<compile_context>
chip_gen: v7x
topology: tpu7x:2x2x1
jax: 0.10.0
libtpu: 0.0.40
codegen_flags: <defaults>
</compile_context>

<pallas_src>
import numpy as np
import jax
import jax.numpy as jnp
from jax import lax
from jax.experimental import pallas as pl
from jax.experimental.pallas import tpu as pltpu


def _lstm_kernel(xlen_ref, x_ref, wih_ref, whh_ref, b_ref, wfc_ref, bfc_ref,
                 y_ref, hn_ref, cn_ref,
                 h_sc, c_sc, gx_sc):
    T_c, B_blk, _ = x_ref.shape
    H = h_sc.shape[1]                       # padded hidden size (multiple of 128)
    tc_idx = pl.program_id(1)               # time-chunk index (inner, "arbitrary")

    # Zero initial hidden/cell state at the first time chunk of each batch block.
    @pl.when(tc_idx == 0)
    def _():
        h_sc[...] = jnp.zeros_like(h_sc)
        c_sc[...] = jnp.zeros_like(c_sc)

    # Hoisted input projection for the whole chunk: one MXU matmul + one bias add.
    gx_sc[...] = (jnp.dot(x_ref[...].reshape(T_c * B_blk, -1), wih_ref[...],
                          preferred_element_type=jnp.float32)
                  + b_ref[...]).reshape(T_c, B_blk, 4 * H)

    whh = whh_ref[...]                      # [H_p, 4H_p]
    wfc = wfc_ref[...]                      # [H_p, D_out_p]
    bfc = bfc_ref[...]                      # [1, D_out_p]
    xlen = xlen_ref[...]                    # [B_blk, 1] int32
    t0 = tc_idx * T_c

    def step(t, carry):
        h_old = h_sc[...]
        gates = gx_sc[t] + jnp.dot(h_old.astype(whh.dtype), whh,
                                   preferred_element_type=jnp.float32)   # [B, 4H_p]
        # Gate slices are 128-lane aligned because H is padded to a multiple of 128.
        i = jax.nn.sigmoid(gates[:, 0 * H:1 * H])
        f = jax.nn.sigmoid(gates[:, 1 * H:2 * H])
        g = jnp.tanh(gates[:, 2 * H:3 * H])
        o = jax.nn.sigmoid(gates[:, 3 * H:4 * H])
        c_new = f * c_sc[...] + i * g
        h_new = o * jnp.tanh(c_new)
        # packed-sequence semantics: freeze state past each sequence's length,
        # zero the padded output positions.
        m = (t0 + t) < xlen                 # [B_blk, 1] bool, broadcasts over H
        c_sc[...] = jnp.where(m, c_new, c_sc[...])
        h_sc[...] = jnp.where(m, h_new, h_old)
        h_out = jnp.where(m, h_new, 0.0)
        # Fused Linear head (lane-dense store into the y chunk).
        y_ref[t] = (jnp.dot(h_out.astype(wfc.dtype), wfc,
                            preferred_element_type=jnp.float32) + bfc
                    ).astype(y_ref.dtype)
        return carry

    lax.fori_loop(0, T_c, step, 0, unroll=True)

    @pl.when(tc_idx == pl.num_programs(1) - 1)
    def _():
        hn_ref[...] = h_sc[...]
        cn_ref[...] = c_sc[...]


def _round_up(n, m):
    return -(-n // m) * m


def _place_gates(w_t, H, H_p):
    """[rows, 4H] -> [rows, 4H_p]; each PyTorch gate block (i,f,g,o) placed at k*H_p."""
    rows = w_t.shape[0]
    out = jnp.zeros((rows, 4 * H_p), w_t.dtype)
    for k in range(4):
        out = out.at[:, k * H_p:k * H_p + H].set(w_t[:, k * H:(k + 1) * H])
    return out


def lstm_net_forward(xseq, xlen, params, *, compute_dtype=jnp.float32, time_chunk=8):
    """xseq: [B, T, D_in] float (batch_first), xlen: host int array [B]."""
    B, T, D_in = xseq.shape
    H = params["w_hh"].shape[1]
    D_out = params["w_fc"].shape[0]

    # Hardware-friendly padded sizes.
    B_p = _round_up(B, 8)
    H_p = _round_up(H, 128)
    D_out_p = _round_up(D_out, 128)
    T_c = min(int(time_chunk), T)
    T_p = _round_up(T, T_c)

    # Time-major, padded input.
    x_tm = jnp.transpose(xseq.astype(jnp.float32), (1, 0, 2))            # [T, B, D_in]
    x_tm = jnp.pad(x_tm, ((0, T_p - T), (0, B_p - B), (0, 0))).astype(compute_dtype)

    # Per-batch sequence lengths (padded batch rows get 0 -> state stays frozen at 0).
    xlen_v = jnp.zeros((B_p, 1), jnp.int32).at[:B, 0].set(jnp.asarray(xlen, jnp.int32))

    # Weights: pre-transposed, gate blocks re-placed at H_p strides, zero-padded.
    w_ih = jnp.asarray(params["w_ih"], jnp.float32)                      # [4H, D_in]
    w_hh = jnp.asarray(params["w_hh"], jnp.float32)                      # [4H, H]
    b_g = (jnp.asarray(params["b_ih"], jnp.float32)
           + jnp.asarray(params["b_hh"], jnp.float32)).reshape(1, 4 * H)
    w_fc = jnp.asarray(params["w_fc"], jnp.float32)                      # [D_out, H]
    b_fc = jnp.asarray(params["b_fc"], jnp.float32)                      # [D_out]

    wih_t = _place_gates(w_ih.T, H, H_p).astype(compute_dtype)           # [D_in, 4H_p]
    whh_t = jnp.zeros((H_p, 4 * H_p), jnp.float32
                      ).at[:H].set(_place_gates(w_hh.T, H, H_p)).astype(compute_dtype)
    bias = _place_gates(b_g, H, H_p)                                     # [1, 4H_p] f32
    wfc_t = jnp.zeros((H_p, D_out_p), jnp.float32
                      ).at[:H, :D_out].set(w_fc.T).astype(compute_dtype)
    bfc_p = jnp.zeros((1, D_out_p), jnp.float32).at[0, :D_out].set(b_fc)

    # Batch axis: one block per "parallel" grid point (split across TCs on v7x
    # when B_p is tiled; here one block is enough for the small demo).
    B_blk = B_p
    grid = (B_p // B_blk, T_p // T_c)

    y_tm, h_n, c_n = pl.pallas_call(
        _lstm_kernel,
        out_shape=(jax.ShapeDtypeStruct((T_p, B_p, D_out_p), jnp.float32),
                   jax.ShapeDtypeStruct((B_p, H_p), jnp.float32),
                   jax.ShapeDtypeStruct((B_p, H_p), jnp.float32)),
        grid_spec=pltpu.PrefetchScalarGridSpec(
            num_scalar_prefetch=0,
            grid=grid,
            in_specs=[
                pl.BlockSpec((B_blk, 1), lambda b, t: (b, 0)),                 # xlen
                pl.BlockSpec((T_c, B_blk, D_in), lambda b, t: (t, b, 0)),      # x chunk
                pl.BlockSpec(wih_t.shape, lambda b, t: (0, 0)),                # W_ih^T
                pl.BlockSpec(whh_t.shape, lambda b, t: (0, 0)),                # W_hh^T
                pl.BlockSpec(bias.shape, lambda b, t: (0, 0)),                 # b_ih+b_hh
                pl.BlockSpec(wfc_t.shape, lambda b, t: (0, 0)),                # W_fc^T
                pl.BlockSpec(bfc_p.shape, lambda b, t: (0, 0)),                # b_fc
            ],
            out_specs=(
                pl.BlockSpec((T_c, B_blk, D_out_p), lambda b, t: (t, b, 0)),   # y chunk
                pl.BlockSpec((B_blk, H_p), lambda b, t: (b, 0)),               # h_n
                pl.BlockSpec((B_blk, H_p), lambda b, t: (b, 0)),               # c_n
            ),
            scratch_shapes=[
                pltpu.VMEM((B_blk, H_p), jnp.float32),                 # h state (carried)
                pltpu.VMEM((B_blk, H_p), jnp.float32),                 # c state (carried)
                pltpu.VMEM((T_c, B_blk, 4 * H_p), jnp.float32),        # hoisted x-projection
            ],
        ),
        compiler_params=pltpu.CompilerParams(
            dimension_semantics=("parallel", "arbitrary")),
    )(xlen_v, x_tm, wih_t, whh_t, bias, wfc_t, bfc_p)

    # pad_packed_sequence trims time to the longest sequence; drop all padding.
    T_out = int(np.max(np.asarray(xlen)))
    padded_y = jnp.transpose(y_tm, (1, 0, 2))[:B, :T_out, :D_out]        # [B, T_out, D_out]
    last_hidden = (h_n[:B, :H][None, :, :], c_n[:B, :H][None, :, :])     # ([1,B,H], [1,B,H])
    return padded_y, last_hidden


# ---------------------------------------------------------------------------
# Pure-numpy reference (same semantics as the PyTorch module) for verification.
def _ref_forward(xseq, xlen, p):
    sig = lambda z: 1.0 / (1.0 + np.exp(-z))
    B, T, _ = xseq.shape
    H = p["w_hh"].shape[1]
    h = np.zeros((B, H), np.float32)
    c = np.zeros((B, H), np.float32)
    outs = np.zeros((B, T, H), np.float32)
    for t in range(T):
        gates = xseq[:, t] @ p["w_ih"].T + p["b_ih"] + h @ p["w_hh"].T + p["b_hh"]
        i = sig(gates[:, :H]); f = sig(gates[:, H:2 * H])
        g = np.tanh(gates[:, 2 * H:3 * H]); o = sig(gates[:, 3 * H:4 * H])
        c_new = f * c + i * g
        h_new = o * np.tanh(c_new)
        m = (t < xlen).astype(np.float32)[:, None]
        c = m * c_new + (1.0 - m) * c
        h = m * h_new + (1.0 - m) * h
        outs[:, t] = m * h_new
    T_out = int(xlen.max())
    y = outs[:, :T_out] @ p["w_fc"].T + p["b_fc"]
    return y, h, c


if __name__ == "__main__":
    D_in, H, D_out = 16, 32, 8
    B, T = 4, 16

    key = jax.random.PRNGKey(0)
    ks = jax.random.split(key, 8)
    s = 1.0 / np.sqrt(H)
    params = {
        "w_ih": jax.random.uniform(ks[0], (4 * H, D_in), jnp.float32, -s, s),
        "w_hh": jax.random.uniform(ks[1], (4 * H, H), jnp.float32, -s, s),
        "b_ih": jax.random.uniform(ks[2], (4 * H,), jnp.float32, -s, s),
        "b_hh": jax.random.uniform(ks[3], (4 * H,), jnp.float32, -s, s),
        "w_fc": jax.random.uniform(ks[4], (D_out, H), jnp.float32, -s, s),
        "b_fc": jax.random.uniform(ks[5], (D_out,), jnp.float32, -s, s),
    }

    xseq = jax.random.normal(ks[6], (B, T, D_in), jnp.float32)
    xlen = np.array([16, 9, 3, 12], dtype=np.int32)   # variable-length sequences

    # f32 compute (use compute_dtype=jnp.bfloat16 for the matmul operands on v6e/v7x).
    padded_y, (h_n, c_n) = lstm_net_forward(xseq, xlen, params,
                                            compute_dtype=jnp.float32, time_chunk=8)
    jax.block_until_ready((padded_y, h_n, c_n))

    # verify against the numpy reference
    np_params = {k: np.asarray(v) for k, v in params.items()}
    y_ref, h_ref, c_ref = _ref_forward(np.asarray(xseq), xlen, np_params)
    np.testing.assert_allclose(np.asarray(padded_y), y_ref, atol=1e-3, rtol=1e-3)
    np.testing.assert_allclose(np.asarray(h_n[0]), h_ref, atol=1e-3, rtol=1e-3)
    np.testing.assert_allclose(np.asarray(c_n[0]), c_ref, atol=1e-3, rtol=1e-3)

    print("KERNEL_OK")
</pallas_src>

<mosaic_0001>
module attributes {stable_mosaic.version = 11 : i64} {
  func.func @_lstm_kernel(%arg0: i32, %arg1: i32, %arg2: memref<8x1xi32, #tpu.memory_space<vmem>>, %arg3: memref<8x8x16xf32, #tpu.memory_space<vmem>>, %arg4: memref<16x512xf32, #tpu.memory_space<vmem>>, %arg5: memref<128x512xf32, #tpu.memory_space<vmem>>, %arg6: memref<1x512xf32, #tpu.memory_space<vmem>>, %arg7: memref<128x128xf32, #tpu.memory_space<vmem>>, %arg8: memref<1x128xf32, #tpu.memory_space<vmem>>, %arg9: memref<8x8x128xf32, #tpu.memory_space<vmem>>, %arg10: memref<8x128xf32, #tpu.memory_space<vmem>>, %arg11: memref<8x128xf32, #tpu.memory_space<vmem>>, %arg12: memref<8x128xf32, #tpu.memory_space<vmem>>, %arg13: memref<8x128xf32, #tpu.memory_space<vmem>>, %arg14: memref<8x8x512xf32, #tpu.memory_space<vmem>>) attributes {dimension_semantics = [#tpu.dimension_semantics<parallel>, #tpu.dimension_semantics<arbitrary>], iteration_bounds = array<i64: 1, 2>, scalar_prefetch = 0 : i64, scratch_operands = 3 : i64, tpu.core_type = #tpu.core_type<tc>, window_params = [{transform_indices = @transform_0, window_bounds = array<i64: 8, 1>}, {transform_indices = @transform_1, window_bounds = array<i64: 8, 8, 16>}, {pipeline_mode = #tpu.pipeline_mode<synchronous>, transform_indices = @transform_2, window_bounds = array<i64: 16, 512>}, {pipeline_mode = #tpu.pipeline_mode<synchronous>, transform_indices = @transform_3, window_bounds = array<i64: 128, 512>}, {pipeline_mode = #tpu.pipeline_mode<synchronous>, transform_indices = @transform_4, window_bounds = array<i64: 1, 512>}, {pipeline_mode = #tpu.pipeline_mode<synchronous>, transform_indices = @transform_5, window_bounds = array<i64: 128, 128>}, {pipeline_mode = #tpu.pipeline_mode<synchronous>, transform_indices = @transform_6, window_bounds = array<i64: 1, 128>}, {transform_indices = @transform_7, window_bounds = array<i64: 8, 8, 128>}, {transform_indices = @transform_8, window_bounds = array<i64: 8, 128>}, {transform_indices = @transform_9, window_bounds = array<i64: 8, 128>}]} {
    %c0_i32 = arith.constant 0 : i32
    %0 = arith.cmpi eq, %arg1, %c0_i32 : i32
    %1 = arith.extui %0 : i1 to i32
    %c0_i32_0 = arith.constant 0 : i32
    %2 = arith.cmpi ne, %1, %c0_i32_0 : i32
    scf.if %2 {
      %cst_182 = arith.constant 0.000000e+00 : f32
      %460 = vector.broadcast %cst_182 : f32 to vector<8x128xf32>
      %c0_183 = arith.constant 0 : index
      %c0_184 = arith.constant 0 : index
      %461 = vector.load %arg12[%c0_183, %c0_184] : memref<8x128xf32, #tpu.memory_space<vmem>>, vector<8x128xf32>
      tpu.vector_store %arg12[%c0_183, %c0_184], %460 {strides = array<i32>} : memref<8x128xf32, #tpu.memory_space<vmem>>, vector<8x128xf32>,
      %cst_185 = arith.constant 0.000000e+00 : f32
      %462 = vector.broadcast %cst_185 : f32 to vector<8x128xf32>
      %c0_186 = arith.constant 0 : index
      %c0_187 = arith.constant 0 : index
      %463 = vector.load %arg13[%c0_186, %c0_187] : memref<8x128xf32, #tpu.memory_space<vmem>>, vector<8x128xf32>
      tpu.vector_store %arg13[%c0_186, %c0_187], %462 {strides = array<i32>} : memref<8x128xf32, #tpu.memory_space<vmem>>, vector<8x128xf32>,
    } else {
    }
    %c0 = arith.constant 0 : index
    %c0_1 = arith.constant 0 : index
    %c0_2 = arith.constant 0 : index
    %3 = vector.load %arg3[%c0, %c0_1, %c0_2] : memref<8x8x16xf32, #tpu.memory_space<vmem>>, vector<8x8x16xf32>
    %4 = vector.shape_cast %3 : vector<8x8x16xf32> to vector<64x16xf32>
    %c0_3 = arith.constant 0 : index
    %c0_4 = arith.constant 0 : index
    %5 = vector.load %arg4[%c0_3, %c0_4] : memref<16x512xf32, #tpu.memory_space<vmem>>, vector<16x512xf32>
    %cst = arith.constant dense<0.000000e+00> : vector<64x512xf32>
    %6 = tpu.matmul %4, %5, %cst {dimension_numbers = #tpu.dot_dimension_numbers<[1], [0], [0], [1], [0, 0, 1, 1], [], []>} : vector<64x16xf32>, vector<16x512xf32>, vector<64x512xf32> -> vector<64x512xf32>
    %c0_5 = arith.constant 0 : index
    %c0_6 = arith.constant 0 : index
    %7 = vector.load %arg6[%c0_5, %c0_6] : memref<1x512xf32, #tpu.memory_space<vmem>>, vector<1x512xf32>
    %8 = vector.broadcast %7 : vector<1x512xf32> to vector<64x512xf32>
    %9 = arith.addf %6, %8 : vector<64x512xf32>
    %10 = vector.shape_cast %9 : vector<64x512xf32> to vector<8x8x512xf32>
    %c0_7 = arith.constant 0 : index
    %c0_8 = arith.constant 0 : index
    %c0_9 = arith.constant 0 : index
    %11 = vector.load %arg14[%c0_7, %c0_8, %c0_9] : memref<8x8x512xf32, #tpu.memory_space<vmem>>, vector<8x8x512xf32>
    tpu.vector_store %arg14[%c0_7, %c0_8, %c0_9], %10 {strides = array<i32>} : memref<8x8x512xf32, #tpu.memory_space<vmem>>, vector<8x8x512xf32>,
    %c0_10 = arith.constant 0 : index
    %c0_11 = arith.constant 0 : index
    %12 = vector.load %arg5[%c0_10, %c0_11] : memref<128x512xf32, #tpu.memory_space<vmem>>, vector<128x512xf32>
    %c0_12 = arith.constant 0 : index
    %c0_13 = arith.constant 0 : index
    %13 = vector.load %arg7[%c0_12, %c0_13] : memref<128x128xf32, #tpu.memory_space<vmem>>, vector<128x128xf32>
    %c0_14 = arith.constant 0 : index
    %c0_15 = arith.constant 0 : index
    %14 = vector.load %arg8[%c0_14, %c0_15] : memref<1x128xf32, #tpu.memory_space<vmem>>, vector<1x128xf32>
    %c0_16 = arith.constant 0 : index
    %c0_17 = arith.constant 0 : index
    %15 = vector.load %arg2[%c0_16, %c0_17] : memref<8x1xi32, #tpu.memory_space<vmem>>, vector<8x1xi32>
    %c8_i32 = arith.constant 8 : i32
    %16 = arith.muli %arg1, %c8_i32 : i32
    %c0_i32_18 = arith.constant 0 : i32
    %c0_19 = arith.constant 0 : index
    %c0_20 = arith.constant 0 : index
    %17 = vector.load %arg12[%c0_19, %c0_20] : memref<8x128xf32, #tpu.memory_space<vmem>>, vector<8x128xf32>
    %18 = arith.index_cast %c0_i32_18 : i32 to index
    %c0_21 = arith.constant 0 : index
    %c0_22 = arith.constant 0 : index
    %19 = vector.load %arg14[%18, %c0_21, %c0_22] : memref<8x8x512xf32, #tpu.memory_space<vmem>>, vector<1x8x512xf32>
    %20 = vector.shape_cast %19 : vector<1x8x512xf32> to vector<8x512xf32>
    %cst_23 = arith.constant dense<0.000000e+00> : vector<8x512xf32>
    %21 = tpu.matmul %17, %12, %cst_23 {dimension_numbers = #tpu.dot_dimension_numbers<[1], [0], [0], [1], [0, 0, 1, 1], [], []>} : vector<8x128xf32>, vector<128x512xf32>, vector<8x512xf32> -> vector<8x512xf32>
    %22 = arith.addf %20, %21 : vector<8x512xf32>
    %23 = vector.extract_strided_slice %22 {offsets = [0, 0], sizes = [8, 128], strides = [1, 1]} : vector<8x512xf32> to vector<8x128xf32>
    %24 = arith.negf %23 : vector<8x128xf32>
    %25 = math.exp %24 : vector<8x128xf32>
    %cst_24 = arith.constant 1.000000e+00 : f32
    %26 = vector.broadcast %cst_24 : f32 to vector<8x128xf32>
    %27 = arith.addf %26, %25 : vector<8x128xf32>
    %28 = arith.divf %26, %27 : vector<8x128xf32>
    %29 = vector.extract_strided_slice %22 {offsets = [0, 128], sizes = [8, 128], strides = [1, 1]} : vector<8x512xf32> to vector<8x128xf32>
    %30 = arith.negf %29 : vector<8x128xf32>
    %31 = math.exp %30 : vector<8x128xf32>
    %cst_25 = arith.constant 1.000000e+00 : f32
    %32 = vector.broadcast %cst_25 : f32 to vector<8x128xf32>
    %33 = arith.addf %32, %31 : vector<8x128xf32>
    %34 = arith.divf %32, %33 : vector<8x128xf32>
    %35 = vector.extract_strided_slice %22 {offsets = [0, 256], sizes = [8, 128], strides = [1, 1]} : vector<8x512xf32> to vector<8x128xf32>
    %36 = math.tanh %35 : vector<8x128xf32>
    %37 = vector.extract_strided_slice %22 {offsets = [0, 384], sizes = [8, 128], strides = [1, 1]} : vector<8x512xf32> to vector<8x128xf32>
    %38 = arith.negf %37 : vector<8x128xf32>
    %39 = math.exp %38 : vector<8x128xf32>
    %cst_26 = arith.constant 1.000000e+00 : f32
    %40 = vector.broadcast %cst_26 : f32 to vector<8x128xf32>
    %41 = arith.addf %40, %39 : vector<8x128xf32>
    %42 = arith.divf %40, %41 : vector<8x128xf32>
    %c0_27 = arith.constant 0 : index
    %c0_28 = arith.constant 0 : index
    %43 = vector.load %arg13[%c0_27, %c0_28] : memref<8x128xf32, #tpu.memory_space<vmem>>, vector<8x128xf32>
    %44 = arith.mulf %34, %43 : vector<8x128xf32>
    %45 = arith.mulf %28, %36 : vector<8x128xf32>
    %46 = arith.addf %44, %45 : vector<8x128xf32>
    %47 = math.tanh %46 : vector<8x128xf32>
    %48 = arith.mulf %42, %47 : vector<8x128xf32>
    %49 = arith.addi %16, %c0_i32_18 : i32
    %50 = vector.broadcast %49 : i32 to vector<8x1xi32>
    %51 = arith.cmpi slt, %50, %15 : vector<8x1xi32>
    %c0_29 = arith.constant 0 : index
    %c0_30 = arith.constant 0 : index
    %52 = vector.load %arg13[%c0_29, %c0_30] : memref<8x128xf32, #tpu.memory_space<vmem>>, vector<8x128xf32>
    %53 = vector.shape_cast %51 : vector<8x1xi1> to vector<8x1xi1>
    %54 = vector.broadcast %53 : vector<8x1xi1> to vector<8x128xi1>
    %55 = arith.select %54, %46, %52 : vector<8x128xi1>, vector<8x128xf32>
    %c0_31 = arith.constant 0 : index
    %c0_32 = arith.constant 0 : index
    %56 = vector.load %arg13[%c0_31, %c0_32] : memref<8x128xf32, #tpu.memory_space<vmem>>, vector<8x128xf32>
    tpu.vector_store %arg13[%c0_31, %c0_32], %55 {strides = array<i32>} : memref<8x128xf32, #tpu.memory_space<vmem>>, vector<8x128xf32>,
    %57 = vector.shape_cast %51 : vector<8x1xi1> to vector<8x1xi1>
    %58 = vector.broadcast %57 : vector<8x1xi1> to vector<8x128xi1>
    %59 = arith.select %58, %48, %17 : vector<8x128xi1>, vector<8x128xf32>
    %c0_33 = arith.constant 0 : index
    %c0_34 = arith.constant 0 : index
    %60 = vector.load %arg12[%c0_33, %c0_34] : memref<8x128xf32, #tpu.memory_space<vmem>>, vector<8x128xf32>
    tpu.vector_store %arg12[%c0_33, %c0_34], %59 {strides = array<i32>} : memref<8x128xf32, #tpu.memory_space<vmem>>, vector<8x128xf32>,
    %cst_35 = arith.constant 0.000000e+00 : f32
    %61 = vector.shape_cast %51 : vector<8x1xi1> to vector<8x1xi1>
    %62 = vector.broadcast %61 : vector<8x1xi1> to vector<8x128xi1>
    %63 = vector.broadcast %cst_35 : f32 to vector<8x128xf32>
    %64 = arith.select %62, %48, %63 : vector<8x128xi1>, vector<8x128xf32>
    %cst_36 = arith.constant dense<0.000000e+00> : vector<8x128xf32>
    %65 = tpu.matmul %64, %13, %cst_36 {dimension_numbers = #tpu.dot_dimension_numbers<[1], [0], [0], [1], [0, 0, 1, 1], [], []>} : vector<8x128xf32>, vector<128x128xf32>, vector<8x128xf32> -> vector<8x128xf32>
    %66 = vector.broadcast %14 : vector<1x128xf32> to vector<8x128xf32>
    %67 = arith.addf %65, %66 : vector<8x128xf32>
    %68 = arith.index_cast %c0_i32_18 : i32 to index
    %c0_37 = arith.constant 0 : index
    %c0_38 = arith.constant 0 : index
    %69 = vector.load %arg9[%68, %c0_37, %c0_38] : memref<8x8x128xf32, #tpu.memory_space<vmem>>, vector<1x8x128xf32>
    %70 = vector.shape_cast %69 : vector<1x8x128xf32> to vector<8x128xf32>
    %71 = vector.shape_cast %67 : vector<8x128xf32> to vector<1x8x128xf32>
    tpu.vector_store %arg9[%68, %c0_37, %c0_38], %71 {strides = array<i32>} : memref<8x8x128xf32, #tpu.memory_space<vmem>>, vector<1x8x128xf32>,
    %c1_i32 = arith.constant 1 : i32
    %c0_39 = arith.constant 0 : index
    %c0_40 = arith.constant 0 : index
    %72 = vector.load %arg12[%c0_39, %c0_40] : memref<8x128xf32, #tpu.memory_space<vmem>>, vector<8x128xf32>
    %73 = arith.index_cast %c1_i32 : i32 to index
    %c0_41 = arith.constant 0 : index
    %c0_42 = arith.constant 0 : index
    %74 = vector.load %arg14[%73, %c0_41, %c0_42] : memref<8x8x512xf32, #tpu.memory_space<vmem>>, vector<1x8x512xf32>
    %75 = vector.shape_cast %74 : vector<1x8x512xf32> to vector<8x512xf32>
    %cst_43 = arith.constant dense<0.000000e+00> : vector<8x512xf32>
    %76 = tpu.matmul %72, %12, %cst_43 {dimension_numbers = #tpu.dot_dimension_numbers<[1], [0], [0], [1], [0, 0, 1, 1], [], []>} : vector<8x128xf32>, vector<128x512xf32>, vector<8x512xf32> -> vector<8x512xf32>
    %77 = arith.addf %75, %76 : vector<8x512xf32>
    %78 = vector.extract_strided_slice %77 {offsets = [0, 0], sizes = [8, 128], strides = [1, 1]} : vector<8x512xf32> to vector<8x128xf32>
    %79 = arith.negf %78 : vector<8x128xf32>
    %80 = math.exp %79 : vector<8x128xf32>
    %cst_44 = arith.constant 1.000000e+00 : f32
    %81 = vector.broadcast %cst_44 : f32 to vector<8x128xf32>
    %82 = arith.addf %81, %80 : vector<8x128xf32>
    %83 = arith.divf %81, %82 : vector<8x128xf32>
    %84 = vector.extract_strided_slice %77 {offsets = [0, 128], sizes = [8, 128], strides = [1, 1]} : vector<8x512xf32> to vector<8x128xf32>
    %85 = arith.negf %84 : vector<8x128xf32>
    %86 = math.exp %85 : vector<8x128xf32>
    %cst_45 = arith.constant 1.000000e+00 : f32
    %87 = vector.broadcast %cst_45 : f32 to vector<8x128xf32>
    %88 = arith.addf %87, %86 : vector<8x128xf32>
    %89 = arith.divf %87, %88 : vector<8x128xf32>
    %90 = vector.extract_strided_slice %77 {offsets = [0, 256], sizes = [8, 128], strides = [1, 1]} : vector<8x512xf32> to vector<8x128xf32>
    %91 = math.tanh %90 : vector<8x128xf32>
    %92 = vector.extract_strided_slice %77 {offsets = [0, 384], sizes = [8, 128], strides = [1, 1]} : vector<8x512xf32> to vector<8x128xf32>
    %93 = arith.negf %92 : vector<8x128xf32>
    %94 = math.exp %93 : vector<8x128xf32>
    %cst_46 = arith.constant 1.000000e+00 : f32
    %95 = vector.broadcast %cst_46 : f32 to vector<8x128xf32>
    %96 = arith.addf %95, %94 : vector<8x128xf32>
    %97 = arith.divf %95, %96 : vector<8x128xf32>
    %c0_47 = arith.constant 0 : index
    %c0_48 = arith.constant 0 : index
    %98 = vector.load %arg13[%c0_47, %c0_48] : memref<8x128xf32, #tpu.memory_space<vmem>>, vector<8x128xf32>
    %99 = arith.mulf %89, %98 : vector<8x128xf32>
    %100 = arith.mulf %83, %91 : vector<8x128xf32>
    %101 = arith.addf %99, %100 : vector<8x128xf32>
    %102 = math.tanh %101 : vector<8x128xf32>
    %103 = arith.mulf %97, %102 : vector<8x128xf32>
    %104 = arith.addi %16, %c1_i32 : i32
    %105 = vector.broadcast %104 : i32 to vector<8x1xi32>
    %106 = arith.cmpi slt, %105, %15 : vector<8x1xi32>
    %c0_49 = arith.constant 0 : index
    %c0_50 = arith.constant 0 : index
    %107 = vector.load %arg13[%c0_49, %c0_50] : memref<8x128xf32, #tpu.memory_space<vmem>>, vector<8x128xf32>
    %108 = vector.shape_cast %106 : vector<8x1xi1> to vector<8x1xi1>
    %109 = vector.broadcast %108 : vector<8x1xi1> to vector<8x128xi1>
    %110 = arith.select %109, %101, %107 : vector<8x128xi1>, vector<8x128xf32>
    %c0_51 = arith.constant 0 : index
    %c0_52 = arith.constant 0 : index
    %111 = vector.load %arg13[%c0_51, %c0_52] : memref<8x128xf32, #tpu.memory_space<vmem>>, vector<8x128xf32>
    tpu.vector_store %arg13[%c0_51, %c0_52], %110 {strides = array<i32>} : memref<8x128xf32, #tpu.memory_space<vmem>>, vector<8x128xf32>,
    %112 = vector.shape_cast %106 : vector<8x1xi1> to vector<8x1xi1>
    %113 = vector.broadcast %112 : vector<8x1xi1> to vector<8x128xi1>
    %114 = arith.select %113, %103, %72 : vector<8x128xi1>, vector<8x128xf32>
    %c0_53 = arith.constant 0 : index
    %c0_54 = arith.constant 0 : index
    %115 = vector.load %arg12[%c0_53, %c0_54] : memref<8x128xf32, #tpu.memory_space<vmem>>, vector<8x128xf32>
    tpu.vector_store %arg12[%c0_53, %c0_54], %114 {strides = array<i32>} : memref<8x128xf32, #tpu.memory_space<vmem>>, vector<8x128xf32>,
    %cst_55 = arith.constant 0.000000e+00 : f32
    %116 = vector.shape_cast %106 : vector<8x1xi1> to vector<8x1xi1>
    %117 = vector.broadcast %116 : vector<8x1xi1> to vector<8x128xi1>
    %118 = vector.broadcast %cst_55 : f32 to vector<8x128xf32>
    %119 = arith.select %117, %103, %118 : vector<8x128xi1>, vector<8x128xf32>
    %cst_56 = arith.constant dense<0.000000e+00> : vector<8x128xf32>
    %120 = tpu.matmul %119, %13, %cst_56 {dimension_numbers = #tpu.dot_dimension_numbers<[1], [0], [0], [1], [0, 0, 1, 1], [], []>} : vector<8x128xf32>, vector<128x128xf32>, vector<8x128xf32> -> vector<8x128xf32>
    %121 = vector.broadcast %14 : vector<1x128xf32> to vector<8x128xf32>
    %122 = arith.addf %120, %121 : vector<8x128xf32>
    %123 = arith.index_cast %c1_i32 : i32 to index
    %c0_57 = arith.constant 0 : index
    %c0_58 = arith.constant 0 : index
    %124 = vector.load %arg9[%123, %c0_57, %c0_58] : memref<8x8x128xf32, #tpu.memory_space<vmem>>, vector<1x8x128xf32>
    %125 = vector.shape_cast %124 : vector<1x8x128xf32> to vector<8x128xf32>
    %126 = vector.shape_cast %122 : vector<8x128xf32> to vector<1x8x128xf32>
    tpu.vector_store %arg9[%123, %c0_57, %c0_58], %126 {strides = array<i32>} : memref<8x8x128xf32, #tpu.memory_space<vmem>>, vector<1x8x128xf32>,
    %c2_i32 = arith.constant 2 : i32
    %c0_59 = arith.constant 0 : index
    %c0_60 = arith.constant 0 : index
    %127 = vector.load %arg12[%c0_59, %c0_60] : memref<8x128xf32, #tpu.memory_space<vmem>>, vector<8x128xf32>
    %128 = arith.index_cast %c2_i32 : i32 to index
    %c0_61 = arith.constant 0 : index
    %c0_62 = arith.constant 0 : index
    %129 = vector.load %arg14[%128, %c0_61, %c0_62] : memref<8x8x512xf32, #tpu.memory_space<vmem>>, vector<1x8x512xf32>
    %130 = vector.shape_cast %129 : vector<1x8x512xf32> to vector<8x512xf32>
    %cst_63 = arith.constant dense<0.000000e+00> : vector<8x512xf32>
    %131 = tpu.matmul %127, %12, %cst_63 {dimension_numbers = #tpu.dot_dimension_numbers<[1], [0], [0], [1], [0, 0, 1, 1], [], []>} : vector<8x128xf32>, vector<128x512xf32>, vector<8x512xf32> -> vector<8x512xf32>
    %132 = arith.addf %130, %131 : vector<8x512xf32>
    %133 = vector.extract_strided_slice %132 {offsets = [0, 0], sizes = [8, 128], strides = [1, 1]} : vector<8x512xf32> to vector<8x128xf32>
    %134 = arith.negf %133 : vector<8x128xf32>
    %135 = math.exp %134 : vector<8x128xf32>
    %cst_64 = arith.constant 1.000000e+00 : f32
    %136 = vector.broadcast %cst_64 : f32 to vector<8x128xf32>
    %137 = arith.addf %136, %135 : vector<8x128xf32>
    %138 = arith.divf %136, %137 : vector<8x128xf32>
    %139 = vector.extract_strided_slice %132 {offsets = [0, 128], sizes = [8, 128], strides = [1, 1]} : vector<8x512xf32> to vector<8x128xf32>
    %140 = arith.negf %139 : vector<8x128xf32>
    %141 = math.exp %140 : vector<8x128xf32>
    %cst_65 = arith.constant 1.000000e+00 : f32
    %142 = vector.broadcast %cst_65 : f32 to vector<8x128xf32>
    %143 = arith.addf %142, %141 : vector<8x128xf32>
    %144 = arith.divf %142, %143 : vector<8x128xf32>
    %145 = vector.extract_strided_slice %132 {offsets = [0, 256], sizes = [8, 128], strides = [1, 1]} : vector<8x512xf32> to vector<8x128xf32>
    %146 = math.tanh %145 : vector<8x128xf32>
    %147 = vector.extract_strided_slice %132 {offsets = [0, 384], sizes = [8, 128], strides = [1, 1]} : vector<8x512xf32> to vector<8x128xf32>
    %148 = arith.negf %147 : vector<8x128xf32>
    %149 = math.exp %148 : vector<8x128xf32>
    %cst_66 = arith.constant 1.000000e+00 : f32
    %150 = vector.broadcast %cst_66 : f32 to vector<8x128xf32>
    %151 = arith.addf %150, %149 : vector<8x128xf32>
    %152 = arith.divf %150, %151 : vector<8x128xf32>
    %c0_67 = arith.constant 0 : index
    %c0_68 = arith.constant 0 : index
    %153 = vector.load %arg13[%c0_67, %c0_68] : memref<8x128xf32, #tpu.memory_space<vmem>>, vector<8x128xf32>
    %154 = arith.mulf %144, %153 : vector<8x128xf32>
    %155 = arith.mulf %138, %146 : vector<8x128xf32>
    %156 = arith.addf %154, %155 : vector<8x128xf32>
    %157 = math.tanh %156 : vector<8x128xf32>
    %158 = arith.mulf %152, %157 : vector<8x128xf32>
    %159 = arith.addi %16, %c2_i32 : i32
    %160 = vector.broadcast %159 : i32 to vector<8x1xi32>
    %161 = arith.cmpi slt, %160, %15 : vector<8x1xi32>
    %c0_69 = arith.constant 0 : index
    %c0_70 = arith.constant 0 : index
    %162 = vector.load %arg13[%c0_69, %c0_70] : memref<8x128xf32, #tpu.memory_space<vmem>>, vector<8x128xf32>
    %163 = vector.shape_cast %161 : vector<8x1xi1> to vector<8x1xi1>
    %164 = vector.broadcast %163 : vector<8x1xi1> to vector<8x128xi1>
    %165 = arith.select %164, %156, %162 : vector<8x128xi1>, vector<8x128xf32>
    %c0_71 = arith.constant 0 : index
    %c0_72 = arith.constant 0 : index
    %166 = vector.load %arg13[%c0_71, %c0_72] : memref<8x128xf32, #tpu.memory_space<vmem>>, vector<8x128xf32>
    tpu.vector_store %arg13[%c0_71, %c0_72], %165 {strides = array<i32>} : memref<8x128xf32, #tpu.memory_space<vmem>>, vector<8x128xf32>,
    %167 = vector.shape_cast %161 : vector<8x1xi1> to vector<8x1xi1>
    %168 = vector.broadcast %167 : vector<8x1xi1> to vector<8x128xi1>
    %169 = arith.select %168, %158, %127 : vector<8x128xi1>, vector<8x128xf32>
    %c0_73 = arith.constant 0 : index
    %c0_74 = arith.constant 0 : index
    %170 = vector.load %arg12[%c0_73, %c0_74] : memref<8x128xf32, #tpu.memory_space<vmem>>, vector<8x128xf32>
    tpu.vector_store %arg12[%c0_73, %c0_74], %169 {strides = array<i32>} : memref<8x128xf32, #tpu.memory_space<vmem>>, vector<8x128xf32>,
    %cst_75 = arith.constant 0.000000e+00 : f32
    %171 = vector.shape_cast %161 : vector<8x1xi1> to vector<8x1xi1>
    %172 = vector.broadcast %171 : vector<8x1xi1> to vector<8x128xi1>
    %173 = vector.broadcast %cst_75 : f32 to vector<8x128xf32>
    %174 = arith.select %172, %158, %173 : vector<8x128xi1>, vector<8x128xf32>
    %cst_76 = arith.constant dense<0.000000e+00> : vector<8x128xf32>
    %175 = tpu.matmul %174, %13, %cst_76 {dimension_numbers = #tpu.dot_dimension_numbers<[1], [0], [0], [1], [0, 0, 1, 1], [], []>} : vector<8x128xf32>, vector<128x128xf32>, vector<8x128xf32> -> vector<8x128xf32>
    %176 = vector.broadcast %14 : vector<1x128xf32> to vector<8x128xf32>
    %177 = arith.addf %175, %176 : vector<8x128xf32>
    %178 = arith.index_cast %c2_i32 : i32 to index
    %c0_77 = arith.constant 0 : index
    %c0_78 = arith.constant 0 : index
    %179 = vector.load %arg9[%178, %c0_77, %c0_78] : memref<8x8x128xf32, #tpu.memory_space<vmem>>, vector<1x8x128xf32>
    %180 = vector.shape_cast %179 : vector<1x8x128xf32> to vector<8x128xf32>
    %181 = vector.shape_cast %177 : vector<8x128xf32> to vector<1x8x128xf32>
    tpu.vector_store %arg9[%178, %c0_77, %c0_78], %181 {strides = array<i32>} : memref<8x8x128xf32, #tpu.memory_space<vmem>>, vector<1x8x128xf32>,
    %c3_i32 = arith.constant 3 : i32
    %c0_79 = arith.constant 0 : index
    %c0_80 = arith.constant 0 : index
    %182 = vector.load %arg12[%c0_79, %c0_80] : memref<8x128xf32, #tpu.memory_space<vmem>>, vector<8x128xf32>
    %183 = arith.index_cast %c3_i32 : i32 to index
    %c0_81 = arith.constant 0 : index
    %c0_82 = arith.constant 0 : index
    %184 = vector.load %arg14[%183, %c0_81, %c0_82] : memref<8x8x512xf32, #tpu.memory_space<vmem>>, vector<1x8x512xf32>
    %185 = vector.shape_cast %184 : vector<1x8x512xf32> to vector<8x512xf32>
    %cst_83 = arith.constant dense<0.000000e+00> : vector<8x512xf32>
    %186 = tpu.matmul %182, %12, %cst_83 {dimension_numbers = #tpu.dot_dimension_numbers<[1], [0], [0], [1], [0, 0, 1, 1], [], []>} : vector<8x128xf32>, vector<128x512xf32>, vector<8x512xf32> -> vector<8x512xf32>
    %187 = arith.addf %185, %186 : vector<8x512xf32>
    %188 = vector.extract_strided_slice %187 {offsets = [0, 0], sizes = [8, 128], strides = [1, 1]} : vector<8x512xf32> to vector<8x128xf32>
    %189 = arith.negf %188 : vector<8x128xf32>
    %190 = math.exp %189 : vector<8x128xf32>
    %cst_84 = arith.constant 1.000000e+00 : f32
    %191 = vector.broadcast %cst_84 : f32 to vector<8x128xf32>
    %192 = arith.addf %191, %190 : vector<8x128xf32>
    %193 = arith.divf %191, %192 : vector<8x128xf32>
    %194 = vector.extract_strided_slice %187 {offsets = [0, 128], sizes = [8, 128], strides = [1, 1]} : vector<8x512xf32> to vector<8x128xf32>
    %195 = arith.negf %194 : vector<8x128xf32>
    %196 = math.exp %195 : vector<8x128xf32>
    %cst_85 = arith.constant 1.000000e+00 : f32
    %197 = vector.broadcast %cst_85 : f32 to vector<8x128xf32>
    %198 = arith.addf %197, %196 : vector<8x128xf32>
    %199 = arith.divf %197, %198 : vector<8x128xf32>
    %200 = vector.extract_strided_slice %187 {offsets = [0, 256], sizes = [8, 128], strides = [1, 1]} : vector<8x512xf32> to vector<8x128xf32>
    %201 = math.tanh %200 : vector<8x128xf32>
    %202 = vector.extract_strided_slice %187 {offsets = [0, 384], sizes = [8, 128], strides = [1, 1]} : vector<8x512xf32> to vector<8x128xf32>
    %203 = arith.negf %202 : vector<8x128xf32>
    %204 = math.exp %203 : vector<8x128xf32>
    %cst_86 = arith.constant 1.000000e+00 : f32
    %205 = vector.broadcast %cst_86 : f32 to vector<8x128xf32>
    %206 = arith.addf %205, %204 : vector<8x128xf32>
    %207 = arith.divf %205, %206 : vector<8x128xf32>
    %c0_87 = arith.constant 0 : index
    %c0_88 = arith.constant 0 : index
    %208 = vector.load %arg13[%c0_87, %c0_88] : memref<8x128xf32, #tpu.memory_space<vmem>>, vector<8x128xf32>
    %209 = arith.mulf %199, %208 : vector<8x128xf32>
    %210 = arith.mulf %193, %201 : vector<8x128xf32>
    %211 = arith.addf %209, %210 : vector<8x128xf32>
    %212 = math.tanh %211 : vector<8x128xf32>
    %213 = arith.mulf %207, %212 : vector<8x128xf32>
    %214 = arith.addi %16, %c3_i32 : i32
    %215 = vector.broadcast %214 : i32 to vector<8x1xi32>
    %216 = arith.cmpi slt, %215, %15 : vector<8x1xi32>
    %c0_89 = arith.constant 0 : index
    %c0_90 = arith.constant 0 : index
    %217 = vector.load %arg13[%c0_89, %c0_90] : memref<8x128xf32, #tpu.memory_space<vmem>>, vector<8x128xf32>
    %218 = vector.shape_cast %216 : vector<8x1xi1> to vector<8x1xi1>
    %219 = vector.broadcast %218 : vector<8x1xi1> to vector<8x128xi1>
    %220 = arith.select %219, %211, %217 : vector<8x128xi1>, vector<8x128xf32>
    %c0_91 = arith.constant 0 : index
    %c0_92 = arith.constant 0 : index
    %221 = vector.load %arg13[%c0_91, %c0_92] : memref<8x128xf32, #tpu.memory_space<vmem>>, vector<8x128xf32>
    tpu.vector_store %arg13[%c0_91, %c0_92], %220 {strides = array<i32>} : memref<8x128xf32, #tpu.memory_space<vmem>>, vector<8x128xf32>,
    %222 = vector.shape_cast %216 : vector<8x1xi1> to vector<8x1xi1>
    %223 = vector.broadcast %222 : vector<8x1xi1> to vector<8x128xi1>
    %224 = arith.select %223, %213, %182 : vector<8x128xi1>, vector<8x128xf32>
    %c0_93 = arith.constant 0 : index
    %c0_94 = arith.constant 0 : index
    %225 = vector.load %arg12[%c0_93, %c0_94] : memref<8x128xf32, #tpu.memory_space<vmem>>, vector<8x128xf32>
    tpu.vector_store %arg12[%c0_93, %c0_94], %224 {strides = array<i32>} : memref<8x128xf32, #tpu.memory_space<vmem>>, vector<8x128xf32>,
    %cst_95 = arith.constant 0.000000e+00 : f32
    %226 = vector.shape_cast %216 : vector<8x1xi1> to vector<8x1xi1>
    %227 = vector.broadcast %226 : vector<8x1xi1> to vector<8x128xi1>
    %228 = vector.broadcast %cst_95 : f32 to vector<8x128xf32>
    %229 = arith.select %227, %213, %228 : vector<8x128xi1>, vector<8x128xf32>
    %cst_96 = arith.constant dense<0.000000e+00> : vector<8x128xf32>
    %230 = tpu.matmul %229, %13, %cst_96 {dimension_numbers = #tpu.dot_dimension_numbers<[1], [0], [0], [1], [0, 0, 1, 1], [], []>} : vector<8x128xf32>, vector<128x128xf32>, vector<8x128xf32> -> vector<8x128xf32>
    %231 = vector.broadcast %14 : vector<1x128xf32> to vector<8x128xf32>
    %232 = arith.addf %230, %231 : vector<8x128xf32>
    %233 = arith.index_cast %c3_i32 : i32 to index
    %c0_97 = arith.constant 0 : index
    %c0_98 = arith.constant 0 : index
    %234 = vector.load %arg9[%233, %c0_97, %c0_98] : memref<8x8x128xf32, #tpu.memory_space<vmem>>, vector<1x8x128xf32>
    %235 = vector.shape_cast %234 : vector<1x8x128xf32> to vector<8x128xf32>
    %236 = vector.shape_cast %232 : vector<8x128xf32> to vector<1x8x128xf32>
    tpu.vector_store %arg9[%233, %c0_97, %c0_98], %236 {strides = array<i32>} : memref<8x8x128xf32, #tpu.memory_space<vmem>>, vector<1x8x128xf32>,
    %c4_i32 = arith.constant 4 : i32
    %c0_99 = arith.constant 0 : index
    %c0_100 = arith.constant 0 : index
    %237 = vector.load %arg12[%c0_99, %c0_100] : memref<8x128xf32, #tpu.memory_space<vmem>>, vector<8x128xf32>
    %238 = arith.index_cast %c4_i32 : i32 to index
    %c0_101 = arith.constant 0 : index
    %c0_102 = arith.constant 0 : index
    %239 = vector.load %arg14[%238, %c0_101, %c0_102] : memref<8x8x512xf32, #tpu.memory_space<vmem>>, vector<1x8x512xf32>
    %240 = vector.shape_cast %239 : vector<1x8x512xf32> to vector<8x512xf32>
    %cst_103 = arith.constant dense<0.000000e+00> : vector<8x512xf32>
    %241 = tpu.matmul %237, %12, %cst_103 {dimension_numbers = #tpu.dot_dimension_numbers<[1], [0], [0], [1], [0, 0, 1, 1], [], []>} : vector<8x128xf32>, vector<128x512xf32>, vector<8x512xf32> -> vector<8x512xf32>
    %242 = arith.addf %240, %241 : vector<8x512xf32>
    %243 = vector.extract_strided_slice %242 {offsets = [0, 0], sizes = [8, 128], strides = [1, 1]} : vector<8x512xf32> to vector<8x128xf32>
    %244 = arith.negf %243 : vector<8x128xf32>
    %245 = math.exp %244 : vector<8x128xf32>
    %cst_104 = arith.constant 1.000000e+00 : f32
    %246 = vector.broadcast %cst_104 : f32 to vector<8x128xf32>
    %247 = arith.addf %246, %245 : vector<8x128xf32>
    %248 = arith.divf %246, %247 : vector<8x128xf32>
    %249 = vector.extract_strided_slice %242 {offsets = [0, 128], sizes = [8, 128], strides = [1, 1]} : vector<8x512xf32> to vector<8x128xf32>
    %250 = arith.negf %249 : vector<8x128xf32>
    %251 = math.exp %250 : vector<8x128xf32>
    %cst_105 = arith.constant 1.000000e+00 : f32
    %252 = vector.broadcast %cst_105 : f32 to vector<8x128xf32>
    %253 = arith.addf %252, %251 : vector<8x128xf32>
    %254 = arith.divf %252, %253 : vector<8x128xf32>
    %255 = vector.extract_strided_slice %242 {offsets = [0, 256], sizes = [8, 128], strides = [1, 1]} : vector<8x512xf32> to vector<8x128xf32>
    %256 = math.tanh %255 : vector<8x128xf32>
    %257 = vector.extract_strided_slice %242 {offsets = [0, 384], sizes = [8, 128], strides = [1, 1]} : vector<8x512xf32> to vector<8x128xf32>
    %258 = arith.negf %257 : vector<8x128xf32>
    %259 = math.exp %258 : vector<8x128xf32>
    %cst_106 = arith.constant 1.000000e+00 : f32
    %260 = vector.broadcast %cst_106 : f32 to vector<8x128xf32>
    %261 = arith.addf %260, %259 : vector<8x128xf32>
    %262 = arith.divf %260, %261 : vector<8x128xf32>
    %c0_107 = arith.constant 0 : index
    %c0_108 = arith.constant 0 : index
    %263 = vector.load %arg13[%c0_107, %c0_108] : memref<8x128xf32, #tpu.memory_space<vmem>>, vector<8x128xf32>
    %264 = arith.mulf %254, %263 : vector<8x128xf32>
    %265 = arith.mulf %248, %256 : vector<8x128xf32>
    %266 = arith.addf %264, %265 : vector<8x128xf32>
    %267 = math.tanh %266 : vector<8x128xf32>
    %268 = arith.mulf %262, %267 : vector<8x128xf32>
    %269 = arith.addi %16, %c4_i32 : i32
    %270 = vector.broadcast %269 : i32 to vector<8x1xi32>
    %271 = arith.cmpi slt, %270, %15 : vector<8x1xi32>
    %c0_109 = arith.constant 0 : index
    %c0_110 = arith.constant 0 : index
    %272 = vector.load %arg13[%c0_109, %c0_110] : memref<8x128xf32, #tpu.memory_space<vmem>>, vector<8x128xf32>
    %273 = vector.shape_cast %271 : vector<8x1xi1> to vector<8x1xi1>
    %274 = vector.broadcast %273 : vector<8x1xi1> to vector<8x128xi1>
    %275 = arith.select %274, %266, %272 : vector<8x128xi1>, vector<8x128xf32>
    %c0_111 = arith.constant 0 : index
    %c0_112 = arith.constant 0 : index
    %276 = vector.load %arg13[%c0_111, %c0_112] : memref<8x128xf32, #tpu.memory_space<vmem>>, vector<8x128xf32>
    tpu.vector_store %arg13[%c0_111, %c0_112], %275 {strides = array<i32>} : memref<8x128xf32, #tpu.memory_space<vmem>>, vector<8x128xf32>,
    %277 = vector.shape_cast %271 : vector<8x1xi1> to vector<8x1xi1>
    %278 = vector.broadcast %277 : vector<8x1xi1> to vector<8x128xi1>
    %279 = arith.select %278, %268, %237 : vector<8x128xi1>, vector<8x128xf32>
    %c0_113 = arith.constant 0 : index
    %c0_114 = arith.constant 0 : index
    %280 = vector.load %arg12[%c0_113, %c0_114] : memref<8x128xf32, #tpu.memory_space<vmem>>, vector<8x128xf32>
    tpu.vector_store %arg12[%c0_113, %c0_114], %279 {strides = array<i32>} : memref<8x128xf32, #tpu.memory_space<vmem>>, vector<8x128xf32>,
    %cst_115 = arith.constant 0.000000e+00 : f32
    %281 = vector.shape_cast %271 : vector<8x1xi1> to vector<8x1xi1>
    %282 = vector.broadcast %281 : vector<8x1xi1> to vector<8x128xi1>
    %283 = vector.broadcast %cst_115 : f32 to vector<8x128xf32>
    %284 = arith.select %282, %268, %283 : vector<8x128xi1>, vector<8x128xf32>
    %cst_116 = arith.constant dense<0.000000e+00> : vector<8x128xf32>
    %285 = tpu.matmul %284, %13, %cst_116 {dimension_numbers = #tpu.dot_dimension_numbers<[1], [0], [0], [1], [0, 0, 1, 1], [], []>} : vector<8x128xf32>, vector<128x128xf32>, vector<8x128xf32> -> vector<8x128xf32>
    %286 = vector.broadcast %14 : vector<1x128xf32> to vector<8x128xf32>
    %287 = arith.addf %285, %286 : vector<8x128xf32>
    %288 = arith.index_cast %c4_i32 : i32 to index
    %c0_117 = arith.constant 0 : index
    %c0_118 = arith.constant 0 : index
    %289 = vector.load %arg9[%288, %c0_117, %c0_118] : memref<8x8x128xf32, #tpu.memory_space<vmem>>, vector<1x8x128xf32>
    %290 = vector.shape_cast %289 : vector<1x8x128xf32> to vector<8x128xf32>
    %291 = vector.shape_cast %287 : vector<8x128xf32> to vector<1x8x128xf32>
    tpu.vector_store %arg9[%288, %c0_117, %c0_118], %291 {strides = array<i32>} : memref<8x8x128xf32, #tpu.memory_space<vmem>>, vector<1x8x128xf32>,
    %c5_i32 = arith.constant 5 : i32
    %c0_119 = arith.constant 0 : index
    %c0_120 = arith.constant 0 : index
    %292 = vector.load %arg12[%c0_119, %c0_120] : memref<8x128xf32, #tpu.memory_space<vmem>>, vector<8x128xf32>
    %293 = arith.index_cast %c5_i32 : i32 to index
    %c0_121 = arith.constant 0 : index
    %c0_122 = arith.constant 0 : index
    %294 = vector.load %arg14[%293, %c0_121, %c0_122] : memref<8x8x512xf32, #tpu.memory_space<vmem>>, vector<1x8x512xf32>
    %295 = vector.shape_cast %294 : vector<1x8x512xf32> to vector<8x512xf32>
    %cst_123 = arith.constant dense<0.000000e+00> : vector<8x512xf32>
    %296 = tpu.matmul %292, %12, %cst_123 {dimension_numbers = #tpu.dot_dimension_numbers<[1], [0], [0], [1], [0, 0, 1, 1], [], []>} : vector<8x128xf32>, vector<128x512xf32>, vector<8x512xf32> -> vector<8x512xf32>
    %297 = arith.addf %295, %296 : vector<8x512xf32>
    %298 = vector.extract_strided_slice %297 {offsets = [0, 0], sizes = [8, 128], strides = [1, 1]} : vector<8x512xf32> to vector<8x128xf32>
    %299 = arith.negf %298 : vector<8x128xf32>
    %300 = math.exp %299 : vector<8x128xf32>
    %cst_124 = arith.constant 1.000000e+00 : f32
    %301 = vector.broadcast %cst_124 : f32 to vector<8x128xf32>
    %302 = arith.addf %301, %300 : vector<8x128xf32>
    %303 = arith.divf %301, %302 : vector<8x128xf32>
    %304 = vector.extract_strided_slice %297 {offsets = [0, 128], sizes = [8, 128], strides = [1, 1]} : vector<8x512xf32> to vector<8x128xf32>
    %305 = arith.negf %304 : vector<8x128xf32>
    %306 = math.exp %305 : vector<8x128xf32>
    %cst_125 = arith.constant 1.000000e+00 : f32
    %307 = vector.broadcast %cst_125 : f32 to vector<8x128xf32>
    %308 = arith.addf %307, %306 : vector<8x128xf32>
    %309 = arith.divf %307, %308 : vector<8x128xf32>
    %310 = vector.extract_strided_slice %297 {offsets = [0, 256], sizes = [8, 128], strides = [1, 1]} : vector<8x512xf32> to vector<8x128xf32>
    %311 = math.tanh %310 : vector<8x128xf32>
    %312 = vector.extract_strided_slice %297 {offsets = [0, 384], sizes = [8, 128], strides = [1, 1]} : vector<8x512xf32> to vector<8x128xf32>
    %313 = arith.negf %312 : vector<8x128xf32>
    %314 = math.exp %313 : vector<8x128xf32>
    %cst_126 = arith.constant 1.000000e+00 : f32
    %315 = vector.broadcast %cst_126 : f32 to vector<8x128xf32>
    %316 = arith.addf %315, %314 : vector<8x128xf32>
    %317 = arith.divf %315, %316 : vector<8x128xf32>
    %c0_127 = arith.constant 0 : index
    %c0_128 = arith.constant 0 : index
    %318 = vector.load %arg13[%c0_127, %c0_128] : memref<8x128xf32, #tpu.memory_space<vmem>>, vector<8x128xf32>
    %319 = arith.mulf %309, %318 : vector<8x128xf32>
    %320 = arith.mulf %303, %311 : vector<8x128xf32>
    %321 = arith.addf %319, %320 : vector<8x128xf32>
    %322 = math.tanh %321 : vector<8x128xf32>
    %323 = arith.mulf %317, %322 : vector<8x128xf32>
    %324 = arith.addi %16, %c5_i32 : i32
    %325 = vector.broadcast %324 : i32 to vector<8x1xi32>
    %326 = arith.cmpi slt, %325, %15 : vector<8x1xi32>
    %c0_129 = arith.constant 0 : index
    %c0_130 = arith.constant 0 : index
    %327 = vector.load %arg13[%c0_129, %c0_130] : memref<8x128xf32, #tpu.memory_space<vmem>>, vector<8x128xf32>
    %328 = vector.shape_cast %326 : vector<8x1xi1> to vector<8x1xi1>
    %329 = vector.broadcast %328 : vector<8x1xi1> to vector<8x128xi1>
    %330 = arith.select %329, %321, %327 : vector<8x128xi1>, vector<8x128xf32>
    %c0_131 = arith.constant 0 : index
    %c0_132 = arith.constant 0 : index
    %331 = vector.load %arg13[%c0_131, %c0_132] : memref<8x128xf32, #tpu.memory_space<vmem>>, vector<8x128xf32>
    tpu.vector_store %arg13[%c0_131, %c0_132], %330 {strides = array<i32>} : memref<8x128xf32, #tpu.memory_space<vmem>>, vector<8x128xf32>,
    %332 = vector.shape_cast %326 : vector<8x1xi1> to vector<8x1xi1>
    %333 = vector.broadcast %332 : vector<8x1xi1> to vector<8x128xi1>
    %334 = arith.select %333, %323, %292 : vector<8x128xi1>, vector<8x128xf32>
    %c0_133 = arith.constant 0 : index
    %c0_134 = arith.constant 0 : index
    %335 = vector.load %arg12[%c0_133, %c0_134] : memref<8x128xf32, #tpu.memory_space<vmem>>, vector<8x128xf32>
    tpu.vector_store %arg12[%c0_133, %c0_134], %334 {strides = array<i32>} : memref<8x128xf32, #tpu.memory_space<vmem>>, vector<8x128xf32>,
    %cst_135 = arith.constant 0.000000e+00 : f32
    %336 = vector.shape_cast %326 : vector<8x1xi1> to vector<8x1xi1>
    %337 = vector.broadcast %336 : vector<8x1xi1> to vector<8x128xi1>
    %338 = vector.broadcast %cst_135 : f32 to vector<8x128xf32>
    %339 = arith.select %337, %323, %338 : vector<8x128xi1>, vector<8x128xf32>
    %cst_136 = arith.constant dense<0.000000e+00> : vector<8x128xf32>
    %340 = tpu.matmul %339, %13, %cst_136 {dimension_numbers = #tpu.dot_dimension_numbers<[1], [0], [0], [1], [0, 0, 1, 1], [], []>} : vector<8x128xf32>, vector<128x128xf32>, vector<8x128xf32> -> vector<8x128xf32>
    %341 = vector.broadcast %14 : vector<1x128xf32> to vector<8x128xf32>
    %342 = arith.addf %340, %341 : vector<8x128xf32>
    %343 = arith.index_cast %c5_i32 : i32 to index
    %c0_137 = arith.constant 0 : index
    %c0_138 = arith.constant 0 : index
    %344 = vector.load %arg9[%343, %c0_137, %c0_138] : memref<8x8x128xf32, #tpu.memory_space<vmem>>, vector<1x8x128xf32>
    %345 = vector.shape_cast %344 : vector<1x8x128xf32> to vector<8x128xf32>
    %346 = vector.shape_cast %342 : vector<8x128xf32> to vector<1x8x128xf32>
    tpu.vector_store %arg9[%343, %c0_137, %c0_138], %346 {strides = array<i32>} : memref<8x8x128xf32, #tpu.memory_space<vmem>>, vector<1x8x128xf32>,
    %c6_i32 = arith.constant 6 : i32
    %c0_139 = arith.constant 0 : index
    %c0_140 = arith.constant 0 : index
    %347 = vector.load %arg12[%c0_139, %c0_140] : memref<8x128xf32, #tpu.memory_space<vmem>>, vector<8x128xf32>
    %348 = arith.index_cast %c6_i32 : i32 to index
    %c0_141 = arith.constant 0 : index
    %c0_142 = arith.constant 0 : index
    %349 = vector.load %arg14[%348, %c0_141, %c0_142] : memref<8x8x512xf32, #tpu.memory_space<vmem>>, vector<1x8x512xf32>
    %350 = vector.shape_cast %349 : vector<1x8x512xf32> to vector<8x512xf32>
    %cst_143 = arith.constant dense<0.000000e+00> : vector<8x512xf32>
    %351 = tpu.matmul %347, %12, %cst_143 {dimension_numbers = #tpu.dot_dimension_numbers<[1], [0], [0], [1], [0, 0, 1, 1], [], []>} : vector<8x128xf32>, vector<128x512xf32>, vector<8x512xf32> -> vector<8x512xf32>
    %352 = arith.addf %350, %351 : vector<8x512xf32>
    %353 = vector.extract_strided_slice %352 {offsets = [0, 0], sizes = [8, 128], strides = [1, 1]} : vector<8x512xf32> to vector<8x128xf32>
    %354 = arith.negf %353 : vector<8x128xf32>
    %355 = math.exp %354 : vector<8x128xf32>
    %cst_144 = arith.constant 1.000000e+00 : f32
    %356 = vector.broadcast %cst_144 : f32 to vector<8x128xf32>
    %357 = arith.addf %356, %355 : vector<8x128xf32>
    %358 = arith.divf %356, %357 : vector<8x128xf32>
    %359 = vector.extract_strided_slice %352 {offsets = [0, 128], sizes = [8, 128], strides = [1, 1]} : vector<8x512xf32> to vector<8x128xf32>
    %360 = arith.negf %359 : vector<8x128xf32>
    %361 = math.exp %360 : vector<8x128xf32>
    %cst_145 = arith.constant 1.000000e+00 : f32
    %362 = vector.broadcast %cst_145 : f32 to vector<8x128xf32>
    %363 = arith.addf %362, %361 : vector<8x128xf32>
    %364 = arith.divf %362, %363 : vector<8x128xf32>
    %365 = vector.extract_strided_slice %352 {offsets = [0, 256], sizes = [8, 128], strides = [1, 1]} : vector<8x512xf32> to vector<8x128xf32>
    %366 = math.tanh %365 : vector<8x128xf32>
    %367 = vector.extract_strided_slice %352 {offsets = [0, 384], sizes = [8, 128], strides = [1, 1]} : vector<8x512xf32> to vector<8x128xf32>
    %368 = arith.negf %367 : vector<8x128xf32>
    %369 = math.exp %368 : vector<8x128xf32>
    %cst_146 = arith.constant 1.000000e+00 : f32
    %370 = vector.broadcast %cst_146 : f32 to vector<8x128xf32>
    %371 = arith.addf %370, %369 : vector<8x128xf32>
    %372 = arith.divf %370, %371 : vector<8x128xf32>
    %c0_147 = arith.constant 0 : index
    %c0_148 = arith.constant 0 : index
    %373 = vector.load %arg13[%c0_147, %c0_148] : memref<8x128xf32, #tpu.memory_space<vmem>>, vector<8x128xf32>
    %374 = arith.mulf %364, %373 : vector<8x128xf32>
    %375 = arith.mulf %358, %366 : vector<8x128xf32>
    %376 = arith.addf %374, %375 : vector<8x128xf32>
    %377 = math.tanh %376 : vector<8x128xf32>
    %378 = arith.mulf %372, %377 : vector<8x128xf32>
    %379 = arith.addi %16, %c6_i32 : i32
    %380 = vector.broadcast %379 : i32 to vector<8x1xi32>
    %381 = arith.cmpi slt, %380, %15 : vector<8x1xi32>
    %c0_149 = arith.constant 0 : index
    %c0_150 = arith.constant 0 : index
    %382 = vector.load %arg13[%c0_149, %c0_150] : memref<8x128xf32, #tpu.memory_space<vmem>>, vector<8x128xf32>
    %383 = vector.shape_cast %381 : vector<8x1xi1> to vector<8x1xi1>
    %384 = vector.broadcast %383 : vector<8x1xi1> to vector<8x128xi1>
    %385 = arith.select %384, %376, %382 : vector<8x128xi1>, vector<8x128xf32>
    %c0_151 = arith.constant 0 : index
    %c0_152 = arith.constant 0 : index
    %386 = vector.load %arg13[%c0_151, %c0_152] : memref<8x128xf32, #tpu.memory_space<vmem>>, vector<8x128xf32>
    tpu.vector_store %arg13[%c0_151, %c0_152], %385 {strides = array<i32>} : memref<8x128xf32, #tpu.memory_space<vmem>>, vector<8x128xf32>,
    %387 = vector.shape_cast %381 : vector<8x1xi1> to vector<8x1xi1>
    %388 = vector.broadcast %387 : vector<8x1xi1> to vector<8x128xi1>
    %389 = arith.select %388, %378, %347 : vector<8x128xi1>, vector<8x128xf32>
    %c0_153 = arith.constant 0 : index
    %c0_154 = arith.constant 0 : index
    %390 = vector.load %arg12[%c0_153, %c0_154] : memref<8x128xf32, #tpu.memory_space<vmem>>, vector<8x128xf32>
    tpu.vector_store %arg12[%c0_153, %c0_154], %389 {strides = array<i32>} : memref<8x128xf32, #tpu.memory_space<vmem>>, vector<8x128xf32>,
    %cst_155 = arith.constant 0.000000e+00 : f32
    %391 = vector.shape_cast %381 : vector<8x1xi1> to vector<8x1xi1>
    %392 = vector.broadcast %391 : vector<8x1xi1> to vector<8x128xi1>
    %393 = vector.broadcast %cst_155 : f32 to vector<8x128xf32>
    %394 = arith.select %392, %378, %393 : vector<8x128xi1>, vector<8x128xf32>
    %cst_156 = arith.constant dense<0.000000e+00> : vector<8x128xf32>
    %395 = tpu.matmul %394, %13, %cst_156 {dimension_numbers = #tpu.dot_dimension_numbers<[1], [0], [0], [1], [0, 0, 1, 1], [], []>} : vector<8x128xf32>, vector<128x128xf32>, vector<8x128xf32> -> vector<8x128xf32>
    %396 = vector.broadcast %14 : vector<1x128xf32> to vector<8x128xf32>
    %397 = arith.addf %395, %396 : vector<8x128xf32>
    %398 = arith.index_cast %c6_i32 : i32 to index
    %c0_157 = arith.constant 0 : index
    %c0_158 = arith.constant 0 : index
    %399 = vector.load %arg9[%398, %c0_157, %c0_158] : memref<8x8x128xf32, #tpu.memory_space<vmem>>, vector<1x8x128xf32>
    %400 = vector.shape_cast %399 : vector<1x8x128xf32> to vector<8x128xf32>
    %401 = vector.shape_cast %397 : vector<8x128xf32> to vector<1x8x128xf32>
    tpu.vector_store %arg9[%398, %c0_157, %c0_158], %401 {strides = array<i32>} : memref<8x8x128xf32, #tpu.memory_space<vmem>>, vector<1x8x128xf32>,
    %c7_i32 = arith.constant 7 : i32
    %c0_159 = arith.constant 0 : index
    %c0_160 = arith.constant 0 : index
    %402 = vector.load %arg12[%c0_159, %c0_160] : memref<8x128xf32, #tpu.memory_space<vmem>>, vector<8x128xf32>
    %403 = arith.index_cast %c7_i32 : i32 to index
    %c0_161 = arith.constant 0 : index
    %c0_162 = arith.constant 0 : index
    %404 = vector.load %arg14[%403, %c0_161, %c0_162] : memref<8x8x512xf32, #tpu.memory_space<vmem>>, vector<1x8x512xf32>
    %405 = vector.shape_cast %404 : vector<1x8x512xf32> to vector<8x512xf32>
    %cst_163 = arith.constant dense<0.000000e+00> : vector<8x512xf32>
    %406 = tpu.matmul %402, %12, %cst_163 {dimension_numbers = #tpu.dot_dimension_numbers<[1], [0], [0], [1], [0, 0, 1, 1], [], []>} : vector<8x128xf32>, vector<128x512xf32>, vector<8x512xf32> -> vector<8x512xf32>
    %407 = arith.addf %405, %406 : vector<8x512xf32>
    %408 = vector.extract_strided_slice %407 {offsets = [0, 0], sizes = [8, 128], strides = [1, 1]} : vector<8x512xf32> to vector<8x128xf32>
    %409 = arith.negf %408 : vector<8x128xf32>
    %410 = math.exp %409 : vector<8x128xf32>
    %cst_164 = arith.constant 1.000000e+00 : f32
    %411 = vector.broadcast %cst_164 : f32 to vector<8x128xf32>
    %412 = arith.addf %411, %410 : vector<8x128xf32>
    %413 = arith.divf %411, %412 : vector<8x128xf32>
    %414 = vector.extract_strided_slice %407 {offsets = [0, 128], sizes = [8, 128], strides = [1, 1]} : vector<8x512xf32> to vector<8x128xf32>
    %415 = arith.negf %414 : vector<8x128xf32>
    %416 = math.exp %415 : vector<8x128xf32>
    %cst_165 = arith.constant 1.000000e+00 : f32
    %417 = vector.broadcast %cst_165 : f32 to vector<8x128xf32>
    %418 = arith.addf %417, %416 : vector<8x128xf32>
    %419 = arith.divf %417, %418 : vector<8x128xf32>
    %420 = vector.extract_strided_slice %407 {offsets = [0, 256], sizes = [8, 128], strides = [1, 1]} : vector<8x512xf32> to vector<8x128xf32>
    %421 = math.tanh %420 : vector<8x128xf32>
    %422 = vector.extract_strided_slice %407 {offsets = [0, 384], sizes = [8, 128], strides = [1, 1]} : vector<8x512xf32> to vector<8x128xf32>
    %423 = arith.negf %422 : vector<8x128xf32>
    %424 = math.exp %423 : vector<8x128xf32>
    %cst_166 = arith.constant 1.000000e+00 : f32
    %425 = vector.broadcast %cst_166 : f32 to vector<8x128xf32>
    %426 = arith.addf %425, %424 : vector<8x128xf32>
    %427 = arith.divf %425, %426 : vector<8x128xf32>
    %c0_167 = arith.constant 0 : index
    %c0_168 = arith.constant 0 : index
    %428 = vector.load %arg13[%c0_167, %c0_168] : memref<8x128xf32, #tpu.memory_space<vmem>>, vector<8x128xf32>
    %429 = arith.mulf %419, %428 : vector<8x128xf32>
    %430 = arith.mulf %413, %421 : vector<8x128xf32>
    %431 = arith.addf %429, %430 : vector<8x128xf32>
    %432 = math.tanh %431 : vector<8x128xf32>
    %433 = arith.mulf %427, %432 : vector<8x128xf32>
    %434 = arith.addi %16, %c7_i32 : i32
    %435 = vector.broadcast %434 : i32 to vector<8x1xi32>
    %436 = arith.cmpi slt, %435, %15 : vector<8x1xi32>
    %c0_169 = arith.constant 0 : index
    %c0_170 = arith.constant 0 : index
    %437 = vector.load %arg13[%c0_169, %c0_170] : memref<8x128xf32, #tpu.memory_space<vmem>>, vector<8x128xf32>
    %438 = vector.shape_cast %436 : vector<8x1xi1> to vector<8x1xi1>
    %439 = vector.broadcast %438 : vector<8x1xi1> to vector<8x128xi1>
    %440 = arith.select %439, %431, %437 : vector<8x128xi1>, vector<8x128xf32>
    %c0_171 = arith.constant 0 : index
    %c0_172 = arith.constant 0 : index
    %441 = vector.load %arg13[%c0_171, %c0_172] : memref<8x128xf32, #tpu.memory_space<vmem>>, vector<8x128xf32>
    tpu.vector_store %arg13[%c0_171, %c0_172], %440 {strides = array<i32>} : memref<8x128xf32, #tpu.memory_space<vmem>>, vector<8x128xf32>,
    %442 = vector.shape_cast %436 : vector<8x1xi1> to vector<8x1xi1>
    %443 = vector.broadcast %442 : vector<8x1xi1> to vector<8x128xi1>
    %444 = arith.select %443, %433, %402 : vector<8x128xi1>, vector<8x128xf32>
    %c0_173 = arith.constant 0 : index
    %c0_174 = arith.constant 0 : index
    %445 = vector.load %arg12[%c0_173, %c0_174] : memref<8x128xf32, #tpu.memory_space<vmem>>, vector<8x128xf32>
    tpu.vector_store %arg12[%c0_173, %c0_174], %444 {strides = array<i32>} : memref<8x128xf32, #tpu.memory_space<vmem>>, vector<8x128xf32>,
    %cst_175 = arith.constant 0.000000e+00 : f32
    %446 = vector.shape_cast %436 : vector<8x1xi1> to vector<8x1xi1>
    %447 = vector.broadcast %446 : vector<8x1xi1> to vector<8x128xi1>
    %448 = vector.broadcast %cst_175 : f32 to vector<8x128xf32>
    %449 = arith.select %447, %433, %448 : vector<8x128xi1>, vector<8x128xf32>
    %cst_176 = arith.constant dense<0.000000e+00> : vector<8x128xf32>
    %450 = tpu.matmul %449, %13, %cst_176 {dimension_numbers = #tpu.dot_dimension_numbers<[1], [0], [0], [1], [0, 0, 1, 1], [], []>} : vector<8x128xf32>, vector<128x128xf32>, vector<8x128xf32> -> vector<8x128xf32>
    %451 = vector.broadcast %14 : vector<1x128xf32> to vector<8x128xf32>
    %452 = arith.addf %450, %451 : vector<8x128xf32>
    %453 = arith.index_cast %c7_i32 : i32 to index
    %c0_177 = arith.constant 0 : index
    %c0_178 = arith.constant 0 : index
    %454 = vector.load %arg9[%453, %c0_177, %c0_178] : memref<8x8x128xf32, #tpu.memory_space<vmem>>, vector<1x8x128xf32>
    %455 = vector.shape_cast %454 : vector<1x8x128xf32> to vector<8x128xf32>
    %456 = vector.shape_cast %452 : vector<8x128xf32> to vector<1x8x128xf32>
    tpu.vector_store %arg9[%453, %c0_177, %c0_178], %456 {strides = array<i32>} : memref<8x8x128xf32, #tpu.memory_space<vmem>>, vector<1x8x128xf32>,
    %c8_i32_179 = arith.constant 8 : i32
    %c1_i32_180 = arith.constant 1 : i32
    %457 = arith.cmpi eq, %arg1, %c1_i32_180 : i32
    %458 = arith.extui %457 : i1 to i32
    %c0_i32_181 = arith.constant 0 : i32
    %459 = arith.cmpi ne, %458, %c0_i32_181 : i32
    scf.if %459 {
      %c0_182 = arith.constant 0 : index
      %c0_183 = arith.constant 0 : index
      %460 = vector.load %arg12[%c0_182, %c0_183] : memref<8x128xf32, #tpu.memory_space<vmem>>, vector<8x128xf32>
      %c0_184 = arith.constant 0 : index
      %c0_185 = arith.constant 0 : index
      %461 = vector.load %arg10[%c0_184, %c0_185] : memref<8x128xf32, #tpu.memory_space<vmem>>, vector<8x128xf32>
      tpu.vector_store %arg10[%c0_184, %c0_185], %460 {strides = array<i32>} : memref<8x128xf32, #tpu.memory_space<vmem>>, vector<8x128xf32>,
      %c0_186 = arith.constant 0 : index
      %c0_187 = arith.constant 0 : index
      %462 = vector.load %arg13[%c0_186, %c0_187] : memref<8x128xf32, #tpu.memory_space<vmem>>, vector<8x128xf32>
      %c0_188 = arith.constant 0 : index
      %c0_189 = arith.constant 0 : index
      %463 = vector.load %arg11[%c0_188, %c0_189] : memref<8x128xf32, #tpu.memory_space<vmem>>, vector<8x128xf32>
      tpu.vector_store %arg11[%c0_188, %c0_189], %462 {strides = array<i32>} : memref<8x128xf32, #tpu.memory_space<vmem>>, vector<8x128xf32>,
    } else {
    }
    return
  }
  func.func @transform_0(%arg0: i32, %arg1: i32) -> (i32, i32) {
    %c0_i32 = arith.constant 0 : i32
    %c0_i32_0 = arith.constant 0 : i32
    return %arg0, %c0_i32 : i32, i32
  }
  func.func @transform_1(%arg0: i32, %arg1: i32) -> (i32, i32, i32) {
    %c0_i32 = arith.constant 0 : i32
    %c0_i32_0 = arith.constant 0 : i32
    return %arg1, %arg0, %c0_i32 : i32, i32, i32
  }
  func.func @transform_2(%arg0: i32, %arg1: i32) -> (i32, i32) {
    %c0_i32 = arith.constant 0 : i32
    %c0_i32_0 = arith.constant 0 : i32
    %c0_i32_1 = arith.constant 0 : i32
    return %c0_i32, %c0_i32_0 : i32, i32
  }
  func.func @transform_3(%arg0: i32, %arg1: i32) -> (i32, i32) {
    %c0_i32 = arith.constant 0 : i32
    %c0_i32_0 = arith.constant 0 : i32
    %c0_i32_1 = arith.constant 0 : i32
    return %c0_i32, %c0_i32_0 : i32, i32
  }
  func.func @transform_4(%arg0: i32, %arg1: i32) -> (i32, i32) {
    %c0_i32 = arith.constant 0 : i32
    %c0_i32_0 = arith.constant 0 : i32
    %c0_i32_1 = arith.constant 0 : i32
    return %c0_i32, %c0_i32_0 : i32, i32
  }
  func.func @transform_5(%arg0: i32, %arg1: i32) -> (i32, i32) {
    %c0_i32 = arith.constant 0 : i32
    %c0_i32_0 = arith.constant 0 : i32
    %c0_i32_1 = arith.constant 0 : i32
    return %c0_i32, %c0_i32_0 : i32, i32
  }
  func.func @transform_6(%arg0: i32, %arg1: i32) -> (i32, i32) {
    %c0_i32 = arith.constant 0 : i32
    %c0_i32_0 = arith.constant 0 : i32
    %c0_i32_1 = arith.constant 0 : i32
    return %c0_i32, %c0_i32_0 : i32, i32
  }
  func.func @transform_7(%arg0: i32, %arg1: i32) -> (i32, i32, i32) {
    %c0_i32 = arith.constant 0 : i32
    %c0_i32_0 = arith.constant 0 : i32
    return %arg1, %arg0, %c0_i32 : i32, i32, i32
  }
  func.func @transform_8(%arg0: i32, %arg1: i32) -> (i32, i32) {
    %c0_i32 = arith.constant 0 : i32
    %c0_i32_0 = arith.constant 0 : i32
    return %arg0, %c0_i32 : i32, i32
  }
  func.func @transform_9(%arg0: i32, %arg1: i32) -> (i32, i32) {
    %c0_i32 = arith.constant 0 : i32
    %c0_i32_0 = arith.constant 0 : i32
    return %arg0, %c0_i32 : i32, i32
  }
}

</mosaic_0001>

<bundles_post_ra>
// kernel: tpu_custom_call.1
= control target key start
LH: loop header
LB: loop body
LE: loop exit
PB: predicated region body
PF: predicated region fallthrough
CT: control target
= control target key end

     0   :  { %s6043_s0 = inlined_call_operand.vmem [shape: s32[8,1], index: 0, kind: input, shape index: {}]   ;;  %s6044_s1 = inlined_call_operand.hbm [shape: f32[16,8,16], index: 1, kind: input, shape index: {}]   ;;  %s6045_s2 = inlined_call_operand.hbm [shape: f32[16,512], index: 2, kind: input, shape index: {}]   ;;  %s6046_s3 = inlined_call_operand.hbm [shape: f32[128,512], index: 3, kind: input, shape index: {}]   ;;  %s6047_s4 = inlined_call_operand.vmem [shape: f32[1,512], index: 4, kind: input, shape index: {}]   ;;  %s6048_s5 = inlined_call_operand.hbm [shape: f32[128,128], index: 5, kind: input, shape index: {}]   ;;  %s6049_s6 = inlined_call_operand.vmem [shape: f32[1,128], index: 6, kind: input, shape index: {}]   ;;  %s6050_s7 = inlined_call_operand.hbm [shape: f32[16,8,128], index: 7, kind: output, shape index: {0}]   ;;  %s6051_s8 = inlined_call_operand.hbm [shape: f32[8,128], index: 8, kind: output, shape index: {1}]   ;;  %s6052_s9 = inlined_call_operand.hbm [shape: f32[8,128], index: 9, kind: output, shape index: {2}]  }
   0x1   :  { %6073 = sst [smem:[#allocation25_spill]] %s6049_s6 }
   0x2   :  { %6074 = sst [smem:[#allocation26_spill]] %s6050_s7 }
   0x3   :  { %6075 = sst [smem:[#allocation27_spill]] %s6051_s8 }
   0x4   :  { %6076 = sst [smem:[#allocation28_spill]] %s6052_s9 }
   0x5   :  { %15 = vsyncpa [#allocation6], 0 }
   0x6   :  { %17 = vsyncpa [#allocation6 + $0x1], 0 }
   0x7   :  { %18 = vsyncpa [#allocation9], 0 }
   0x8   :  { %19 = vsyncpa [#allocation12], 0 }
   0x9   :  { %20 = vsyncpa [#allocation7], 0 }
   0xa   :  { %22 = vsyncpa [#allocation7 + $0x1], 0 }
   0xb   :  { %23 = vsyncpa [#allocation15], 0  ;;  %s5007_s30 = smov 0   ;;  %s5009_s10 = smov 0  }
   0xc   :  { %s5011_s11 = smov 0   ;;  %s5013_s12 = smov 0  }
   0xd   :  { %s5015_s13 = smov 0   ;;  %s5017_s14 = smov 0  }
   0xe LB: > { %6077 = sst [smem:[#allocation22_spill]] %s4917_s30  ;;  %s3149_s15 = sadd.s32 4294967295, %s4937_s14   ;;  %s4937_s14 = sphi %s5017_s14, %s29_s14   ;;  %s4933_s13 = sphi %s5015_s13, %s6111_s13   ;;  %s4929_s12 = sphi %s5013_s12, %s6110_s12   ;;  %s4925_s11 = sphi %s5011_s11, %s6109_s11   ;;  %s4921_s10 = sphi %s5009_s10, %s6108_s10   ;;  %s4917_s30 = sphi %s5007_s30, %s6107_s30  }
   0xf   : > { %s3150_s16 = sadd.s32 4294967294, %s4937_s14   ;;  %p89_p0 = scmp.ne.s32.totalorder %s4921_s10, %s4917_s30 }
  0x10   : > { %p5041_p1 = scmp.eq.s32.totalorder %s3149_s15, 0  ;;  %p5045_p2 = scmp.eq.s32.totalorder %s3149_s15, 1 }
  0x11   : > { %p226_p3 = scmp.eq.s32.totalorder %s3150_s16, 1  ;;  %p3151_p5 = scmp.ge.s32.totalorder %s4937_s14, 1 }
  0x12   : > { %s6078_s17 = scalar_select %p5041_p1, 1, 0 }
  0x13   : > { %s6079_s18 = scalar_select %p5045_p2, 1, 0 }
  0x14   : > { %p5051_p4 = por %p5041_p1, %p89_p0  ;;  %p5056_p6 = por %p226_p3, %p89_p0 }
  0x15   : > { %p285_p7 = scmp.lt.s32.totalorder %s4937_s14, 3  ;;  %s4939_s22 = smov [#allocation8]  }
  0x16   : > { %s6080_s19 = scalar_select %p5051_p4, 1, 0 }
  0x17   : > { %s6081_s20 = scalar_select %p5056_p6, 1, 0 }
  0x18   : > { %p5061_p8 = pnand %p3151_p5, %p285_p7  ;;  %s304_s23 = sshll.u32 %s4939_s22, 4  ;;  %s5065_s23 = int_to_ptr.vmem [resolvable:$true] %s304_s23 }
  0x19   : > { %6082 = sst [smem:[#allocation23_spill]] %s6081_s20  ;;  %s4940_s25 = smov [#allocation10]  }
  0x1a   : > { %s6083_s21 = scalar_select %p5061_p8, 1, 0 }
  0x1b   : > { %p4452_p9 = pneg %p5061_p8  ;;  %s317_s26 = sshll.u32 %s4940_s25, 4  ;;  %s5076_s26 = int_to_ptr.vmem [resolvable:$true] %s317_s26 }
  0x1c   : > { %s4941_s27 = smov [#allocation11]   ;;  %s4677_s16 = scalar_lea.hbm %s6045_s2, 1024 }
  0x1d   : > { %p5072_p11 = pnand %p4452_p9, %p5041_p1  ;;  %s5078_s28 = sshll.u32 %s4941_s27, 4  ;;  %s334_s28 = int_to_ptr.vmem [resolvable:$true] %s5078_s28 }
  0x1e   : > { %p4678_p12 = scmp.ne.s32.totalorder %s6045_s2, %s4677_s16  ;;  %p4684_p5 = scmp.lt.u32.totalorder %s4677_s16, %s6045_s2 }
  0x1f   : > { %p5088_p13 = pneg %p5072_p11 }
  0x21   : > { %p4680_p0 = pnand %p5088_p13, %p4678_p12 }
  0x23   : > { %p4681_p3 = pneg %p4680_p0 }
  0x25   : > { %p4686_p7 = pnand %p4684_p5, %p4681_p3 }
  0x27   : > { %4689 = shalt.err (!%p4686_p7)
}
  0x28   : > { %s4690_s20 = scalar_lea.vmem %s5065_s23, 1024  ;;  %p4698_p1 = scmp.lt.s32.totalorder %s5065_s23, %s5065_s23 }
  0x29   : > { %p4691_p9 = scmp.ne.s32.totalorder %s5065_s23, %s4690_s20  ;;  %p4699_p4 = scmp.lt.s32.totalorder %s4690_s20, %s4690_s20 }
  0x2b   : > { %p4693_p10 = pnand %p4691_p9, %p5088_p13  ;;  %p4700_p12 = por %p4699_p4, %p4698_p1 }
  0x2d   : > { %p4694_p6 = pneg %p4693_p10 }
  0x2f   : > { %p4701_p0 = pnand %p4700_p12, %p4694_p6 }
  0x31   : > { %4704 = shalt.err (!%p4701_p0)
}
  0x32   : > { %s4942_s29 = smov 512   ;;  %s4943_s15 = smov 32  }
  0x33   : > { %4455 = dma.hbm_to_vmem [thread:$0]  (!%p5072_p11), %s6045_s2, 1024, %s5065_s23, [#allocation9], %s4942_s29, %s4942_s29, %s4943_s15  }
  0x34   : > { %s4705_s9 = scalar_lea.hbm %s6046_s3, 8192 }
  0x35   : > { %p4706_p1 = scmp.ne.s32.totalorder %s6046_s3, %s4705_s9  ;;  %p4712_p10 = scmp.lt.u32.totalorder %s4705_s9, %s6046_s3 }
  0x37   : > { %p4708_p4 = pnand %p4706_p1, %p5088_p13 }
  0x39   : > { %p4709_p6 = pneg %p4708_p4 }
  0x3b   : > { %p4714_p3 = pnand %p4712_p10, %p4709_p6 }
  0x3d   : > { %4717 = shalt.err (!%p4714_p3)
}
  0x3e   : > { %s4718_s23 = scalar_lea.vmem %s5076_s26, 8192  ;;  %p4726_p12 = scmp.lt.s32.totalorder %s5076_s26, %s5076_s26 }
  0x3f   : > { %p4719_p5 = scmp.ne.s32.totalorder %s5076_s26, %s4718_s23  ;;  %p4727_p0 = scmp.lt.s32.totalorder %s4718_s23, %s4718_s23 }
  0x41   : > { %p4721_p7 = pnand %p4719_p5, %p5088_p13  ;;  %p4728_p1 = por %p4727_p0, %p4726_p12 }
  0x43   : > { %p4722_p9 = pneg %p4721_p7 }
  0x45   : > { %p4729_p4 = pnand %p4728_p1, %p4722_p9 }
  0x47   : > { %4732 = shalt.err (!%p4729_p4)
}
  0x48   : > { %4458 = dma.hbm_to_vmem [thread:$0]  (!%p5072_p11), %s6046_s3, 8192, %s5076_s26, [#allocation9], %s4942_s29, %s4942_s29, %s4943_s15  }
  0x49   : > { %s4733_s16 = scalar_lea.hbm %s6048_s5, 2048 }
  0x4a   : > { %p4734_p6 = scmp.ne.s32.totalorder %s6048_s5, %s4733_s16  ;;  %p4740_p5 = scmp.lt.u32.totalorder %s4733_s16, %s6048_s5 }
  0x4c   : > { %p4736_p10 = pnand %p4734_p6, %p5088_p13 }
  0x4e   : > { %p4737_p3 = pneg %p4736_p10 }
  0x50   : > { %p4742_p7 = pnand %p4740_p5, %p4737_p3 }
  0x52   : > { %4745 = shalt.err (!%p4742_p7)
}
  0x53   : > { %s4746_s23 = scalar_lea.vmem %s334_s28, 2048  ;;  %p4754_p1 = scmp.lt.s32.totalorder %s334_s28, %s334_s28 }
  0x54   : > { %p4747_p9 = scmp.ne.s32.totalorder %s334_s28, %s4746_s23  ;;  %p4755_p4 = scmp.lt.s32.totalorder %s4746_s23, %s4746_s23 }
  0x56   : > { %p4749_p12 = pnand %p4747_p9, %p5088_p13  ;;  %p4756_p8 = por %p4755_p4, %p4754_p1 }
  0x58   : > { %p4750_p0 = pneg %p4749_p12 }
  0x5a   : > { %p4757_p2 = pnand %p4756_p8, %p4750_p0 }
  0x5c   : > { %4760 = shalt.err (!%p4757_p2)
}
  0x5d   : > { %s4944_s26 = smov 128   ;;  %s4945_s30 = smov 8  }
  0x5e   : > { %4461 = dma.hbm_to_vmem [thread:$0]  (!%p5072_p11), %s6048_s5, 2048, %s334_s28, [#allocation12], %s4944_s26, %s4944_s26, %s4945_s30  }
  0x5f   : > { %s76_s6 = sadd.s32 1, %s4925_s11  ;;  %s38_s7 = sadd.s32 1, %s4933_s13 }
  0x60   : > { %p83_p2 = scmp.ne.s32.totalorder %s4925_s11, %s4921_s10  ;;  %p39_p8 = scmp.ge.s32.totalorder %s38_s7, 2 }
  0x61   : > { %p84_p13 = scmp.eq.s32.totalorder %s4937_s14, 0  ;;  %p6086_p6 = scmp.ne.s32.totalorder %s6079_s18, 0 }
  0x62   : > { %p4473_p3 = scmp.lt.s32.totalorder %s4937_s14, 2  ;;  %s6113_s7 = smov (%p39_p8, %s38_s7), 0 }
  0x63   : > { %p5161_p10 = por %p6086_p6, %p83_p2  ;;  %p85_p5 = por %p84_p13, %p83_p2 }
  0x64   : > { %s350_s24 = sand.u32 1, %s4925_s11   ;;  %s71_s9 = ssub.s32 %s4933_s13, %s6113_s7 }
  0x65   : > { %p74_p7 = scmp.eq.s32.totalorder %s71_s9, 0  ;;  %s3157_s28 = sshll.u32 %s350_s24, 6 }
  0x66   : > { %s3234_s16 = sshll.u32 %s4933_s13, 10  ;;  %s354_s23 = scalar_lea.vmem [#allocation5], %s3157_s28 }
  0x67   : > { %s5173_s22 = scalar_select %p74_p7, %s4925_s11, %s76_s6  }
  0x68   : > { %s5178_s20 = scalar_lea.hbm %s6044_s1, %s3234_s16  ;;  %s362_s29 = sshll.u32 %s354_s23, 4  ;;  %s5180_s29 = int_to_ptr.vmem [resolvable:$true] %s362_s29 }
  0x69   : > { %p5184_p11 = pnand %p4473_p3, %p85_p5  ;;  %s5188_s6 = scalar_lea.sflag [#allocation6], %s350_s24 }
  0x6a   : > { %s4761_s9 = scalar_lea.hbm %s5178_s20, 1024  ;;  %s4766_s25 = scalar_lea.hbm %s6044_s1, 2048 }
  0x6b   : > { %p4762_p9 = scmp.ne.s32.totalorder %s5178_s20, %s4761_s9  ;;  %p4763_p12 = pneg %p5184_p11 }
  0x6c   : > { %p4767_p4 = scmp.lt.u32.totalorder %s5178_s20, %s6044_s1  ;;  %p4768_p2 = scmp.lt.u32.totalorder %s4766_s25, %s4761_s9 }
  0x6d   : > { %p4764_p0 = pnand %p4763_p12, %p4762_p9  ;;  %p4770_p13 = scmp.lt.u32.totalorder %s4761_s9, %s5178_s20 }
  0x6e   : > { %p4769_p8 = por %p4768_p2, %p4767_p4 }
  0x6f   : > { %p4765_p1 = pneg %p4764_p0 }
  0x70   : > { %p4771_p6 = por %p4770_p13, %p4769_p8 }
  0x72   : > { %p4772_p3 = pnand %p4771_p6, %p4765_p1 }
  0x74   : > { %4775 = shalt.err (!%p4772_p3)
}
  0x75   : > { %s4776_s24 = scalar_lea.vmem %s5180_s29, 1024  ;;  %s4946_s28 = smov [#allocation5]  }
  0x76   : > { %p4777_p5 = scmp.ne.s32.totalorder %s5180_s29, %s4776_s24  ;;  %s4781_s16 = sshll.u32 %s4946_s28, 4  ;;  %s4782_s16 = int_to_ptr.vmem [resolvable:$false] %s4781_s16 }
  0x77   : > { %s4783_s27 = scalar_lea.vmem %s4782_s16, 2048  ;;  %p4784_p0 = scmp.lt.s32.totalorder %s5180_s29, %s4782_s16 }
  0x78   : > { %p4779_p7 = pnand %p4777_p5, %p4763_p12  ;;  %p4785_p4 = scmp.lt.s32.totalorder %s4783_s27, %s4776_s24 }
  0x7a   : > { %p4780_p9 = pneg %p4779_p7  ;;  %p4786_p2 = por %p4785_p4, %p4784_p0 }
  0x7c   : > { %p4787_p8 = pnand %p4786_p2, %p4780_p9 }
  0x7e   : > { %4790 = shalt.err (!%p4787_p8)
}
  0x7f   : > { %4465 = dma.hbm_to_vmem [thread:$0]  (!%p5184_p11), %s5178_s20, 1024, %s5180_s29, %s5188_s6, %s4944_s26, %s4944_s26, %s4945_s30  }
  0x80   : > { %p6089_p12 = scmp.ne.s32.totalorder %s6083_s21, 0 }
  0x82   : > { %374 = sbr.rel (%p6089_p12) target bundleno = 2738 (0xab2), region = 48 }
  0x89   : > { %s5222_s9 = sand.u32 1, %s4921_s10   ;;  %p6090_p1 = scmp.ne.s32.totalorder %s6080_s19, 0 }
  0x8a   : > { %s3161_s25 = sshll.u32 %s5222_s9, 6  ;;  %s377_s23 = scalar_lea.sflag [#allocation6], %s5222_s9 }
  0x8b   : > { %s5226_s24 = scalar_lea.vmem [#allocation5], %s3161_s25 }
  0x8c   : > { %4896 = dma.done.wait (%p6090_p1), %s377_s23, 1024  }
  0x8d   : > { %4898 = vsyncadd (%p6090_p1), %s377_s23, 4294966272  ;;  %p6091_p11 = scmp.ne.s32.totalorder %s6078_s17, 0 }
  0x8f   : > { %4900 = dma.done.wait (%p6091_p11), [#allocation9], 9216  }
  0x90   : > { %4902 = vsyncadd (%p6091_p11), [#allocation9], 4294958080 }
  0x91   : > { %4904 = dma.done.wait (%p6091_p11), [#allocation12], 2048  }
  0x92   : > { %4906 = vsyncadd (%p6091_p11), [#allocation12], 4294965248  ;;  %s5240_s21 = scalar_lea.vmem [#allocation13], %s3161_s25  ;;  %p3166_p13 = scmp.ne.s32.totalorder %s4929_s12, 0 }
  0x93   : > { %v4947_v0 = vmov (!%p3166_p13), 0.0  }
  0x94   : > { %440 = sbr.rel (%p3166_p13) target bundleno = 155 (0x9b), region = 68  ;;  %441 = vst [vmem:[#allocation2] sm:$0xff] (!%p3166_p13), %v4947_v0  ;;  %442 = vst [vmem:[#allocation3] sm:$0xff] (!%p3166_p13), %v4947_v0 }
  0x9b PF: > { %v452_v1 = vld [vmem:[#allocation8 + $0x8] sm:$0xff]  ;;  %v454_v3 = vld [vmem:[#allocation8 + $0x18] sm:$0xff]  ;;  %v451_v6 = vld [vmem:[#allocation8] sm:$0xff]  ;;  %v6068_v8 = vmov 0.0   ;;  %v6064_v14 = vmov 0   ;;  %vm481_vm0 = vcmask 130048  }
  0x9c   : > { %v456_v2 = vld [vmem:[#allocation8 + $0x28] sm:$0xff]  ;;  %v458_v5 = vld [vmem:[#allocation8 + $0x38] sm:$0xff]  ;;  %v455_v7 = vld [vmem:[#allocation8 + $0x20] sm:$0xff]  ;;  %570 = vmatprep.mubr.f32.mxu0 %v6068_v8  ;;  %683 = vmatprep.mubr.f32.mxu1 %v6068_v8  ;;  %s5345_s17 = sshll.u32 %s4929_s12, 3  ;;  %vm4951_vm5 = vmmov 0   ;;  %s6095_s19 = sld [smem:[#allocation25_spill]] }
  0x9d   : > { %v3652_v4 = vpack.c.bf16 %v456_v2, %v452_v1  ;;  %v3656_v9 = vpack.c.bf16 %v458_v5, %v454_v3  ;;  %v3654_v10 = vpack.c.bf16 %v455_v7, %v451_v6  ;;  %v453_v11 = vld [vmem:[#allocation8 + $0x10] sm:$0xff]  ;;  %v443_v13 = vld [vmem:[%s5226_s24] sm:$0xff]  ;;  %4546 = vset.pattern.permute.xlu0 %v6064_v14  ;;  %4547 = vset.pattern.permute.xlu1 %v6064_v14  ;;  %v765_v16 = vld [vmem:[#allocation10 + $0x8] sm:$0xff]  ;;  %s1289_s30 = sadd.s32 1, %s5345_s17  ;;  %s2075_s20 = sadd.s32 4, %s5345_s17 }
  0x9e   : > { %v457_v12 = vld [vmem:[#allocation8 + $0x30] sm:$0xff]  ;;  %v769_v17 = vld [vmem:[#allocation10 + $0x28] sm:$0xff]  ;;  %v767_v18 = vld [vmem:[#allocation10 + $0x18] sm:$0xff]  ;;  %s2599_s29 = sadd.s32 6, %s5345_s17  ;;  %s1551_s28 = sadd.s32 2, %s5345_s17 }
  0x9f   : > { %3653 = vmatprep.subr.bf16.mxu0 %v3652_v4  ;;  %v3658_v15 = vpack.c.bf16 %v457_v12, %v453_v11  ;;  %3657 = vmatprep.subr.bf16.mxu1 %v3656_v9  ;;  %v5248_v19 = vpack.c.bf16 %v769_v17, %v765_v16  ;;  %v771_v20 = vld [vmem:[#allocation10 + $0x38] sm:$0xff]  ;;  %v764_v21 = vld [vmem:[#allocation10] sm:$0xff]  ;;  %v766_v25 = vld [vmem:[#allocation10 + $0x10] sm:$0xff]  ;;  %s1813_s16 = sadd.s32 3, %s5345_s17  ;;  %s2337_s27 = sadd.s32 5, %s5345_s17 }
  0xa0   : > { %3655 = vmatpush1.bf16.msra.mxu0 %v3654_v10  ;;  %v768_v22 = vld [vmem:[#allocation10 + $0x20] sm:$0xff]  ;;  %v5250_v23 = vpack.c.bf16 %v771_v20, %v767_v18  ;;  %v770_v26 = vld [vmem:[#allocation10 + $0x30] sm:$0xff]  ;;  %v773_v28 = vld [vmem:[#allocation10 + $0x48] sm:$0xff]  ;;  %s2861_s25 = sadd.s32 7, %s5345_s17  ;;  %p3224_p6 = scmp.ne.s32.totalorder %s4929_s12, 1 }
  0xa1   : > { %3659 = vmatpush1.bf16.msra.mxu1 %v3658_v15  ;;  %v5252_v24 = vpack.c.bf16 %v768_v22, %v764_v21  ;;  %3661 = vmatprep.subr.bf16.mxu0 %v5248_v19  ;;  %v5255_v27 = vpack.c.bf16 %v770_v26, %v766_v25  ;;  %v777_v29 = vld [vmem:[#allocation10 + $0x68] sm:$0xff]  ;;  %v775_v30 = vld [vmem:[#allocation10 + $0x58] sm:$0xff]  ;;  %v772_v33 = vld [vmem:[#allocation10 + $0x40] sm:$0xff] }
  0xa2   : > { %3693 = vmatprep.subr.bf16.mxu1 %v5250_v23  ;;  %v5259_v31 = vpack.c.bf16 %v777_v29, %v773_v28  ;;  %v779_v32 = vld [vmem:[#allocation10 + $0x78] sm:$0xff]  ;;  %v776_v34 = vld [vmem:[#allocation10 + $0x60] sm:$0xff]  ;;  %v444_v35 = vld [vmem:[%s5226_s24 + $0x8] sm:$0xff] }
  0xa3   : > { %3167 = vmatmul.mubr.msk.f32.vlgmr.msra.gmra.mrb[0].mxu0 %vm481_vm0, %v443_v13  ;;  %v5264_v36 = vpack.c.bf16 %v779_v32, %v775_v30  ;;  %v5266_v37 = vpack.c.bf16 %v776_v34, %v772_v33  ;;  %v774_v38 = vld [vmem:[#allocation10 + $0x50] sm:$0xff]  ;;  %v781_v41 = vld [vmem:[#allocation10 + $0x88] sm:$0xff]  ;;  %v783_v43 = vld [vmem:[#allocation10 + $0x98] sm:$0xff] }
  0xa4   : > { %3175 = vmatmul.mubr.msk.f32.vlgmr.msra.gmra.mrb[0].mxu1 %vm481_vm0, %v443_v13  ;;  %3663 = vmatpush1.bf16.msra.mxu0 %v5252_v24  ;;  %v778_v39 = vld [vmem:[#allocation10 + $0x70] sm:$0xff]  ;;  %v785_v42 = vld [vmem:[#allocation10 + $0xa8] sm:$0xff]  ;;  %v787_v45 = vld [vmem:[#allocation10 + $0xb8] sm:$0xff] }
  0xa5   : > { %3695 = vmatpush1.bf16.msra.mxu1 %v5255_v27  ;;  %576 = vmatprep.mubr.f32.mxu0 %v6068_v8  ;;  %v5270_v40 = vpack.c.bf16 %v778_v39, %v774_v38  ;;  %v5274_v44 = vpack.c.bf16 %v785_v42, %v781_v41  ;;  %v780_v46 = vld [vmem:[#allocation10 + $0x80] sm:$0xff]  ;;  %v445_v48 = vld [vmem:[%s5226_s24 + $0x10] sm:$0xff]  ;;  %v5279_v49 = vpack.c.bf16 %v787_v45, %v783_v43  ;;  %v789_v53 = vld [vmem:[#allocation10 + $0xc8] sm:$0xff] }
  0xa6   : > { %689 = vmatprep.mubr.f32.mxu1 %v6068_v8  ;;  %3665 = vmatprep.subr.bf16.mxu0 %v5259_v31  ;;  %v784_v47 = vld [vmem:[#allocation10 + $0xa0] sm:$0xff]  ;;  %v782_v50 = vld [vmem:[#allocation10 + $0x90] sm:$0xff]  ;;  %v793_v54 = vld [vmem:[#allocation10 + $0xe8] sm:$0xff] }
  0xa7   : > { %3168 = vmatmul.mubr.msk.f32.gmra.mrb[2].mxu0 %vm481_vm0, %v444_v35  ;;  %3697 = vmatprep.subr.bf16.mxu1 %v5264_v36  ;;  %v786_v51 = vld [vmem:[#allocation10 + $0xb0] sm:$0xff]  ;;  %v5283_v52 = vpack.c.bf16 %v784_v47, %v780_v46  ;;  %v791_v55 = vld [vmem:[#allocation10 + $0xd8] sm:$0xff]  ;;  %v788_v58 = vld [vmem:[#allocation10 + $0xc0] sm:$0xff]  ;;  %v5291_v60 = vpack.c.bf16 %v793_v54, %v789_v53 }
  0xa8   : > { %3176 = vmatmul.mubr.msk.f32.gmra.mrb[2].mxu1 %vm481_vm0, %v444_v35  ;;  %3667 = vmatpush1.bf16.msra.mxu0 %v5266_v37  ;;  %v5287_v56 = vpack.c.bf16 %v786_v51, %v782_v50  ;;  %v795_v57 = vld [vmem:[#allocation10 + $0xf8] sm:$0xff]  ;;  %v792_v59 = vld [vmem:[#allocation10 + $0xe0] sm:$0xff]  ;;  %v790_v61 = vld [vmem:[#allocation10 + $0xd0] sm:$0xff] }
  0xa9   : > { %3699 = vmatpush1.bf16.msra.mxu1 %v5270_v40  ;;  %582 = vmatprep.mubr.f32.mxu0 %v6068_v8  ;;  %v794_v62 = vld [vmem:[#allocation10 + $0xf0] sm:$0xff]  ;;  %v5295_v63 = vpack.c.bf16 %v795_v57, %v791_v55  ;;  %v797_v0 = vld [vmem:[#allocation10 + $0x108] sm:$0xff]  ;;  %v446_v2 = vld [vmem:[%s5226_s24 + $0x18] sm:$0xff]  ;;  %v5300_v3 = vpack.c.bf16 %v792_v59, %v788_v58 }
  0xaa   : > { %695 = vmatprep.mubr.f32.mxu1 %v6068_v8  ;;  %3669 = vmatprep.subr.bf16.mxu0 %v5274_v44  ;;  %v801_v1 = vld [vmem:[#allocation10 + $0x128] sm:$0xff]  ;;  %v799_v4 = vld [vmem:[#allocation10 + $0x118] sm:$0xff]  ;;  %v5304_v6 = vpack.c.bf16 %v794_v62, %v790_v61  ;;  %v796_v7 = vld [vmem:[#allocation10 + $0x100] sm:$0xff] }
  0xab   : > { %3169 = vmatmul.mubr.msk.f32.gmra.mrb[4].mxu0 %vm481_vm0, %v445_v48  ;;  %3701 = vmatprep.subr.bf16.mxu1 %v5279_v49  ;;  %v803_v5 = vld [vmem:[#allocation10 + $0x138] sm:$0xff]  ;;  %v800_v9 = vld [vmem:[#allocation10 + $0x120] sm:$0xff]  ;;  %v5308_v10 = vpack.c.bf16 %v801_v1, %v797_v0  ;;  %v798_v11 = vld [vmem:[#allocation10 + $0x110] sm:$0xff]  ;;  %v1023_v1 = vstv %s5345_s17 }
  0xac   : > { %3177 = vmatmul.mubr.msk.f32.gmra.mrb[4].mxu1 %vm481_vm0, %v445_v48  ;;  %3671 = vmatpush1.bf16.msra.mxu0 %v5283_v52  ;;  %v802_v12 = vld [vmem:[#allocation10 + $0x130] sm:$0xff]  ;;  %v5312_v13 = vpack.c.bf16 %v803_v5, %v799_v4  ;;  %v805_v15 = vld [vmem:[#allocation10 + $0x148] sm:$0xff]  ;;  %v447_v17 = vld [vmem:[%s5226_s24 + $0x20] sm:$0xff]  ;;  %v5317_v18 = vpack.c.bf16 %v800_v9, %v796_v7 }
  0xad   : > { %3703 = vmatpush1.bf16.msra.mxu1 %v5287_v56  ;;  %588 = vmatprep.mubr.f32.mxu0 %v6068_v8  ;;  %v809_v16 = vld [vmem:[#allocation10 + $0x168] sm:$0xff]  ;;  %v807_v20 = vld [vmem:[#allocation10 + $0x158] sm:$0xff]  ;;  %v5321_v22 = vpack.c.bf16 %v802_v12, %v798_v11  ;;  %v804_v25 = vld [vmem:[#allocation10 + $0x140] sm:$0xff] }
  0xae   : > { %701 = vmatprep.mubr.f32.mxu1 %v6068_v8  ;;  %3673 = vmatprep.subr.bf16.mxu0 %v5291_v60  ;;  %v811_v21 = vld [vmem:[#allocation10 + $0x178] sm:$0xff]  ;;  %v808_v26 = vld [vmem:[#allocation10 + $0x160] sm:$0xff]  ;;  %v5325_v28 = vpack.c.bf16 %v809_v16, %v805_v15  ;;  %v806_v29 = vld [vmem:[#allocation10 + $0x150] sm:$0xff]  ;;  %v1290_v15 = vstv %s1289_s30 }
  0xaf   : > { %3170 = vmatmul.mubr.msk.f32.gmra.mrb[6].mxu0 %vm481_vm0, %v446_v2  ;;  %3705 = vmatprep.subr.bf16.mxu1 %v5295_v63  ;;  %v810_v30 = vld [vmem:[#allocation10 + $0x170] sm:$0xff]  ;;  %v5329_v32 = vpack.c.bf16 %v811_v21, %v807_v20  ;;  %v813_v33 = vld [vmem:[#allocation10 + $0x188] sm:$0xff]  ;;  %v5334_v38 = vpack.c.bf16 %v808_v26, %v804_v25  ;;  %v815_v39 = vld [vmem:[#allocation10 + $0x198] sm:$0xff]  ;;  %v2076_v20 = vstv %s2075_s20  ;;  %v2600_v25 = vstv %s2599_s29 }
  0xb0   : > { %3178 = vmatmul.mubr.msk.f32.gmra.mrb[6].mxu1 %vm481_vm0, %v446_v2  ;;  %3675 = vmatpush1.bf16.msra.mxu0 %v5300_v3  ;;  %v817_v34 = vld [vmem:[#allocation10 + $0x1a8] sm:$0xff]  ;;  %v819_v41 = vld [vmem:[#allocation10 + $0x1b8] sm:$0xff]  ;;  %v5338_v42 = vpack.c.bf16 %v810_v30, %v806_v29  ;;  %v812_v43 = vld [vmem:[#allocation10 + $0x180] sm:$0xff] }
  0xb1   : > { %3707 = vmatpush1.bf16.msra.mxu1 %v5304_v6  ;;  %594 = vmatprep.mubr.f32.mxu0 %v6068_v8  ;;  %v448_v35 = vld [vmem:[%s5226_s24 + $0x28] sm:$0xff]  ;;  %v816_v45 = vld [vmem:[#allocation10 + $0x1a0] sm:$0xff]  ;;  %v5342_v46 = vpack.c.bf16 %v817_v34, %v813_v33  ;;  %v814_v47 = vld [vmem:[#allocation10 + $0x190] sm:$0xff]  ;;  %v5349_v50 = vpack.c.bf16 %v819_v41, %v815_v39 }
  0xb2   : > { %707 = vmatprep.mubr.f32.mxu1 %v6068_v8  ;;  %3677 = vmatprep.subr.bf16.mxu0 %v5308_v10  ;;  %v818_v48 = vld [vmem:[#allocation10 + $0x1b0] sm:$0xff]  ;;  %v821_v51 = vld [vmem:[#allocation10 + $0x1c8] sm:$0xff]  ;;  %v5354_v55 = vpack.c.bf16 %v816_v45, %v812_v43  ;;  %v823_v57 = vld [vmem:[#allocation10 + $0x1d8] sm:$0xff] }
  0xb3   : > { %3171 = vmatmul.mubr.msk.f32.gmra.mrb[8].mxu0 %vm481_vm0, %v447_v17  ;;  %3709 = vmatprep.subr.bf16.mxu1 %v5312_v13  ;;  %v825_v53 = vld [vmem:[#allocation10 + $0x1e8] sm:$0xff]  ;;  %v449_v54 = vld [vmem:[%s5226_s24 + $0x30] sm:$0xff]  ;;  %v827_v58 = vld [vmem:[#allocation10 + $0x1f8] sm:$0xff]  ;;  %v5358_v59 = vpack.c.bf16 %v818_v48, %v814_v47 }
  0xb4   : > { %3179 = vmatmul.mubr.msk.f32.gmra.mrb[8].mxu1 %vm481_vm0, %v447_v17  ;;  %3679 = vmatpush1.bf16.msra.mxu0 %v5317_v18  ;;  %v820_v61 = vld [vmem:[#allocation10 + $0x1c0] sm:$0xff]  ;;  %v5363_v0 = vld [vmem:[%s6043_s0] sm:$0xff]  ;;  %v5368_v2 = vpack.c.bf16 %v825_v53, %v821_v51  ;;  %v5373_v7 = vpack.c.bf16 %v827_v58, %v823_v57  ;;  %v450_v9 = vld [vmem:[%s5226_s24 + $0x38] sm:$0xff] }
  0xb5   : > { %3711 = vmatpush1.bf16.msra.mxu1 %v5321_v22  ;;  %600 = vmatprep.mubr.f32.mxu0 %v6068_v8  ;;  %v824_v62 = vld [vmem:[#allocation10 + $0x1e0] sm:$0xff]  ;;  %v822_v4 = vld [vmem:[#allocation10 + $0x1d0] sm:$0xff]  ;;  %vm1024_vm1 = vcmp.lt.s32.totalorder %v1023_v1, %v5363_v0  ;;  %vm1291_vm2 = vcmp.lt.s32.totalorder %v1290_v15, %v5363_v0  ;;  %vm2077_vm3 = vcmp.lt.s32.totalorder %v2076_v20, %v5363_v0  ;;  %v829_v33 = vld [vmem:[#allocation11 + $0x8] sm:$0xff] }
  0xb6   : > { %713 = vmatprep.mubr.f32.mxu1 %v6068_v8  ;;  %3681 = vmatprep.subr.bf16.mxu0 %v5325_v28  ;;  %v826_v5 = vld [vmem:[#allocation10 + $0x1f0] sm:$0xff]  ;;  %v5378_v11 = vpack.c.bf16 %v824_v62, %v820_v61  ;;  %v1025_v16 = vsel %vm1024_vm1, 1, %v6064_v14  ;;  %v1292_v21 = vsel %vm1291_vm2, 1, %v6064_v14  ;;  %v2078_v26 = vsel %vm2077_vm3, 1, %v6064_v14  ;;  %v828_v30 = vld [vmem:[#allocation11] sm:$0xff]  ;;  %v831_v41 = vld [vmem:[#allocation11 + $0x18] sm:$0xff] }
  0xb7   : > { %3172 = vmatmul.mubr.msk.f32.gmra.mrb[10].mxu0 %vm481_vm0, %v448_v35  ;;  %3713 = vmatprep.subr.bf16.mxu1 %v5329_v32  ;;  %v5383_v12 = vpack.c.bf16 %v826_v5, %v822_v4  ;;  %v5393_v17 = vld [vmem:[#allocation2] sm:$0xff]  ;;  %vm2601_vm4 = vcmp.lt.s32.totalorder %v2600_v25, %v5363_v0  ;;  %v5424_v34 = vpack.c.bf16 %v829_v33, %v828_v30  ;;  %v832_v45 = vld [vmem:[#allocation11 + $0x20] sm:$0xff]  ;;  %v833_v47 = vld [vmem:[#allocation11 + $0x28] sm:$0xff]  ;;  %v461_v25 = vlaneseq }
  0xb8   : > { %3180 = vmatmul.mubr.msk.f32.gmra.mrb[10].mxu1 %vm481_vm0, %v448_v35  ;;  %3683 = vmatpush1.bf16.msra.mxu0 %v5334_v38  ;;  %v2602_v29 = vsel %vm2601_vm4, 1, %v6064_v14  ;;  %v6066_v35 = vmov 0.0|0.0   ;;  %v830_v39 = vld [vmem:[#allocation11 + $0x10] sm:$0xff]  ;;  %v5434_v48 = vpack.c.bf16 %v833_v47, %v832_v45  ;;  %v835_v53 = vld [vmem:[#allocation11 + $0x38] sm:$0xff]  ;;  %v836_v57 = vld [vmem:[#allocation11 + $0x40] sm:$0xff] }
  0xb9   : > { %3715 = vmatpush1.bf16.msra.mxu1 %v5338_v42  ;;  %606 = vmatprep.mubr.f32.mxu0 %v6068_v8  ;;  %6092 = vst [vmem:[#allocation24_spill] sm:$0xff] %v5383_v12  ;;  %v5430_v43 = vpack.c.bf16 %v831_v41, %v830_v39  ;;  %v834_v51 = vld [vmem:[#allocation11 + $0x30] sm:$0xff]  ;;  %v837_v58 = vld [vmem:[#allocation11 + $0x48] sm:$0xff]  ;;  %v839_v1 = vld [vmem:[#allocation11 + $0x58] sm:$0xff] }
  0xba   : > { %719 = vmatprep.mubr.f32.mxu1 %v6068_v8  ;;  %3685 = vmatprep.subr.bf16.mxu0 %v5342_v46  ;;  %v5441_v61 = vpack.c.bf16 %v837_v58, %v836_v57  ;;  %v838_v62 = vld [vmem:[#allocation11 + $0x50] sm:$0xff]  ;;  %v840_v5 = vld [vmem:[#allocation11 + $0x60] sm:$0xff]  ;;  %v843_v20 = vld [vmem:[#allocation11 + $0x78] sm:$0xff] }
  0xbb   : > { %3173 = vmatmul.mubr.msk.f32.gmra.mrb[12].mxu0 %vm481_vm0, %v449_v54  ;;  %3717 = vmatprep.subr.bf16.mxu1 %v5349_v50  ;;  %v5446_v4 = vpack.c.bf16 %v839_v1, %v838_v62  ;;  %v459_v30 = vld [vmem:[%s6047_s4] sm:$0xf] }
  0xbc   : > { %3181 = vmatmul.mubr.msk.f32.gmra.mrb[12].mxu1 %vm481_vm0, %v449_v54  ;;  %3687 = vmatpush1.bf16.msra.mxu0 %v5354_v55  ;;  %v5437_v54 = vpack.c.bf16 %v835_v53, %v834_v51 }
  0xbd   : > { %3719 = vmatpush1.bf16.msra.mxu1 %v5358_v59  ;;  %612 = vmatprep.mubr.f32.mxu0 %v6068_v8 }
  0xbe   : > { %725 = vmatprep.mubr.f32.mxu1 %v6068_v8  ;;  %3689 = vmatprep.subr.bf16.mxu0 %v5368_v2 }
  0xbf   : > { %3174 = vmatmul.mubr.msk.f32.gmra.mrb[14].mxu0 %vm481_vm0, %v450_v9  ;;  %3721 = vmatprep.subr.bf16.mxu1 %v5373_v7 }
  0xc0   : > { %3182 = vmatmul.mubr.msk.f32.gmra.mrb[14].mxu1 %vm481_vm0, %v450_v9  ;;  %3691 = vmatpush1.bf16.msra.mxu0 %v5378_v11  ;;  %v841_v9 = vld [vmem:[#allocation11 + $0x68] sm:$0xff] }
  0xc1   : > { %3723 = vmatpush1.bf16.msra.mxu1 %v5383_v12  ;;  %916 = vmatprep.mubr.f32.mxu0 %v6068_v8  ;;  %v5450_v15 = vpack.c.bf16 %v841_v9, %v840_v5 }
  0xc2   : > { %987 = vmatprep.mubr.f32.mxu1 %v6068_v8  ;;  %1027 = vperm.xlu0 %4546, %v1025_v16   ;;  %v842_v16 = vld [vmem:[#allocation11 + $0x70] sm:$0xff] }
  0xc3   : > { %917 = vmatmul.mubr.f32.vlgmr.msra.gmra.mrb[0].mxu0 %v5393_v17  ;;  %3781 = vmatprep.subr.bf16.mxu1 %v5250_v23 }
  0xc4   : > { %988 = vmatmul.mubr.f32.vlgmr.msra.gmra.mrb[0].mxu1 %v5393_v17  ;;  %3724 = vmatprep.subr.bf16.mxu0 %v6066_v35 }
  0xc5   : > { %3783 = vmatpush1.bf16.msra.mxu1 %v5255_v27  ;;  %1253 = vmatprep.mubr.f32.mxu1 %v6068_v8 }
  0xc6   : > { %1294 = vperm.xlu0 %4546, %v1292_v21   ;;  %3785 = vmatprep.subr.bf16.mxu1 %v5264_v36  ;;  %v5454_v21 = vpack.c.bf16 %v843_v20, %v842_v16 }
  0xc7   : > { %3726 = vmatpush3.bf16.msra.mxu0 %v5424_v34  ;;  %3404 = vmatprep.mubr.msk.f32.mxu0 %vm4951_vm5, %v6068_v8 }
  0xc8   : > { %3727 = vmatprep.subr.bf16.mxu0 %v6066_v35 }
  0xc9   : > { %3787 = vmatpush1.bf16.msra.mxu1 %v5270_v40 }
  0xca   : > { %2080 = vperm.xlu0 %4546, %v2078_v26   ;;  %3789 = vmatprep.subr.bf16.mxu1 %v5279_v49  ;;  %v462_v26 = vshrl.u32 %v461_v25, 7 }
  0xcb   : > { %3729 = vmatpush3.bf16.msra.mxu0 %v5430_v43 }
  0xcc   : > { %3730 = vmatprep.subr.bf16.mxu0 %v6066_v35  ;;  %v467_v33 = vsub.s32 1, %v462_v26  ;;  %v475_v47 = vsub.s32 3, %v462_v26  ;;  %v471_v16 = vsub.s32 2, %v462_v26 }
  0xcd   : > { %3791 = vmatpush1.bf16.msra.mxu1 %v5287_v56 }
  0xce   : > { %2604 = vperm.xlu0 %4546, %v2602_v29   ;;  %3793 = vmatprep.subr.bf16.mxu1 %v5295_v63  ;;  %v463_v29 = vsub.s32 0, %v462_v26  ;;  %v5465_v41 = vrot.slane %v459_v30, %v467_v33  ;;  %v5469_v9 = vrot.slane %v459_v30, %v475_v47  ;;  %v5472_v25 = vrot.slane %v459_v30, %v471_v16 }
  0xcf   : > { %3732 = vmatpush3.bf16.msra.mxu0 %v5434_v48 }
  0xd0   : > { %3733 = vmatprep.subr.bf16.mxu0 %v6066_v35  ;;  %v5463_v39 = vrot.slane %v459_v30, %v463_v29 }
  0xd1   : > { %3795 = vmatpush1.bf16.msra.mxu1 %v5304_v6 }
  0xd2   : > { %3797 = vmatprep.subr.bf16.mxu1 %v5312_v13 }
  0xd3   : > { %3735 = vmatpush3.bf16.msra.mxu0 %v5437_v54 }
  0xd4   : > { %3736 = vmatprep.subr.bf16.mxu0 %v6066_v35 }
  0xd5   : > { %3799 = vmatpush1.bf16.msra.mxu1 %v5321_v22 }
  0xd6   : > { %3801 = vmatprep.subr.bf16.mxu1 %v5329_v32 }
  0xd7   : > { %3738 = vmatpush3.bf16.msra.mxu0 %v5441_v61 }
  0xd8   : > { %3739 = vmatprep.subr.bf16.mxu0 %v6066_v35 }
  0xd9   : > { %3803 = vmatpush1.bf16.msra.mxu1 %v5338_v42 }
  0xda   : > { %3805 = vmatprep.subr.bf16.mxu1 %v5349_v50 }
  0xdb   : > { %3741 = vmatpush3.bf16.msra.mxu0 %v5446_v4 }
  0xdc   : > { %3742 = vmatprep.subr.bf16.mxu0 %v6066_v35 }
  0xdd   : > { %3807 = vmatpush1.bf16.msra.mxu1 %v5358_v59 }
  0xde   : > { %3809 = vmatprep.subr.bf16.mxu1 %v5373_v7 }
  0xdf   : > { %3744 = vmatpush3.bf16.msra.mxu0 %v5450_v15 }
  0xe0   : > { %3745 = vmatprep.subr.bf16.mxu0 %v6066_v35 }
  0xe1   : > { %3811 = vmatpush1.bf16.msra.mxu1 %v5383_v12 }
  0xe2   : > { %3812 = vmatprep.subr.bf16.mxu1 %v6066_v35 }
  0xe3   : > { %3747 = vmatpush3.bf16.msra.mxu0 %v5454_v21 }
  0xe4   : > { %3749 = vmatprep.subr.bf16.mxu0 %v5248_v19 }
 0x196   : > { %v918_v45 = vpop.f32.mrb[0].mxu0 }
 0x197   : > { %v4364_v51 = vadd.f32 %v918_v45, %v5463_v39  ;;  %v989_v53 = vpop.f32.mrb[0].mxu1  ;;  %v920_v57 = vpop.f32.mrb[1].mxu0 }
 0x198   : > { %v4365_v58 = vadd.f32 %v920_v57, %v5465_v41  ;;  %v991_v62 = vpop.f32.mrb[1].mxu1  ;;  %v4380_v33 = vadd.f32 %v989_v53, %v5472_v25 }
 0x199   : > { %v3184_v1 = vmul.f32 -1.442695, %v4364_v51  ;;  %v4381_v20 = vadd.f32 %v991_v62, %v5469_v9 }
 0x19a   : > { %v3185_v5 = vmul.f32 -1.442695, %v4365_v58  ;;  %v1017_v58 = vld [vmem:[#allocation3] sm:$0xff] }
 0x19b   : > { %4548 = vpow2.f32 %v3184_v1  ;;  %v3186_v29 = vmul.f32 -1.442695, %v4381_v20  ;;  %v1028_v1 = vpop.permute.xlu0 %1027 }
 0x19c   : > { %4550 = vpow2.f32 %v3185_v5  ;;  %vm1029_vm6 = vcmp.eq.s32.totalorder %v1028_v1, 1  ;;  %v2862_v1 = vstv %s2861_s25 }
 0x19d   : > { %4552 = vpow2.f32 %v3186_v29  ;;  %vm2863_vm10 = vcmp.lt.s32.totalorder %v2862_v1, %v5363_v0 }
 0x19e   : > { %4554 = vtanh.f32 %v4380_v33 }
 0x1a5   : > { %v4549_v45 = vpop.eup %4548 }
 0x1a6   : > { %v4551_v14 = vpop.eup %4550  ;;  %v1001_v35 = vadd.f32 1.0, %v4549_v45  ;;  %v6093_v45 = vmov 0.0|0.0  }
 0x1a7   : > { %v1007_v57 = vadd.f32 1.0, %v4551_v14  ;;  %v4553_v47 = vpop.eup %4552 }
 0x1a8   : > { %4556 = vrcp.f32 %v1001_v35  ;;  %v4555_v51 = vpop.eup %4554  ;;  %v1014_v62 = vadd.f32 1.0, %v4553_v47  ;;  %v6094_v47 = vmov 0  }
 0x1a9   : > { %4558 = vrcp.f32 %v1007_v57  ;;  %v1814_v57 = vstv %s1813_s16 }
 0x1aa   : > { %4560 = vrcp.f32 %v1014_v62  ;;  %vm1815_vm8 = vcmp.lt.s32.totalorder %v1814_v57, %v5363_v0  ;;  %v2864_v62 = vsel %vm2863_vm10, 1, %v6094_v47 }
 0x1b2   : > { %v4557_v26 = vpop.eup %4556 }
 0x1b3   : > { %v4559_v5 = vpop.eup %4558  ;;  %v1019_v30 = vmul.f32 %v4557_v26, %v4555_v51  ;;  %v1816_v26 = vsel %vm1815_vm8, 1, %v6094_v47 }
 0x1b4   : > { %v1018_v16 = vmul.f32 %v4559_v5, %v1017_v58  ;;  %v4561_v29 = vpop.eup %4560 }
 0x1b6   : > { %v1020_v20 = vadd.f32 %v1019_v30, %v1018_v16  ;;  %v5549_v30 = vld [vmem:[%s6095_s19] ss:$0 sm:$0xff] }
 0x1b8   : > { %4562 = vtanh.f32 %v1020_v20  ;;  %v5475_v53 = vsel %vm1029_vm6, %v1020_v20, %v1017_v58  ;;  %v2338_v58 = vstv %s2337_s27 }
 0x1b9   : > { %vm2339_vm9 = vcmp.lt.s32.totalorder %v2338_v58, %v5363_v0 }
 0x1ba   : > { %v2340_v5 = vsel %vm2339_vm9, 1, %v6094_v47 }
 0x1c2   : > { %v4563_v33 = vpop.eup %4562 }
 0x1c3   : > { %v1022_v14 = vmul.f32 %v4563_v33, %v4561_v29 }
 0x1c5   : > { %v5478_v35 = vsel %vm1029_vm6, %v1022_v14, %v5393_v17  ;;  %3405 = vmatmul.mubr.msk.f32.vlgmr.msra.gmra.mrb[16].mxu0 %vm1029_vm6, %v1022_v14  ;;  %v1552_v17 = vstv %s1551_s28 }
 0x1c6   : > { %3751 = vmatpush1.bf16.msra.mxu0 %v5252_v24  ;;  %1254 = vmatmul.mubr.f32.vlgmr.msra.gmra.mrb[2].mxu1 %v5478_v35  ;;  %vm1553_vm7 = vcmp.lt.s32.totalorder %v1552_v17, %v5363_v0 }
 0x1c7   : > { %3753 = vmatprep.subr.bf16.mxu0 %v5259_v31  ;;  %1182 = vmatprep.mubr.f32.mxu0 %v6068_v8  ;;  %v1554_v51 = vsel %vm1553_vm7, 1, %v6094_v47 }
 0x1c8   : > { %3814 = vmatpush3.bf16.msra.mxu1 %v5424_v34  ;;  %3439 = vmatprep.mubr.msk.f32.mxu1 %vm4951_vm5, %v6068_v8 }
 0x1c9   : > { %3815 = vmatprep.subr.bf16.mxu1 %v6093_v45  ;;  %1556 = vperm.xlu1 %4547, %v1554_v51  }
 0x1ca   : > { %3755 = vmatpush1.bf16.msra.mxu0 %v5266_v37 }
 0x1cb   : > { %3757 = vmatprep.subr.bf16.mxu0 %v5274_v44 }
 0x1cc   : > { %3817 = vmatpush3.bf16.msra.mxu1 %v5430_v43 }
 0x1cd   : > { %3818 = vmatprep.subr.bf16.mxu1 %v6093_v45  ;;  %1818 = vperm.xlu1 %4547, %v1816_v26  }
 0x1ce   : > { %3759 = vmatpush1.bf16.msra.mxu0 %v5283_v52 }
 0x1cf   : > { %3761 = vmatprep.subr.bf16.mxu0 %v5291_v60 }
 0x1d0   : > { %3820 = vmatpush3.bf16.msra.mxu1 %v5434_v48 }
 0x1d1   : > { %3821 = vmatprep.subr.bf16.mxu1 %v6093_v45  ;;  %2342 = vperm.xlu1 %4547, %v2340_v5  }
 0x1d2   : > { %3763 = vmatpush1.bf16.msra.mxu0 %v5300_v3 }
 0x1d3   : > { %3765 = vmatprep.subr.bf16.mxu0 %v5308_v10 }
 0x1d4   : > { %3823 = vmatpush3.bf16.msra.mxu1 %v5437_v54 }
 0x1d5   : > { %3824 = vmatprep.subr.bf16.mxu1 %v6093_v45  ;;  %2866 = vperm.xlu1 %4547, %v2864_v62  }
 0x1d6   : > { %3767 = vmatpush1.bf16.msra.mxu0 %v5317_v18 }
 0x1d7   : > { %3769 = vmatprep.subr.bf16.mxu0 %v5325_v28 }
 0x1d8   : > { %3826 = vmatpush3.bf16.msra.mxu1 %v5441_v61 }
 0x1d9   : > { %3827 = vmatprep.subr.bf16.mxu1 %v6093_v45 }
 0x1da   : > { %3771 = vmatpush1.bf16.msra.mxu0 %v5334_v38 }
 0x1db   : > { %3773 = vmatprep.subr.bf16.mxu0 %v5342_v46 }
 0x1dc   : > { %3829 = vmatpush3.bf16.msra.mxu1 %v5446_v4 }
 0x1dd   : > { %3830 = vmatprep.subr.bf16.mxu1 %v6093_v45 }
 0x1de   : > { %3775 = vmatpush1.bf16.msra.mxu0 %v5354_v55 }
 0x1df   : > { %3777 = vmatprep.subr.bf16.mxu0 %v5368_v2 }
 0x1e0   : > { %3832 = vmatpush3.bf16.msra.mxu1 %v5450_v15 }
 0x1e1   : > { %3833 = vmatprep.subr.bf16.mxu1 %v6093_v45 }
 0x1e2   : > { %3779 = vmatpush1.bf16.msra.mxu0 %v5378_v11 }
 0x1e3   : > { %3837 = vmatprep.subr.bf16.mxu0 %v5248_v19 }
 0x1e4   : > { %3835 = vmatpush3.bf16.msra.mxu1 %v5454_v21 }
 0x1e5   : > { %1183 = vmatmul.mubr.f32.vlgmr.msra.gmra.mrb[2].mxu0 %v5478_v35  ;;  %3869 = vmatprep.subr.bf16.mxu1 %v5250_v23 }
 0x1e6   : > { %3839 = vmatpush1.bf16.msra.mxu0 %v5252_v24  ;;  %1444 = vmatprep.mubr.f32.mxu0 %v6068_v8 }
 0x1e7   : > { %3841 = vmatprep.subr.bf16.mxu0 %v5259_v31 }
 0x1ea   : > { %3843 = vmatpush1.bf16.msra.mxu0 %v5266_v37 }
 0x1eb   : > { %3845 = vmatprep.subr.bf16.mxu0 %v5274_v44 }
 0x1ee   : > { %3847 = vmatpush1.bf16.msra.mxu0 %v5283_v52 }
 0x1ef   : > { %3849 = vmatprep.subr.bf16.mxu0 %v5291_v60 }
 0x1f2   : > { %3851 = vmatpush1.bf16.msra.mxu0 %v5300_v3 }
 0x1f3   : > { %3853 = vmatprep.subr.bf16.mxu0 %v5308_v10 }
 0x1f6   : > { %3855 = vmatpush1.bf16.msra.mxu0 %v5317_v18 }
 0x1f7   : > { %3857 = vmatprep.subr.bf16.mxu0 %v5325_v28 }
 0x1fa   : > { %3859 = vmatpush1.bf16.msra.mxu0 %v5334_v38 }
 0x1fb   : > { %3861 = vmatprep.subr.bf16.mxu0 %v5342_v46 }
 0x1fe   : > { %3863 = vmatpush1.bf16.msra.mxu0 %v5354_v55 }
 0x1ff   : > { %3865 = vmatprep.subr.bf16.mxu0 %v5368_v2 }
 0x202   : > { %3867 = vmatpush1.bf16.msra.mxu0 %v5378_v11 }
 0x203   : > { %3900 = vmatprep.subr.bf16.mxu0 %v6093_v45 }
 0x298   : > { %v1107_v16 = vpop.f32.mrb[16].mxu0 }
 0x299   : > { %v1108_v20 = vadd.f32 %v5549_v30, %v1107_v16  ;;  %v3406_v29 = vpop.f32.mrb[17].mxu0  ;;  %v1255_v33 = vpop.f32.mrb[2].mxu1 }
 0x29a   : > { %v1257_v14 = vpop.f32.mrb[3].mxu1  ;;  %v4382_v5 = vadd.f32 %v1255_v33, %v5472_v25 }
 0x29b   : > { %1111 = vst [vmem:[%s5240_s21] sm:$0xff] %v1108_v20  ;;  %v4383_v26 = vadd.f32 %v1257_v14, %v5469_v9  ;;  %v1295_v14 = vpop.permute.xlu0 %1294 }
 0x29c   : > { %vm1296_vm11 = vcmp.eq.s32.totalorder %v1295_v14, 1 }
 0x29d   : > { %v3191_v1 = vmul.f32 -1.442695, %v4383_v26 }
 0x2b8   : > { %v1184_v17 = vpop.f32.mrb[2].mxu0 }
 0x2b9   : > { %v4366_v57 = vadd.f32 %v1184_v17, %v5463_v39  ;;  %v1186_v0 = vpop.f32.mrb[3].mxu0 }
 0x2ba   : > { %v4367_v51 = vadd.f32 %v1186_v0, %v5465_v41 }
 0x2bb   : > { %v3189_v47 = vmul.f32 -1.442695, %v4366_v57 }
 0x2bc   : > { %v3190_v58 = vmul.f32 -1.442695, %v4367_v51 }
 0x2bd   : > { %4564 = vpow2.f32 %v3189_v47 }
 0x2be   : > { %4566 = vpow2.f32 %v3190_v58 }
 0x2bf   : > { %4568 = vpow2.f32 %v3191_v1 }
 0x2c0   : > { %4570 = vtanh.f32 %v4382_v5 }
 0x2c7   : > { %v4565_v62 = vpop.eup %4564 }
 0x2c8   : > { %v4567_v16 = vpop.eup %4566  ;;  %v1267_v29 = vadd.f32 1.0, %v4565_v62 }
 0x2c9   : > { %v1273_v20 = vadd.f32 1.0, %v4567_v16  ;;  %v4569_v17 = vpop.eup %4568 }
 0x2ca   : > { %4572 = vrcp.f32 %v1267_v29  ;;  %v4571_v8 = vpop.eup %4570  ;;  %v1280_v51 = vadd.f32 1.0, %v4569_v17 }
 0x2cb   : > { %4574 = vrcp.f32 %v1273_v20 }
 0x2cc   : > { %4576 = vrcp.f32 %v1280_v51 }
 0x2d4   : > { %v4573_v0 = vpop.eup %4572 }
 0x2d5   : > { %v4575_v57 = vpop.eup %4574  ;;  %v1285_v47 = vmul.f32 %v4573_v0, %v4571_v8  ;;  %v6096_v8 = vmov 0.0  }
 0x2d6   : > { %v1284_v58 = vmul.f32 %v4575_v57, %v5475_v53  ;;  %v4577_v1 = vpop.eup %4576 }
 0x2d8   : > { %v1286_v26 = vadd.f32 %v1285_v47, %v1284_v58 }
 0x2da   : > { %4578 = vtanh.f32 %v1286_v26  ;;  %v5559_v33 = vsel %vm1296_vm11, %v1286_v26, %v5475_v53 }
 0x2e4   : > { %v4579_v5 = vpop.eup %4578 }
 0x2e5   : > { %v1288_v62 = vmul.f32 %v4579_v5, %v4577_v1 }
 0x2e7   : > { %v5562_v16 = vsel %vm1296_vm11, %v1288_v62, %v5478_v35  ;;  %3440 = vmatmul.mubr.msk.f32.vlgmr.msra.gmra.mrb[16].mxu1 %vm1296_vm11, %v1288_v62 }
 0x2e8   : > { %3871 = vmatpush1.bf16.msra.mxu1 %v5255_v27  ;;  %1445 = vmatmul.mubr.f32.vlgmr.msra.gmra.mrb[4].mxu0 %v5562_v16 }
 0x2e9   : > { %3873 = vmatprep.subr.bf16.mxu1 %v5264_v36  ;;  %1515 = vmatprep.mubr.f32.mxu1 %v6096_v8 }
 0x2ea   : > { %3902 = vmatpush3.bf16.msra.mxu0 %v5424_v34  ;;  %3474 = vmatprep.mubr.msk.f32.mxu0 %vm4951_vm5, %v6096_v8 }
 0x2eb   : > { %3903 = vmatprep.subr.bf16.mxu0 %v6093_v45 }
 0x2ec   : > { %3875 = vmatpush1.bf16.msra.mxu1 %v5270_v40 }
 0x2ed   : > { %3877 = vmatprep.subr.bf16.mxu1 %v5279_v49 }
 0x2ee   : > { %3905 = vmatpush3.bf16.msra.mxu0 %v5430_v43 }
 0x2ef   : > { %3906 = vmatprep.subr.bf16.mxu0 %v6093_v45 }
 0x2f0   : > { %3879 = vmatpush1.bf16.msra.mxu1 %v5287_v56 }
 0x2f1   : > { %3881 = vmatprep.subr.bf16.mxu1 %v5295_v63 }
 0x2f2   : > { %3908 = vmatpush3.bf16.msra.mxu0 %v5434_v48 }
 0x2f3   : > { %3909 = vmatprep.subr.bf16.mxu0 %v6093_v45 }
 0x2f4   : > { %3883 = vmatpush1.bf16.msra.mxu1 %v5304_v6 }
 0x2f5   : > { %3885 = vmatprep.subr.bf16.mxu1 %v5312_v13 }
 0x2f6   : > { %3911 = vmatpush3.bf16.msra.mxu0 %v5437_v54 }
 0x2f7   : > { %3912 = vmatprep.subr.bf16.mxu0 %v6093_v45 }
 0x2f8   : > { %3887 = vmatpush1.bf16.msra.mxu1 %v5321_v22 }
 0x2f9   : > { %3889 = vmatprep.subr.bf16.mxu1 %v5329_v32 }
 0x2fa   : > { %3914 = vmatpush3.bf16.msra.mxu0 %v5441_v61 }
 0x2fb   : > { %3915 = vmatprep.subr.bf16.mxu0 %v6093_v45 }
 0x2fc   : > { %3891 = vmatpush1.bf16.msra.mxu1 %v5338_v42 }
 0x2fd   : > { %3893 = vmatprep.subr.bf16.mxu1 %v5349_v50 }
 0x2fe   : > { %3917 = vmatpush3.bf16.msra.mxu0 %v5446_v4 }
 0x2ff   : > { %3918 = vmatprep.subr.bf16.mxu0 %v6093_v45 }
 0x300   : > { %3895 = vmatpush1.bf16.msra.mxu1 %v5358_v59 }
 0x301   : > { %3897 = vmatprep.subr.bf16.mxu1 %v5373_v7 }
 0x302   : > { %3920 = vmatpush3.bf16.msra.mxu0 %v5450_v15 }
 0x303   : > { %3921 = vmatprep.subr.bf16.mxu0 %v6093_v45 }
 0x304   : > { %3899 = vmatpush1.bf16.msra.mxu1 %v5383_v12 }
 0x305   : > { %3957 = vmatprep.subr.bf16.mxu1 %v5250_v23 }
 0x306   : > { %3923 = vmatpush3.bf16.msra.mxu0 %v5454_v21 }
 0x307   : > { %1516 = vmatmul.mubr.f32.vlgmr.msra.gmra.mrb[4].mxu1 %v5562_v16  ;;  %3925 = vmatprep.subr.bf16.mxu0 %v5248_v19 }
 0x308   : > { %3959 = vmatpush1.bf16.msra.mxu1 %v5255_v27  ;;  %1777 = vmatprep.mubr.f32.mxu1 %v6096_v8 }
 0x309   : > { %3961 = vmatprep.subr.bf16.mxu1 %v5264_v36 }
 0x30c   : > { %3963 = vmatpush1.bf16.msra.mxu1 %v5270_v40 }
 0x30d   : > { %3965 = vmatprep.subr.bf16.mxu1 %v5279_v49 }
 0x310   : > { %3967 = vmatpush1.bf16.msra.mxu1 %v5287_v56 }
 0x311   : > { %3969 = vmatprep.subr.bf16.mxu1 %v5295_v63 }
 0x314   : > { %3971 = vmatpush1.bf16.msra.mxu1 %v5304_v6 }
 0x315   : > { %3973 = vmatprep.subr.bf16.mxu1 %v5312_v13 }
 0x318   : > { %3975 = vmatpush1.bf16.msra.mxu1 %v5321_v22 }
 0x319   : > { %3977 = vmatprep.subr.bf16.mxu1 %v5329_v32 }
 0x31c   : > { %3979 = vmatpush1.bf16.msra.mxu1 %v5338_v42 }
 0x31d   : > { %3981 = vmatprep.subr.bf16.mxu1 %v5349_v50 }
 0x320   : > { %3983 = vmatpush1.bf16.msra.mxu1 %v5358_v59 }
 0x321   : > { %3985 = vmatprep.subr.bf16.mxu1 %v5373_v7 }
 0x324   : > { %3987 = vmatpush1.bf16.msra.mxu1 %v5383_v12 }
 0x325   : > { %3988 = vmatprep.subr.bf16.mxu1 %v6093_v45 }
 0x3ba   : > { %v1368_v53 = vpop.f32.mrb[16].mxu1 }
 0x3bb   : > { %v1369_v35 = vadd.f32 %v5549_v30, %v1368_v53  ;;  %v3441_v29 = vpop.f32.mrb[17].mxu1  ;;  %v1446_v20 = vpop.f32.mrb[4].mxu0 }
 0x3bc   : > { %v1448_v17 = vpop.f32.mrb[5].mxu0  ;;  %v4368_v51 = vadd.f32 %v1446_v20, %v5463_v39 }
 0x3bd   : > { %3193 = vst [vmem:[%s5240_s21 + $0x8] sm:$0xff] %v1369_v35  ;;  %v4369_v0 = vadd.f32 %v1448_v17, %v5465_v41 }
 0x3be   : > { %v3194_v47 = vmul.f32 -1.442695, %v4368_v51 }
 0x3bf   : > { %v3195_v57 = vmul.f32 -1.442695, %v4369_v0 }
 0x3c1   : > { %4580 = vpow2.f32 %v3195_v57  ;;  %v1557_v57 = vpop.permute.xlu1 %1556 }
 0x3c2   : > { %4582 = vpow2.f32 %v3194_v47  ;;  %vm1558_vm12 = vcmp.eq.s32.totalorder %v1557_v57, 1 }
 0x3cb   : > { %v4581_v58 = vpop.eup %4580 }
 0x3cc   : > { %v1535_v14 = vadd.f32 1.0, %v4581_v58  ;;  %v4583_v26 = vpop.eup %4582 }
 0x3cd   : > { %v1529_v5 = vadd.f32 1.0, %v4583_v26 }
 0x3ce   : > { %4584 = vrcp.f32 %v1535_v14 }
 0x3cf   : > { %4586 = vrcp.f32 %v1529_v5 }
 0x3d8   : > { %v4585_v1 = vpop.eup %4584 }
 0x3d9   : > { %v1546_v62 = vmul.f32 %v4585_v1, %v5559_v33  ;;  %v4587_v20 = vpop.eup %4586 }
 0x3da   : > { %v1517_v53 = vpop.f32.mrb[4].mxu1 }
 0x3db   : > { %v4384_v29 = vadd.f32 %v1517_v53, %v5472_v25  ;;  %v1519_v35 = vpop.f32.mrb[5].mxu1 }
 0x3dc   : > { %v4385_v17 = vadd.f32 %v1519_v35, %v5469_v9 }
 0x3dd   : > { %4588 = vtanh.f32 %v4384_v29 }
 0x3de   : > { %v3196_v0 = vmul.f32 -1.442695, %v4385_v17 }
 0x3e0   : > { %4590 = vpow2.f32 %v3196_v0 }
 0x3e7   : > { %v4589_v51 = vpop.eup %4588 }
 0x3e8   : > { %v1547_v47 = vmul.f32 %v4589_v51, %v4587_v20 }
 0x3ea   : > { %v4591_v58 = vpop.eup %4590  ;;  %v1548_v14 = vadd.f32 %v1547_v47, %v1546_v62 }
 0x3eb   : > { %v1542_v26 = vadd.f32 1.0, %v4591_v58 }
 0x3ec   : > { %4592 = vtanh.f32 %v1548_v14  ;;  %v5626_v1 = vsel %vm1558_vm12, %v1548_v14, %v5559_v33 }
 0x3ed   : > { %4594 = vrcp.f32 %v1542_v26 }
 0x3f6   : > { %v4593_v53 = vpop.eup %4592 }
 0x3f7   : > { %v4595_v5 = vpop.eup %4594 }
 0x3f8   : > { %v1550_v12 = vmul.f32 %v4595_v5, %v4593_v53 }
 0x3fa   : > { %v5629_v29 = vsel %vm1558_vm12, %v1550_v12, %v5562_v16  ;;  %3475 = vmatmul.mubr.msk.f32.vlgmr.msra.gmra.mrb[18].mxu0 %vm1558_vm12, %v1550_v12 }
 0x3fb   : > { %3927 = vmatpush1.bf16.msra.mxu0 %v5252_v24  ;;  %1778 = vmatmul.mubr.f32.vlgmr.msra.gmra.mrb[6].mxu1 %v5629_v29 }
 0x3fc   : > { %3929 = vmatprep.subr.bf16.mxu0 %v5259_v31  ;;  %1706 = vmatprep.mubr.f32.mxu0 %v6096_v8 }
 0x3fd   : > { %3990 = vmatpush3.bf16.msra.mxu1 %v5424_v34  ;;  %3509 = vmatprep.mubr.msk.f32.mxu1 %vm4951_vm5, %v6096_v8 }
 0x3fe   : > { %3991 = vmatprep.subr.bf16.mxu1 %v6093_v45 }
 0x3ff   : > { %3931 = vmatpush1.bf16.msra.mxu0 %v5266_v37 }
 0x400   : > { %3933 = vmatprep.subr.bf16.mxu0 %v5274_v44 }
 0x401   : > { %3993 = vmatpush3.bf16.msra.mxu1 %v5430_v43 }
 0x402   : > { %3994 = vmatprep.subr.bf16.mxu1 %v6093_v45 }
 0x403   : > { %3935 = vmatpush1.bf16.msra.mxu0 %v5283_v52 }
 0x404   : > { %3937 = vmatprep.subr.bf16.mxu0 %v5291_v60 }
 0x405   : > { %3996 = vmatpush3.bf16.msra.mxu1 %v5434_v48 }
 0x406   : > { %3997 = vmatprep.subr.bf16.mxu1 %v6093_v45 }
 0x407   : > { %3939 = vmatpush1.bf16.msra.mxu0 %v5300_v3 }
 0x408   : > { %3941 = vmatprep.subr.bf16.mxu0 %v5308_v10 }
 0x409   : > { %3999 = vmatpush3.bf16.msra.mxu1 %v5437_v54 }
 0x40a   : > { %4000 = vmatprep.subr.bf16.mxu1 %v6093_v45 }
 0x40b   : > { %3943 = vmatpush1.bf16.msra.mxu0 %v5317_v18 }
 0x40c   : > { %3945 = vmatprep.subr.bf16.mxu0 %v5325_v28 }
 0x40d   : > { %4002 = vmatpush3.bf16.msra.mxu1 %v5441_v61 }
 0x40e   : > { %4003 = vmatprep.subr.bf16.mxu1 %v6093_v45 }
 0x40f   : > { %3947 = vmatpush1.bf16.msra.mxu0 %v5334_v38 }
 0x410   : > { %3949 = vmatprep.subr.bf16.mxu0 %v5342_v46 }
 0x411   : > { %4005 = vmatpush3.bf16.msra.mxu1 %v5446_v4 }
 0x412   : > { %4006 = vmatprep.subr.bf16.mxu1 %v6093_v45 }
 0x413   : > { %3951 = vmatpush1.bf16.msra.mxu0 %v5354_v55 }
 0x414   : > { %3953 = vmatprep.subr.bf16.mxu0 %v5368_v2 }
 0x415   : > { %4008 = vmatpush3.bf16.msra.mxu1 %v5450_v15 }
 0x416   : > { %4009 = vmatprep.subr.bf16.mxu1 %v6093_v45 }
 0x417   : > { %3955 = vmatpush1.bf16.msra.mxu0 %v5378_v11 }
 0x418   : > { %4013 = vmatprep.subr.bf16.mxu0 %v5248_v19 }
 0x419   : > { %4011 = vmatpush3.bf16.msra.mxu1 %v5454_v21 }
 0x41a   : > { %1707 = vmatmul.mubr.f32.vlgmr.msra.gmra.mrb[6].mxu0 %v5629_v29  ;;  %4045 = vmatprep.subr.bf16.mxu1 %v5250_v23 }
 0x41b   : > { %4015 = vmatpush1.bf16.msra.mxu0 %v5252_v24  ;;  %1968 = vmatprep.mubr.f32.mxu0 %v6096_v8 }
 0x41c   : > { %4017 = vmatprep.subr.bf16.mxu0 %v5259_v31 }
 0x41f   : > { %4019 = vmatpush1.bf16.msra.mxu0 %v5266_v37 }
 0x420   : > { %4021 = vmatprep.subr.bf16.mxu0 %v5274_v44 }
 0x423   : > { %4023 = vmatpush1.bf16.msra.mxu0 %v5283_v52 }
 0x424   : > { %4025 = vmatprep.subr.bf16.mxu0 %v5291_v60 }
 0x427   : > { %4027 = vmatpush1.bf16.msra.mxu0 %v5300_v3 }
 0x428   : > { %4029 = vmatprep.subr.bf16.mxu0 %v5308_v10 }
 0x42b   : > { %4031 = vmatpush1.bf16.msra.mxu0 %v5317_v18 }
 0x42c   : > { %4033 = vmatprep.subr.bf16.mxu0 %v5325_v28 }
 0x42f   : > { %4035 = vmatpush1.bf16.msra.mxu0 %v5334_v38 }
 0x430   : > { %4037 = vmatprep.subr.bf16.mxu0 %v5342_v46 }
 0x433   : > { %4039 = vmatpush1.bf16.msra.mxu0 %v5354_v55 }
 0x434   : > { %4041 = vmatprep.subr.bf16.mxu0 %v5368_v2 }
 0x437   : > { %4043 = vmatpush1.bf16.msra.mxu0 %v5378_v11 }
 0x438   : > { %4076 = vmatprep.subr.bf16.mxu0 %v6093_v45 }
 0x4cd   : > { %v1630_v12 = vpop.f32.mrb[18].mxu0 }
 0x4ce   : > { %v1631_v33 = vadd.f32 %v5549_v30, %v1630_v12  ;;  %v3476_v16 = vpop.f32.mrb[19].mxu0  ;;  %v1779_v62 = vpop.f32.mrb[6].mxu1 }
 0x4cf   : > { %v1781_v35 = vpop.f32.mrb[7].mxu1  ;;  %v4386_v26 = vadd.f32 %v1779_v62, %v5472_v25 }
 0x4d0   : > { %3198 = vst [vmem:[%s5240_s21 + $0x10] sm:$0xff] %v1631_v33  ;;  %v4387_v58 = vadd.f32 %v1781_v35, %v5469_v9  ;;  %v1819_v35 = vpop.permute.xlu1 %1818 }
 0x4d1   : > { %vm1820_vm13 = vcmp.eq.s32.totalorder %v1819_v35, 1 }
 0x4d2   : > { %v3201_v14 = vmul.f32 -1.442695, %v4387_v58 }
 0x4ed   : > { %v1708_v17 = vpop.f32.mrb[6].mxu0 }
 0x4ee   : > { %v4370_v0 = vadd.f32 %v1708_v17, %v5463_v39  ;;  %v1710_v20 = vpop.f32.mrb[7].mxu0 }
 0x4ef   : > { %v4371_v57 = vadd.f32 %v1710_v20, %v5465_v41 }
 0x4f0   : > { %v3199_v51 = vmul.f32 -1.442695, %v4370_v0 }
 0x4f1   : > { %v3200_v47 = vmul.f32 -1.442695, %v4371_v57 }
 0x4f2   : > { %4596 = vpow2.f32 %v3199_v51 }
 0x4f3   : > { %4598 = vpow2.f32 %v3200_v47 }
 0x4f4   : > { %4600 = vpow2.f32 %v3201_v14 }
 0x4f5   : > { %4602 = vtanh.f32 %v4386_v26 }
 0x4fc   : > { %v4597_v53 = vpop.eup %4596 }
 0x4fd   : > { %v4599_v5 = vpop.eup %4598  ;;  %v1791_v12 = vadd.f32 1.0, %v4597_v53 }
 0x4fe   : > { %v1797_v33 = vadd.f32 1.0, %v4599_v5  ;;  %v4601_v16 = vpop.eup %4600 }
 0x4ff   : > { %4604 = vrcp.f32 %v1791_v12  ;;  %v4603_v17 = vpop.eup %4602  ;;  %v1804_v57 = vadd.f32 1.0, %v4601_v16 }
 0x500   : > { %4606 = vrcp.f32 %v1797_v33 }
 0x501   : > { %4608 = vrcp.f32 %v1804_v57 }
 0x509   : > { %v4605_v20 = vpop.eup %4604 }
 0x50a   : > { %v4607_v0 = vpop.eup %4606  ;;  %v1809_v51 = vmul.f32 %v4605_v20, %v4603_v17 }
 0x50b   : > { %v1808_v47 = vmul.f32 %v4607_v0, %v5626_v1  ;;  %v4609_v14 = vpop.eup %4608 }
 0x50d   : > { %v1810_v58 = vadd.f32 %v1809_v51, %v1808_v47 }
 0x50f   : > { %4610 = vtanh.f32 %v1810_v58  ;;  %v5693_v62 = vsel %vm1820_vm13, %v1810_v58, %v5626_v1  ;;  %v6097_v1 = vld [vmem:[#allocation24_spill] sm:$0xff] }
 0x519   : > { %v4611_v26 = vpop.eup %4610 }
 0x51a   : > { %v1812_v53 = vmul.f32 %v4611_v26, %v4609_v14 }
 0x51c   : > { %v5696_v5 = vsel %vm1820_vm13, %v1812_v53, %v5629_v29  ;;  %3510 = vmatmul.mubr.msk.f32.vlgmr.msra.gmra.mrb[18].mxu1 %vm1820_vm13, %v1812_v53 }
 0x51d   : > { %4047 = vmatpush1.bf16.msra.mxu1 %v5255_v27  ;;  %1969 = vmatmul.mubr.f32.vlgmr.msra.gmra.mrb[8].mxu0 %v5696_v5 }
 0x51e   : > { %4049 = vmatprep.subr.bf16.mxu1 %v5264_v36  ;;  %2039 = vmatprep.mubr.f32.mxu1 %v6096_v8 }
 0x51f   : > { %4078 = vmatpush3.bf16.msra.mxu0 %v5424_v34  ;;  %3544 = vmatprep.mubr.msk.f32.mxu0 %vm4951_vm5, %v6096_v8 }
 0x520   : > { %4079 = vmatprep.subr.bf16.mxu0 %v6093_v45 }
 0x521   : > { %4051 = vmatpush1.bf16.msra.mxu1 %v5270_v40 }
 0x522   : > { %4053 = vmatprep.subr.bf16.mxu1 %v5279_v49 }
 0x523   : > { %4081 = vmatpush3.bf16.msra.mxu0 %v5430_v43 }
 0x524   : > { %4082 = vmatprep.subr.bf16.mxu0 %v6093_v45 }
 0x525   : > { %4055 = vmatpush1.bf16.msra.mxu1 %v5287_v56 }
 0x526   : > { %4057 = vmatprep.subr.bf16.mxu1 %v5295_v63 }
 0x527   : > { %4084 = vmatpush3.bf16.msra.mxu0 %v5434_v48 }
 0x528   : > { %4085 = vmatprep.subr.bf16.mxu0 %v6093_v45 }
 0x529   : > { %4059 = vmatpush1.bf16.msra.mxu1 %v5304_v6 }
 0x52a   : > { %4061 = vmatprep.subr.bf16.mxu1 %v5312_v13 }
 0x52b   : > { %4087 = vmatpush3.bf16.msra.mxu0 %v5437_v54 }
 0x52c   : > { %4088 = vmatprep.subr.bf16.mxu0 %v6093_v45 }
 0x52d   : > { %4063 = vmatpush1.bf16.msra.mxu1 %v5321_v22 }
 0x52e   : > { %4065 = vmatprep.subr.bf16.mxu1 %v5329_v32 }
 0x52f   : > { %4090 = vmatpush3.bf16.msra.mxu0 %v5441_v61 }
 0x530   : > { %4091 = vmatprep.subr.bf16.mxu0 %v6093_v45 }
 0x531   : > { %4067 = vmatpush1.bf16.msra.mxu1 %v5338_v42 }
 0x532   : > { %4069 = vmatprep.subr.bf16.mxu1 %v5349_v50 }
 0x533   : > { %4093 = vmatpush3.bf16.msra.mxu0 %v5446_v4 }
 0x534   : > { %4094 = vmatprep.subr.bf16.mxu0 %v6093_v45 }
 0x535   : > { %4071 = vmatpush1.bf16.msra.mxu1 %v5358_v59 }
 0x536   : > { %4073 = vmatprep.subr.bf16.mxu1 %v5373_v7 }
 0x537   : > { %4096 = vmatpush3.bf16.msra.mxu0 %v5450_v15 }
 0x538   : > { %4097 = vmatprep.subr.bf16.mxu0 %v6093_v45 }
 0x539   : > { %4075 = vmatpush1.bf16.msra.mxu1 %v6097_v1 }
 0x53a   : > { %4133 = vmatprep.subr.bf16.mxu1 %v5250_v23 }
 0x53b   : > { %4099 = vmatpush3.bf16.msra.mxu0 %v5454_v21 }
 0x53c   : > { %2040 = vmatmul.mubr.f32.vlgmr.msra.gmra.mrb[8].mxu1 %v5696_v5  ;;  %4101 = vmatprep.subr.bf16.mxu0 %v5248_v19 }
 0x53d   : > { %4135 = vmatpush1.bf16.msra.mxu1 %v5255_v27  ;;  %2301 = vmatprep.mubr.f32.mxu1 %v6096_v8 }
 0x53e   : > { %4137 = vmatprep.subr.bf16.mxu1 %v5264_v36 }
 0x541   : > { %4139 = vmatpush1.bf16.msra.mxu1 %v5270_v40 }
 0x542   : > { %4141 = vmatprep.subr.bf16.mxu1 %v5279_v49 }
 0x545   : > { %4143 = vmatpush1.bf16.msra.mxu1 %v5287_v56 }
 0x546   : > { %4145 = vmatprep.subr.bf16.mxu1 %v5295_v63 }
 0x549   : > { %4147 = vmatpush1.bf16.msra.mxu1 %v5304_v6 }
 0x54a   : > { %4149 = vmatprep.subr.bf16.mxu1 %v5312_v13 }
 0x54d   : > { %4151 = vmatpush1.bf16.msra.mxu1 %v5321_v22 }
 0x54e   : > { %4153 = vmatprep.subr.bf16.mxu1 %v5329_v32 }
 0x551   : > { %4155 = vmatpush1.bf16.msra.mxu1 %v5338_v42 }
 0x552   : > { %4157 = vmatprep.subr.bf16.mxu1 %v5349_v50 }
 0x555   : > { %4159 = vmatpush1.bf16.msra.mxu1 %v5358_v59 }
 0x556   : > { %4161 = vmatprep.subr.bf16.mxu1 %v5373_v7 }
 0x559   : > { %4163 = vmatpush1.bf16.msra.mxu1 %v6097_v1 }
 0x55a   : > { %4164 = vmatprep.subr.bf16.mxu1 %v6093_v45 }
 0x5ef   : > { %v1892_v29 = vpop.f32.mrb[18].mxu1 }
 0x5f0   : > { %v1893_v12 = vadd.f32 %v5549_v30, %v1892_v29  ;;  %v3511_v33 = vpop.f32.mrb[19].mxu1  ;;  %v1970_v16 = vpop.f32.mrb[8].mxu0 }
 0x5f1   : > { %v1972_v17 = vpop.f32.mrb[9].mxu0  ;;  %v4372_v57 = vadd.f32 %v1970_v16, %v5463_v39 }
 0x5f2   : > { %3203 = vst [vmem:[%s5240_s21 + $0x18] sm:$0xff] %v1893_v12  ;;  %v4373_v20 = vadd.f32 %v1972_v17, %v5465_v41 }
 0x5f3   : > { %v3204_v51 = vmul.f32 -1.442695, %v4372_v57 }
 0x5f4   : > { %v3205_v0 = vmul.f32 -1.442695, %v4373_v20 }
 0x5f6   : > { %4612 = vpow2.f32 %v3205_v0 }
 0x5f7   : > { %4614 = vpow2.f32 %v3204_v51 }
 0x600   : > { %v4613_v47 = vpop.eup %4612 }
 0x601   : > { %v2059_v35 = vadd.f32 1.0, %v4613_v47  ;;  %v4615_v58 = vpop.eup %4614  ;;  %v2081_v47 = vpop.permute.xlu0 %2080 }
 0x602   : > { %v2053_v26 = vadd.f32 1.0, %v4615_v58  ;;  %vm2082_vm14 = vcmp.eq.s32.totalorder %v2081_v47, 1 }
 0x603   : > { %4616 = vrcp.f32 %v2059_v35 }
 0x604   : > { %4618 = vrcp.f32 %v2053_v26 }
 0x60d   : > { %v4617_v14 = vpop.eup %4616 }
 0x60e   : > { %v2070_v53 = vmul.f32 %v4617_v14, %v5693_v62  ;;  %v4619_v16 = vpop.eup %4618 }
 0x60f   : > { %v2041_v29 = vpop.f32.mrb[8].mxu1 }
 0x610   : > { %v4388_v33 = vadd.f32 %v2041_v29, %v5472_v25  ;;  %v2043_v12 = vpop.f32.mrb[9].mxu1 }
 0x611   : > { %v4389_v17 = vadd.f32 %v2043_v12, %v5469_v9 }
 0x612   : > { %4620 = vtanh.f32 %v4388_v33 }
 0x613   : > { %v3206_v20 = vmul.f32 -1.442695, %v4389_v17 }
 0x615   : > { %4622 = vpow2.f32 %v3206_v20 }
 0x61c   : > { %v4621_v0 = vpop.eup %4620 }
 0x61d   : > { %v2071_v57 = vmul.f32 %v4621_v0, %v4619_v16 }
 0x61f   : > { %v4623_v51 = vpop.eup %4622  ;;  %v2072_v35 = vadd.f32 %v2071_v57, %v2070_v53 }
 0x620   : > { %v2066_v58 = vadd.f32 1.0, %v4623_v51 }
 0x621   : > { %4624 = vtanh.f32 %v2072_v35  ;;  %v5760_v14 = vsel %vm2082_vm14, %v2072_v35, %v5693_v62 }
 0x622   : > { %4626 = vrcp.f32 %v2066_v58 }
 0x62b   : > { %v4625_v29 = vpop.eup %4624 }
 0x62c   : > { %v4627_v26 = vpop.eup %4626 }
 0x62d   : > { %v2074_v1 = vmul.f32 %v4627_v26, %v4625_v29 }
 0x62f   : > { %v5763_v33 = vsel %vm2082_vm14, %v2074_v1, %v5696_v5  ;;  %3545 = vmatmul.mubr.msk.f32.vlgmr.msra.gmra.mrb[20].mxu0 %vm2082_vm14, %v2074_v1 }
 0x630   : > { %4103 = vmatpush1.bf16.msra.mxu0 %v5252_v24  ;;  %2302 = vmatmul.mubr.f32.vlgmr.msra.gmra.mrb[10].mxu1 %v5763_v33 }
 0x631   : > { %4105 = vmatprep.subr.bf16.mxu0 %v5259_v31  ;;  %2230 = vmatprep.mubr.f32.mxu0 %v6096_v8 }
 0x632   : > { %4166 = vmatpush3.bf16.msra.mxu1 %v5424_v34  ;;  %3579 = vmatprep.mubr.msk.f32.mxu1 %vm4951_vm5, %v6096_v8 }
 0x633   : > { %4167 = vmatprep.subr.bf16.mxu1 %v6093_v45 }
 0x634   : > { %4107 = vmatpush1.bf16.msra.mxu0 %v5266_v37 }
 0x635   : > { %4109 = vmatprep.subr.bf16.mxu0 %v5274_v44 }
 0x636   : > { %4169 = vmatpush3.bf16.msra.mxu1 %v5430_v43 }
 0x637   : > { %4170 = vmatprep.subr.bf16.mxu1 %v6093_v45 }
 0x638   : > { %4111 = vmatpush1.bf16.msra.mxu0 %v5283_v52 }
 0x639   : > { %4113 = vmatprep.subr.bf16.mxu0 %v5291_v60 }
 0x63a   : > { %4172 = vmatpush3.bf16.msra.mxu1 %v5434_v48 }
 0x63b   : > { %4173 = vmatprep.subr.bf16.mxu1 %v6093_v45 }
 0x63c   : > { %4115 = vmatpush1.bf16.msra.mxu0 %v5300_v3 }
 0x63d   : > { %4117 = vmatprep.subr.bf16.mxu0 %v5308_v10 }
 0x63e   : > { %4175 = vmatpush3.bf16.msra.mxu1 %v5437_v54 }
 0x63f   : > { %4176 = vmatprep.subr.bf16.mxu1 %v6093_v45 }
 0x640   : > { %4119 = vmatpush1.bf16.msra.mxu0 %v5317_v18 }
 0x641   : > { %4121 = vmatprep.subr.bf16.mxu0 %v5325_v28 }
 0x642   : > { %4178 = vmatpush3.bf16.msra.mxu1 %v5441_v61 }
 0x643   : > { %4179 = vmatprep.subr.bf16.mxu1 %v6093_v45 }
 0x644   : > { %4123 = vmatpush1.bf16.msra.mxu0 %v5334_v38 }
 0x645   : > { %4125 = vmatprep.subr.bf16.mxu0 %v5342_v46 }
 0x646   : > { %4181 = vmatpush3.bf16.msra.mxu1 %v5446_v4 }
 0x647   : > { %4182 = vmatprep.subr.bf16.mxu1 %v6093_v45 }
 0x648   : > { %4127 = vmatpush1.bf16.msra.mxu0 %v5354_v55 }
 0x649   : > { %4129 = vmatprep.subr.bf16.mxu0 %v5368_v2 }
 0x64a   : > { %4184 = vmatpush3.bf16.msra.mxu1 %v5450_v15 }
 0x64b   : > { %4185 = vmatprep.subr.bf16.mxu1 %v6093_v45 }
 0x64c   : > { %4131 = vmatpush1.bf16.msra.mxu0 %v5378_v11 }
 0x64d   : > { %4189 = vmatprep.subr.bf16.mxu0 %v5248_v19 }
 0x64e   : > { %4187 = vmatpush3.bf16.msra.mxu1 %v5454_v21 }
 0x64f   : > { %2231 = vmatmul.mubr.f32.vlgmr.msra.gmra.mrb[10].mxu0 %v5763_v33  ;;  %4221 = vmatprep.subr.bf16.mxu1 %v5250_v23 }
 0x650   : > { %4191 = vmatpush1.bf16.msra.mxu0 %v5252_v24  ;;  %2492 = vmatprep.mubr.f32.mxu0 %v6096_v8 }
 0x651   : > { %4193 = vmatprep.subr.bf16.mxu0 %v5259_v31 }
 0x654   : > { %4195 = vmatpush1.bf16.msra.mxu0 %v5266_v37 }
 0x655   : > { %4197 = vmatprep.subr.bf16.mxu0 %v5274_v44 }
 0x658   : > { %4199 = vmatpush1.bf16.msra.mxu0 %v5283_v52 }
 0x659   : > { %4201 = vmatprep.subr.bf16.mxu0 %v5291_v60 }
 0x65c   : > { %4203 = vmatpush1.bf16.msra.mxu0 %v5300_v3 }
 0x65d   : > { %4205 = vmatprep.subr.bf16.mxu0 %v5308_v10 }
 0x660   : > { %4207 = vmatpush1.bf16.msra.mxu0 %v5317_v18 }
 0x661   : > { %4209 = vmatprep.subr.bf16.mxu0 %v5325_v28 }
 0x664   : > { %4211 = vmatpush1.bf16.msra.mxu0 %v5334_v38 }
 0x665   : > { %4213 = vmatprep.subr.bf16.mxu0 %v5342_v46 }
 0x668   : > { %4215 = vmatpush1.bf16.msra.mxu0 %v5354_v55 }
 0x669   : > { %4217 = vmatprep.subr.bf16.mxu0 %v5368_v2 }
 0x66c   : > { %4219 = vmatpush1.bf16.msra.mxu0 %v5378_v11 }
 0x66d   : > { %4252 = vmatprep.subr.bf16.mxu0 %v6093_v45 }
 0x702   : > { %v2154_v62 = vpop.f32.mrb[20].mxu0 }
 0x703   : > { %v2155_v5 = vadd.f32 %v5549_v30, %v2154_v62  ;;  %v3546_v1 = vpop.f32.mrb[21].mxu0  ;;  %v2303_v53 = vpop.f32.mrb[10].mxu1 }
 0x704   : > { %v2305_v12 = vpop.f32.mrb[11].mxu1  ;;  %v4390_v58 = vadd.f32 %v2303_v53, %v5472_v25 }
 0x705   : > { %3208 = vst [vmem:[%s5240_s21 + $0x20] sm:$0xff] %v2155_v5  ;;  %v4391_v47 = vadd.f32 %v2305_v12, %v5469_v9  ;;  %v2343_v12 = vpop.permute.xlu1 %2342 }
 0x706   : > { %vm2344_vm15 = vcmp.eq.s32.totalorder %v2343_v12, 1 }
 0x707   : > { %v3211_v35 = vmul.f32 -1.442695, %v4391_v47 }
 0x722   : > { %v2232_v17 = vpop.f32.mrb[10].mxu0 }
 0x723   : > { %v4374_v20 = vadd.f32 %v2232_v17, %v5463_v39  ;;  %v2234_v16 = vpop.f32.mrb[11].mxu0 }
 0x724   : > { %v4375_v0 = vadd.f32 %v2234_v16, %v5465_v41 }
 0x725   : > { %v3209_v57 = vmul.f32 -1.442695, %v4374_v20 }
 0x726   : > { %v3210_v51 = vmul.f32 -1.442695, %v4375_v0 }
 0x727   : > { %4628 = vpow2.f32 %v3209_v57 }
 0x728   : > { %4630 = vpow2.f32 %v3210_v51 }
 0x729   : > { %4632 = vpow2.f32 %v3211_v35 }
 0x72a   : > { %4634 = vtanh.f32 %v4390_v58 }
 0x731   : > { %v4629_v29 = vpop.eup %4628 }
 0x732   : > { %v4631_v26 = vpop.eup %4630  ;;  %v2315_v62 = vadd.f32 1.0, %v4629_v29 }
 0x733   : > { %v2321_v5 = vadd.f32 1.0, %v4631_v26  ;;  %v4633_v1 = vpop.eup %4632 }
 0x734   : > { %4636 = vrcp.f32 %v2315_v62  ;;  %v4635_v17 = vpop.eup %4634  ;;  %v2328_v0 = vadd.f32 1.0, %v4633_v1 }
 0x735   : > { %4638 = vrcp.f32 %v2321_v5 }
 0x736   : > { %4640 = vrcp.f32 %v2328_v0 }
 0x73e   : > { %v4637_v16 = vpop.eup %4636 }
 0x73f   : > { %v4639_v20 = vpop.eup %4638  ;;  %v2333_v57 = vmul.f32 %v4637_v16, %v4635_v17  ;;  %v2605_v16 = vpop.permute.xlu0 %2604 }
 0x740   : > { %v2332_v51 = vmul.f32 %v4639_v20, %v5760_v14  ;;  %v4641_v35 = vpop.eup %4640  ;;  %vm2606_vm0 = vcmp.eq.s32.totalorder %v2605_v16, 1 }
 0x742   : > { %v2334_v47 = vadd.f32 %v2333_v57, %v2332_v51 }
 0x744   : > { %4642 = vtanh.f32 %v2334_v47  ;;  %v5827_v53 = vsel %vm2344_vm15, %v2334_v47, %v5760_v14  ;;  %v6098_v14 = vld [vmem:[#allocation24_spill] sm:$0xff] }
 0x74e   : > { %v4643_v58 = vpop.eup %4642 }
 0x74f   : > { %v2336_v29 = vmul.f32 %v4643_v58, %v4641_v35 }
 0x751   : > { %v5830_v26 = vsel %vm2344_vm15, %v2336_v29, %v5763_v33  ;;  %3580 = vmatmul.mubr.msk.f32.vlgmr.msra.gmra.mrb[20].mxu1 %vm2344_vm15, %v2336_v29 }
 0x752   : > { %4223 = vmatpush1.bf16.msra.mxu1 %v5255_v27  ;;  %2493 = vmatmul.mubr.f32.vlgmr.msra.gmra.mrb[12].mxu0 %v5830_v26 }
 0x753   : > { %4225 = vmatprep.subr.bf16.mxu1 %v5264_v36  ;;  %2563 = vmatprep.mubr.f32.mxu1 %v6096_v8 }
 0x754   : > { %4254 = vmatpush3.bf16.msra.mxu0 %v5424_v34  ;;  %3614 = vmatprep.mubr.msk.f32.mxu0 %vm4951_vm5, %v6096_v8 }
 0x755   : > { %4255 = vmatprep.subr.bf16.mxu0 %v6093_v45 }
 0x756   : > { %4227 = vmatpush1.bf16.msra.mxu1 %v5270_v40 }
 0x757   : > { %4229 = vmatprep.subr.bf16.mxu1 %v5279_v49 }
 0x758   : > { %4257 = vmatpush3.bf16.msra.mxu0 %v5430_v43 }
 0x759   : > { %4258 = vmatprep.subr.bf16.mxu0 %v6093_v45 }
 0x75a   : > { %4231 = vmatpush1.bf16.msra.mxu1 %v5287_v56 }
 0x75b   : > { %4233 = vmatprep.subr.bf16.mxu1 %v5295_v63 }
 0x75c   : > { %4260 = vmatpush3.bf16.msra.mxu0 %v5434_v48 }
 0x75d   : > { %4261 = vmatprep.subr.bf16.mxu0 %v6093_v45 }
 0x75e   : > { %4235 = vmatpush1.bf16.msra.mxu1 %v5304_v6 }
 0x75f   : > { %4237 = vmatprep.subr.bf16.mxu1 %v5312_v13 }
 0x760   : > { %4263 = vmatpush3.bf16.msra.mxu0 %v5437_v54 }
 0x761   : > { %4264 = vmatprep.subr.bf16.mxu0 %v6093_v45 }
 0x762   : > { %4239 = vmatpush1.bf16.msra.mxu1 %v5321_v22 }
 0x763   : > { %4241 = vmatprep.subr.bf16.mxu1 %v5329_v32 }
 0x764   : > { %4266 = vmatpush3.bf16.msra.mxu0 %v5441_v61 }
 0x765   : > { %4267 = vmatprep.subr.bf16.mxu0 %v6093_v45 }
 0x766   : > { %4243 = vmatpush1.bf16.msra.mxu1 %v5338_v42 }
 0x767   : > { %4245 = vmatprep.subr.bf16.mxu1 %v5349_v50 }
 0x768   : > { %4269 = vmatpush3.bf16.msra.mxu0 %v5446_v4 }
 0x769   : > { %4270 = vmatprep.subr.bf16.mxu0 %v6093_v45 }
 0x76a   : > { %4247 = vmatpush1.bf16.msra.mxu1 %v5358_v59 }
 0x76b   : > { %4249 = vmatprep.subr.bf16.mxu1 %v5373_v7 }
 0x76c   : > { %4272 = vmatpush3.bf16.msra.mxu0 %v5450_v15 }
 0x76d   : > { %4273 = vmatprep.subr.bf16.mxu0 %v6093_v45 }
 0x76e   : > { %4251 = vmatpush1.bf16.msra.mxu1 %v6098_v14 }
 0x76f   : > { %4309 = vmatprep.subr.bf16.mxu1 %v5250_v23 }
 0x770   : > { %4275 = vmatpush3.bf16.msra.mxu0 %v5454_v21 }
 0x771   : > { %2564 = vmatmul.mubr.f32.vlgmr.msra.gmra.mrb[12].mxu1 %v5830_v26  ;;  %4277 = vmatprep.subr.bf16.mxu0 %v5248_v19 }
 0x772   : > { %4311 = vmatpush1.bf16.msra.mxu1 %v5255_v27  ;;  %2825 = vmatprep.mubr.f32.mxu1 %v6096_v8 }
 0x773   : > { %4313 = vmatprep.subr.bf16.mxu1 %v5264_v36 }
 0x776   : > { %4315 = vmatpush1.bf16.msra.mxu1 %v5270_v40 }
 0x777   : > { %4317 = vmatprep.subr.bf16.mxu1 %v5279_v49 }
 0x77a   : > { %4319 = vmatpush1.bf16.msra.mxu1 %v5287_v56 }
 0x77b   : > { %4321 = vmatprep.subr.bf16.mxu1 %v5295_v63 }
 0x77e   : > { %4323 = vmatpush1.bf16.msra.mxu1 %v5304_v6 }
 0x77f   : > { %4325 = vmatprep.subr.bf16.mxu1 %v5312_v13 }
 0x782   : > { %4327 = vmatpush1.bf16.msra.mxu1 %v5321_v22 }
 0x783   : > { %4329 = vmatprep.subr.bf16.mxu1 %v5329_v32 }
 0x786   : > { %4331 = vmatpush1.bf16.msra.mxu1 %v5338_v42 }
 0x787   : > { %4333 = vmatprep.subr.bf16.mxu1 %v5349_v50 }
 0x78a   : > { %4335 = vmatpush1.bf16.msra.mxu1 %v5358_v59 }
 0x78b   : > { %4337 = vmatprep.subr.bf16.mxu1 %v5373_v7 }
 0x78e   : > { %4339 = vmatpush1.bf16.msra.mxu1 %v6098_v14 }
 0x78f   : > { %4340 = vmatprep.subr.bf16.mxu1 %v6093_v45 }
 0x824   : > { %v2416_v19 = vpop.f32.mrb[20].mxu1 }
 0x825   : > { %v2417_v23 = vadd.f32 %v5549_v30, %v2416_v19  ;;  %v3581_v27 = vpop.f32.mrb[21].mxu1  ;;  %v2494_v36 = vpop.f32.mrb[12].mxu0 }
 0x826   : > { %v2496_v40 = vpop.f32.mrb[13].mxu0  ;;  %v4376_v63 = vadd.f32 %v2494_v36, %v5463_v39 }
 0x827   : > { %3213 = vst [vmem:[%s5240_s21 + $0x28] sm:$0xff] %v2417_v23  ;;  %v4377_v49 = vadd.f32 %v2496_v40, %v5465_v41 }
 0x828   : > { %v3214_v6 = vmul.f32 -1.442695, %v4376_v63 }
 0x829   : > { %v3215_v56 = vmul.f32 -1.442695, %v4377_v49 }
 0x82b   : > { %4644 = vpow2.f32 %v3215_v56 }
 0x82c   : > { %4646 = vpow2.f32 %v3214_v6 }
 0x835   : > { %v4645_v13 = vpop.eup %4644 }
 0x836   : > { %v2583_v22 = vadd.f32 1.0, %v4645_v13  ;;  %v4647_v32 = vpop.eup %4646 }
 0x837   : > { %v2577_v50 = vadd.f32 1.0, %v4647_v32 }
 0x838   : > { %4648 = vrcp.f32 %v2583_v22 }
 0x839   : > { %4650 = vrcp.f32 %v2577_v50 }
 0x842   : > { %v4649_v42 = vpop.eup %4648 }
 0x843   : > { %v2594_v59 = vmul.f32 %v4649_v42, %v5827_v53  ;;  %v4651_v1 = vpop.eup %4650 }
 0x844   : > { %v2565_v7 = vpop.f32.mrb[12].mxu1 }
 0x845   : > { %v4392_v30 = vadd.f32 %v2565_v7, %v5472_v25  ;;  %v2567_v33 = vpop.f32.mrb[13].mxu1 }
 0x846   : > { %v4393_v62 = vadd.f32 %v2567_v33, %v5469_v9 }
 0x847   : > { %4652 = vtanh.f32 %v4392_v30 }
 0x848   : > { %v3216_v5 = vmul.f32 -1.442695, %v4393_v62 }
 0x84a   : > { %4654 = vpow2.f32 %v3216_v5 }
 0x851   : > { %v4653_v17 = vpop.eup %4652 }
 0x852   : > { %v2595_v20 = vmul.f32 %v4653_v17, %v4651_v1 }
 0x854   : > { %v4655_v0 = vpop.eup %4654  ;;  %v2596_v57 = vadd.f32 %v2595_v20, %v2594_v59 }
 0x855   : > { %v2590_v51 = vadd.f32 1.0, %v4655_v0 }
 0x856   : > { %4656 = vtanh.f32 %v2596_v57  ;;  %v5894_v12 = vsel %vm2606_vm0, %v2596_v57, %v5827_v53 }
 0x857   : > { %4658 = vrcp.f32 %v2590_v51 }
 0x860   : > { %v4657_v47 = vpop.eup %4656 }
 0x861   : > { %v4659_v35 = vpop.eup %4658 }
 0x862   : > { %v2598_v58 = vmul.f32 %v4659_v35, %v4657_v47 }
 0x864   : > { %v5897_v29 = vsel %vm2606_vm0, %v2598_v58, %v5830_v26  ;;  %3615 = vmatmul.mubr.msk.f32.vlgmr.msra.gmra.mrb[22].mxu0 %vm2606_vm0, %v2598_v58 }
 0x865   : > { %4279 = vmatpush1.bf16.msra.mxu0 %v5252_v24  ;;  %2826 = vmatmul.mubr.f32.vlgmr.msra.gmra.mrb[14].mxu1 %v5897_v29 }
 0x866   : > { %4281 = vmatprep.subr.bf16.mxu0 %v5259_v31  ;;  %2754 = vmatprep.mubr.f32.mxu0 %v6096_v8  ;;  %v4676_v31 = vld [vmem:[%s6095_s19] ss:$0 sm:$0xff] }
 0x867   : > { %4342 = vmatpush3.bf16.msra.mxu1 %v5424_v34  ;;  %3649 = vmatprep.mubr.msk.f32.mxu1 %vm4951_vm5, %v6096_v8 }
 0x868   : > { %4343 = vmatprep.subr.bf16.mxu1 %v6093_v45 }
 0x869   : > { %4283 = vmatpush1.bf16.msra.mxu0 %v5266_v37 }
 0x86a   : > { %4285 = vmatprep.subr.bf16.mxu0 %v5274_v44 }
 0x86b   : > { %4345 = vmatpush3.bf16.msra.mxu1 %v5430_v43 }
 0x86c   : > { %4346 = vmatprep.subr.bf16.mxu1 %v6093_v45 }
 0x86d   : > { %4287 = vmatpush1.bf16.msra.mxu0 %v5283_v52 }
 0x86e   : > { %4289 = vmatprep.subr.bf16.mxu0 %v5291_v60 }
 0x86f   : > { %4348 = vmatpush3.bf16.msra.mxu1 %v5434_v48 }
 0x870   : > { %4349 = vmatprep.subr.bf16.mxu1 %v6093_v45 }
 0x871   : > { %4291 = vmatpush1.bf16.msra.mxu0 %v5300_v3 }
 0x872   : > { %4293 = vmatprep.subr.bf16.mxu0 %v5308_v10 }
 0x873   : > { %4351 = vmatpush3.bf16.msra.mxu1 %v5437_v54 }
 0x874   : > { %4352 = vmatprep.subr.bf16.mxu1 %v6093_v45 }
 0x875   : > { %4295 = vmatpush1.bf16.msra.mxu0 %v5317_v18 }
 0x876   : > { %4297 = vmatprep.subr.bf16.mxu0 %v5325_v28 }
 0x877   : > { %4354 = vmatpush3.bf16.msra.mxu1 %v5441_v61 }
 0x878   : > { %4355 = vmatprep.subr.bf16.mxu1 %v6093_v45 }
 0x879   : > { %4299 = vmatpush1.bf16.msra.mxu0 %v5334_v38 }
 0x87a   : > { %4301 = vmatprep.subr.bf16.mxu0 %v5342_v46 }
 0x87b   : > { %4357 = vmatpush3.bf16.msra.mxu1 %v5446_v4 }
 0x87c   : > { %4358 = vmatprep.subr.bf16.mxu1 %v6093_v45 }
 0x87d   : > { %4303 = vmatpush1.bf16.msra.mxu0 %v5354_v55 }
 0x87e   : > { %4305 = vmatprep.subr.bf16.mxu0 %v5368_v2 }
 0x87f   : > { %4360 = vmatpush3.bf16.msra.mxu1 %v5450_v15 }
 0x880   : > { %4361 = vmatprep.subr.bf16.mxu1 %v6093_v45  ;;  %v2867_v45 = vpop.permute.xlu1 %2866 }
 0x881   : > { %4307 = vmatpush1.bf16.msra.mxu0 %v5378_v11  ;;  %vm2868_vm1 = vcmp.eq.s32.totalorder %v2867_v45, 1 }
 0x883   : > { %4363 = vmatpush3.bf16.msra.mxu1 %v5454_v21 }
 0x884   : > { %2755 = vmatmul.mubr.f32.vlgmr.msra.gmra.mrb[14].mxu0 %v5897_v29 }
 0x937   : > { %v2678_v24 = vpop.f32.mrb[22].mxu0 }
 0x938   : > { %v2679_v37 = vadd.f32 %v4676_v31, %v2678_v24  ;;  %v3616_v44 = vpop.f32.mrb[23].mxu0  ;;  %v2827_v52 = vpop.f32.mrb[14].mxu1 }
 0x939   : > { %v2829_v60 = vpop.f32.mrb[15].mxu1  ;;  %v4394_v11 = vadd.f32 %v2827_v52, %v5472_v25 }
 0x93a   : > { %3218 = vst [vmem:[%s5240_s21 + $0x30] sm:$0xff] %v2679_v37  ;;  %v4395_v55 = vadd.f32 %v2829_v60, %v5469_v9 }
 0x93c   : > { %v3221_v2 = vmul.f32 -1.442695, %v4395_v55 }
 0x957   : > { %v2756_v3 = vpop.f32.mrb[14].mxu0 }
 0x958   : > { %v4378_v10 = vadd.f32 %v2756_v3, %v5463_v39  ;;  %v2758_v18 = vpop.f32.mrb[15].mxu0 }
 0x959   : > { %v4379_v28 = vadd.f32 %v2758_v18, %v5465_v41 }
 0x95a   : > { %v3219_v38 = vmul.f32 -1.442695, %v4378_v10 }
 0x95b   : > { %v3220_v46 = vmul.f32 -1.442695, %v4379_v28 }
 0x95c   : > { %4660 = vpow2.f32 %v3219_v38 }
 0x95d   : > { %4662 = vpow2.f32 %v3220_v46 }
 0x95e   : > { %4664 = vpow2.f32 %v3221_v2 }
 0x95f   : > { %4666 = vtanh.f32 %v4394_v11 }
 0x966   : > { %v4661_v34 = vpop.eup %4660 }
 0x967   : > { %v4663_v43 = vpop.eup %4662  ;;  %v2839_v48 = vadd.f32 1.0, %v4661_v34 }
 0x968   : > { %v2845_v54 = vadd.f32 1.0, %v4663_v43  ;;  %v4665_v61 = vpop.eup %4664 }
 0x969   : > { %4668 = vrcp.f32 %v2839_v48  ;;  %v4667_v4 = vpop.eup %4666  ;;  %v2852_v39 = vadd.f32 1.0, %v4665_v61 }
 0x96a   : > { %4670 = vrcp.f32 %v2845_v54 }
 0x96b   : > { %4672 = vrcp.f32 %v2852_v39 }
 0x973   : > { %v4669_v15 = vpop.eup %4668 }
 0x974   : > { %v4671_v21 = vpop.eup %4670  ;;  %v2857_v41 = vmul.f32 %v4669_v15, %v4667_v4 }
 0x975   : > { %v2856_v9 = vmul.f32 %v4671_v21, %v5894_v12  ;;  %v4673_v53 = vpop.eup %4672 }
 0x977   : > { %v2858_v8 = vadd.f32 %v2857_v41, %v2856_v9 }
 0x979   : > { %4674 = vtanh.f32 %v2858_v8  ;;  %v2869_v25 = vsel %vm2868_vm1, %v2858_v8, %v5894_v12 }
 0x97a   : > { %2870 = vst [vmem:[#allocation3] sm:$0xff] %v2869_v25 }
 0x981   : > { %v2952_v49 = vld [vmem:[#allocation3] sm:$0xff] (!%p3224_p6) }
 0x982   : > { %2953 = vst [vmem:[#allocation16] sm:$0xff] (!%p3224_p6), %v2952_v49 }
 0x983   : > { %v4675_v26 = vpop.eup %4674 }
 0x984   : > { %v2860_v14 = vmul.f32 %v4675_v26, %v4673_v53 }
 0x986   : > { %v2871_v19 = vsel %vm2868_vm1, %v2860_v14, %v5897_v29  ;;  %3650 = vmatmul.mubr.msk.f32.vlgmr.msra.gmra.mrb[22].mxu1 %vm2868_vm1, %v2860_v14 }
 0x987   : > { %2872 = vst [vmem:[#allocation2] sm:$0xff] %v2871_v19 }
 0x98e   : > { %v2950_v40 = vld [vmem:[#allocation2] sm:$0xff] (!%p3224_p6) }
 0x98f   : > { %2951 = vst [vmem:[#allocation14] sm:$0xff] (!%p3224_p6), %v2950_v40 }
 0xa56   : > { %2949 = sbr.rel (%p3224_p6) target bundleno = 2653 (0xa5d), region = 72 }
 0xa59   : > { %v2940_v23 = vpop.f32.mrb[22].mxu1 }
 0xa5a   : > { %v2941_v27 = vadd.f32 %v4676_v31, %v2940_v23  ;;  %v3651_v36 = vpop.f32.mrb[23].mxu1 }
 0xa5c   : > { %3223 = vst [vmem:[%s5240_s21 + $0x38] sm:$0xff] %v2941_v27 }
 0xa5d PF: > { %s4952_s30 = smov [#allocation14]   ;;  %s3235_s29 = sshll.u32 %s4929_s12, 10 }
 0xa5e   : > { %s2985_s20 = sshll.u32 %s4952_s30, 4  ;;  %p6099_p5 = scmp.ne.s32.totalorder %s6079_s18, 0  ;;  %s2986_s20 = int_to_ptr.vmem [resolvable:$true] %s2985_s20 }
 0xa5f   : > { %s4791_s15 = scalar_lea.vmem %s2986_s20, 128  ;;  %p4798_p0 = scmp.lt.s32.totalorder %s2986_s20, %s2986_s20 }
 0xa60   : > { %p4792_p3 = scmp.ne.s32.totalorder %s2986_s20, %s4791_s15  ;;  %p4799_p4 = scmp.lt.s32.totalorder %s4791_s15, %s4791_s15 }
 0xa62   : > { %p4793_p7 = pnand %p4792_p3, %p6099_p5  ;;  %p4800_p2 = por %p4799_p4, %p4798_p0 }
 0xa64   : > { %p4794_p9 = pneg %p4793_p7 }
 0xa66   : > { %p4801_p8 = pnand %p4800_p2, %p4794_p9 }
 0xa68   : > { %4804 = shalt.err (!%p4801_p8)
}
 0xa69   : > { %s6100_s16 = sld [smem:[#allocation27_spill]] }
 0xa6f   : > { %s4805_s27 = scalar_lea.hbm %s6100_s16, 128 }
 0xa70   : > { %p4806_p12 = scmp.ne.s32.totalorder %s6100_s16, %s4805_s27  ;;  %p4811_p13 = scmp.lt.u32.totalorder %s4805_s27, %s6100_s16 }
 0xa72   : > { %p4807_p1 = pnand %p4806_p12, %p6099_p5 }
 0xa74   : > { %p4808_p11 = pneg %p4807_p1 }
 0xa76   : > { %p4813_p6 = pnand %p4811_p13, %p4808_p11 }
 0xa78   : > { %4816 = shalt.err (!%p4813_p6)
}
 0xa79   : > { %4444 = dma.vmem_to_hbm [thread:$0]  (%p6099_p5), %s2986_s20, 128, %s6100_s16, [#allocation15]  }
 0xa7a   : > { %s6101_s6 = sld [smem:[#allocation26_spill]]  ;;  %s2969_s25 = sshll.u32 %s5240_s21, 4  ;;  %s5972_s25 = int_to_ptr.vmem [resolvable:$true] %s2969_s25 }
 0xa7b   : > { %s2955_s27 = scalar_lea.sflag [#allocation7], %s5222_s9  ;;  %s4817_s23 = scalar_lea.vmem %s5972_s25, 1024 }
 0xa7c   : > { %p4818_p3 = scmp.ne.s32.totalorder %s5972_s25, %s4817_s23  ;;  %s4953_s12 = smov [#allocation13]  }
 0xa7d   : > { %s4821_s24 = sshll.u32 %s4953_s12, 4  ;;  %s4822_s24 = int_to_ptr.vmem [resolvable:$false] %s4821_s24 }
 0xa7e   : > { %p4819_p7 = pnand %p4818_p3, %p5161_p10  ;;  %s4823_s20 = scalar_lea.vmem %s4822_s24, 2048 }
 0xa7f   : > { %p4824_p0 = scmp.lt.s32.totalorder %s5972_s25, %s4822_s24  ;;  %p4825_p4 = scmp.lt.s32.totalorder %s4823_s20, %s4817_s23 }
 0xa80   : > { %s5969_s28 = scalar_lea.hbm %s6101_s6, %s3235_s29  ;;  %p4820_p9 = pneg %p4819_p7 }
 0xa81   : > { %p4826_p2 = por %p4825_p4, %p4824_p0 }
 0xa83   : > { %p4827_p8 = pnand %p4826_p2, %p4820_p9 }
 0xa85   : > { %4830 = shalt.err (!%p4827_p8)
}
 0xa86   : > { %s4831_s21 = scalar_lea.hbm %s5969_s28, 1024  ;;  %s4835_s26 = scalar_lea.hbm %s6101_s6, 2048 }
 0xa87   : > { %p4832_p12 = scmp.ne.s32.totalorder %s5969_s28, %s4831_s21  ;;  %p4836_p13 = scmp.lt.u32.totalorder %s5969_s28, %s6101_s6 }
 0xa88   : > { %p4837_p6 = scmp.lt.u32.totalorder %s4835_s26, %s4831_s21  ;;  %p4839_p7 = scmp.lt.u32.totalorder %s4831_s21, %s5969_s28 }
 0xa89   : > { %p4833_p1 = pnand %p4832_p12, %p5161_p10 }
 0xa8a   : > { %p4838_p3 = por %p4837_p6, %p4836_p13 }
 0xa8b   : > { %p4834_p11 = pneg %p4833_p1 }
 0xa8c   : > { %p4840_p9 = por %p4839_p7, %p4838_p3 }
 0xa8e   : > { %p4841_p0 = pnand %p4840_p9, %p4834_p11 }
 0xa90   : > { %4844 = shalt.err (!%p4841_p0)
}
 0xa91   : > { %s4954_s23 = smov 128   ;;  %s4955_s12 = smov 8  }
 0xa92   : > { %4442 = dma.vmem_to_hbm [thread:$0]  (%p5161_p10), %s5972_s25, 1024, %s5969_s28, %s2955_s27, %s4954_s23, %s4954_s23, %s4955_s12  }
 0xa93   : > { %s4956_s24 = smov [#allocation16]  }
 0xa94   : > { %s2998_s20 = sshll.u32 %s4956_s24, 4  ;;  %s2999_s20 = int_to_ptr.vmem [resolvable:$true] %s2998_s20 }
 0xa95   : > { %s4845_s29 = scalar_lea.vmem %s2999_s20, 128  ;;  %p4852_p12 = scmp.lt.s32.totalorder %s2999_s20, %s2999_s20 }
 0xa96   : > { %p4846_p4 = scmp.ne.s32.totalorder %s2999_s20, %s4845_s29  ;;  %p4853_p1 = scmp.lt.s32.totalorder %s4845_s29, %s4845_s29 }
 0xa98   : > { %p4847_p2 = pnand %p4846_p4, %p6099_p5  ;;  %p4854_p11 = por %p4853_p1, %p4852_p12 }
 0xa9a   : > { %p4848_p8 = pneg %p4847_p2 }
 0xa9c   : > { %p4855_p13 = pnand %p4854_p11, %p4848_p8 }
 0xa9e   : > { %4858 = shalt.err (!%p4855_p13)
}
 0xa9f   : > { %s6102_s26 = sld [smem:[#allocation28_spill]] }
 0xaa5   : > { %s4859_s8 = scalar_lea.hbm %s6102_s26, 128 }
 0xaa6   : > { %p4860_p10 = scmp.ne.s32.totalorder %s6102_s26, %s4859_s8  ;;  %p4865_p7 = scmp.lt.u32.totalorder %s4859_s8, %s6102_s26 }
 0xaa8   : > { %p4861_p6 = pnand %p4860_p10, %p6099_p5 }
 0xaaa   : > { %p4862_p3 = pneg %p4861_p6 }
 0xaac   : > { %p4867_p9 = pnand %p4865_p7, %p4862_p3 }
 0xaae   : > { %4870 = shalt.err (!%p4867_p9)
}
 0xaaf   : > { %4446 = dma.vmem_to_hbm [thread:$0]  (%p6099_p5), %s2999_s20, 128, %s6102_s26, [#allocation15]  }
 0xab0   : > { %4908 = dma.done.wait (%p6099_p5), [#allocation15], 256  }
 0xab1   : > { %4910 = vsyncadd (%p6099_p5), [#allocation15], 4294967040 }
 0xab2 PF: > { %s6103_s23 = sld [smem:[#allocation22_spill]]  ;;  %s6104_s12 = sld [smem:[#allocation23_spill]] }
 0xab3   : > { %p6106_p4 = scmp.ge.s32.totalorder %s4937_s14, 2 }
 0xab8   : > { %s3018_s24 = sand.u32 1, %s6103_s23   ;;  %p6105_p0 = scmp.ne.s32.totalorder %s6104_s12, 0 }
 0xab9   : > { %s3019_s29 = scalar_lea.sflag [#allocation7], %s3018_s24 }
 0xaba   : > { %p4467_p2 = pnand %p6106_p4, %p6105_p0 }
 0xabc   : > { %4912 = dma.done.wait (!%p4467_p2), %s3019_s29, 1024  }
 0xabd   : > { %4914 = vsyncadd (!%p4467_p2), %s3019_s29, 4294966272  ;;  %s29_s14 = sadd.s32 1, %s4937_s14   ;;  %s6107_s30 = smov %s4921_s10 }
 0xabe   : > { %p26_p8 = scmp.ge.s32.totalorder %s29_s14, 4   ;;  %s6108_s10 = smov %s4925_s11 }
 0xabf   : > { %s6109_s11 = smov %s5173_s22  ;;  %s6110_s12 = smov %s4933_s13 }
 0xac0   : > { %s6111_s13 = smov %s6113_s7  ;;  %28 = sbr.rel (!%p26_p8) target bundleno = 14 (0xe), region = 148 }
 0xac7   :  { %3024 = vsyncpa [#allocation6], 1 }
 0xac8   :  { %3026 = vsyncpa [#allocation6 + $0x1], 1 }
 0xac9   :  { %3027 = vsyncpa [#allocation9], 1 }
 0xaca   :  { %3028 = vsyncpa [#allocation12], 1 }
 0xacb   :  { %3029 = vsyncpa [#allocation7], 1 }
 0xacc   :  { %3031 = vsyncpa [#allocation7 + $0x1], 1 }
 0xacd   :  { %3032 = vsyncpa [#allocation15], 1 }

</bundles_post_ra>
